<compile_context>
chip_gen: v6e
topology: v6e:2x2x1
jax: 0.10.0
libtpu: 0.0.40
codegen_flags: <defaults>
</compile_context>

<pallas_src>
import jax
import jax.numpy as jnp
from jax.experimental import pallas as pl
from jax.experimental.pallas import tpu as pltpu

# ---------------------------------------------------------------------------
# constants implied by the module
# ---------------------------------------------------------------------------
N_REF = 500
N_VOCAB = 1591
N_KEY = 8
D_IN = 1 + N_REF + N_VOCAB * N_KEY          # 13229
D_HID = 512


def _round_up(x, m):
    return (x + m - 1) // m * m


# ---------------------------------------------------------------------------
# Kernel 1: value head  (x @ W1) * col_scale + b1 -> tanh -> sum(h * w2) [+ b2]
# grid = (batch tiles, hidden tiles, K tiles); K reduction accumulated in a
# f32 VMEM scratch; each hidden tile writes a partial [TB,1] summed outside.
# ---------------------------------------------------------------------------
def _value_mlp_kernel(x_ref, w1_ref, scale_ref, b1_ref, w2_ref, o_ref, acc_ref):
    k = pl.program_id(2)

    @pl.when(k == 0)
    def _():
        acc_ref[...] = jnp.zeros_like(acc_ref)

    # bf16 x int8-dequant(bf16) -> f32 accumulate on the MXU.  The int8->bf16
    # cast is VPU work hidden under the (HBM-bound) W1 stream.
    acc_ref[...] += jnp.dot(x_ref[...], w1_ref[...].astype(jnp.bfloat16),
                            preferred_element_type=jnp.float32)

    @pl.when(k == pl.num_programs(2) - 1)
    def _():
        h = jnp.tanh(acc_ref[...] * scale_ref[...] + b1_ref[...])
        # second "matmul" has a single output column: broadcast-multiply (VPU)
        # + lane reduce (XLU) instead of driving the MXU with 1/256 occupancy.
        o_ref[0] = jnp.sum(h * w2_ref[...], axis=-1, keepdims=True)


def prepare_value_params(w1, b1, w2, b2, *, quantize_w1=True):
    """One-time weight prep (call OUTSIDE the hot path).

    w1: [D_IN, D_HID] (torch Linear weight.T), zero-padded to Kp rows (padded
    x columns then contribute exactly 0).  With quantize_w1=True the streamed
    weight is int8 with per-output-column f32 scales (precision trade vs the
    f32 PyTorch reference — set False for the bf16 path).
    """
    Kp = _round_up(D_IN, 128)                                    # 13312
    w1_pad = jnp.zeros((Kp, D_HID), jnp.float32).at[:D_IN, :].set(
        w1.astype(jnp.float32))
    if quantize_w1:
        amax = jnp.max(jnp.abs(w1_pad), axis=0, keepdims=True)   # (1, 512)
        scale = jnp.where(amax > 0.0, amax / 127.0, 1.0).astype(jnp.float32)
        w1_store = jnp.clip(jnp.round(w1_pad / scale), -127, 127).astype(jnp.int8)
    else:
        w1_store = w1_pad.astype(jnp.bfloat16)
        scale = jnp.ones((1, D_HID), jnp.float32)
    b1_p = b1.reshape(1, D_HID).astype(jnp.float32)
    w2_row = w2.reshape(1, D_HID).astype(jnp.float32)
    b2_p = b2.reshape(()).astype(jnp.float32)
    return w1_store, scale, b1_p, w2_row, b2_p


def value_head(x, w1_q, w1_scale, b1_p, w2_row, b2_p, *, tk=3328):
    """x: [B, D_IN] f32 -> [B] f32 (matches torch.squeeze(value_layer(x)))."""
    B = x.shape[0]
    Kp, Dh = w1_q.shape
    assert Kp % tk == 0                       # 13312 / 3328 = 4 K steps

    # Batch tiling: large TB at big B so W1 is re-streamed as rarely as possible.
    if B <= 256:
        TB = _round_up(B, 8)
        Bp = TB
    else:
        TB = 256
        Bp = _round_up(B, 256)

    # Hidden split (2 x 256 cols) only at small batch: each hidden tile pulls a
    # disjoint half of W1 -> both v7x TensorCores stream concurrently; W1 HBM
    # bytes stay at exactly one full pass.  At large B it would only re-stream
    # x on single-TC chips, so fall back to one 512-wide tile.
    NH = 2 if B <= 64 else 1
    TH = Dh // NH

    # small per-call copy (bf16 cast BEFORE pad -> half the pad bytes); the
    # ~6.8 MB int8 W1 is never re-padded / re-cast per call.
    x_p = jnp.pad(x.astype(jnp.bfloat16), ((0, Bp - B), (0, Kp - x.shape[1])))

    partial = pl.pallas_call(
        _value_mlp_kernel,
        out_shape=jax.ShapeDtypeStruct((NH, Bp, 1), jnp.float32),
        grid_spec=pltpu.PrefetchScalarGridSpec(
            num_scalar_prefetch=0,
            grid=(Bp // TB, NH, Kp // tk),
            in_specs=[
                pl.BlockSpec((TB, tk), lambda b, h, k: (b, k)),      # x
                pl.BlockSpec((tk, TH), lambda b, h, k: (k, h)),      # W1 (int8/bf16)
                pl.BlockSpec((1, TH), lambda b, h, k: (0, h)),       # col scales
                pl.BlockSpec((1, TH), lambda b, h, k: (0, h)),       # b1
                pl.BlockSpec((1, TH), lambda b, h, k: (0, h)),       # w2 row
            ],
            out_specs=pl.BlockSpec((1, TB, 1), lambda b, h, k: (h, b, 0)),
            scratch_shapes=[pltpu.VMEM((TB, TH), jnp.float32)],
        ),
        compiler_params=pltpu.CompilerParams(
            dimension_semantics=("parallel", "parallel", "arbitrary")),
    )(x_p, w1_q, w1_scale, b1_p, w2_row)

    # sum the hidden-tile partials (trivial) and add b2 once.
    return partial.sum(axis=0)[:B, 0] + b2_p


# ---------------------------------------------------------------------------
# Kernel 2: fused ref + keydown softmaxes, row-tiled over batch.
# Takes the logits at their natural widths (500 / 1591); also emits per-row
# logsumexp so downstream log-probs are `logit - lse` (exact, no log(probs)).
# ---------------------------------------------------------------------------
def _softmax_heads_kernel(ref_ref, kd_ref,
                          refp_ref, kdp_ref, reflse_ref, kdlse_ref):
    r = ref_ref[...]                                       # (TB, 500) f32
    m = jnp.max(r, axis=-1, keepdims=True)
    e = jnp.exp(r - m)
    s = jnp.sum(e, axis=-1, keepdims=True)
    refp_ref[...] = e / s
    reflse_ref[...] = m + jnp.log(s)

    kd = kd_ref[...]                                       # (TB, 8, 1591) f32
    mk = jnp.max(kd, axis=-1, keepdims=True)
    ek = jnp.exp(kd - mk)
    sk = jnp.sum(ek, axis=-1, keepdims=True)
    kdp_ref[...] = ek / sk
    kdlse_ref[...] = mk + jnp.log(sk)


def softmax_heads(ref_logits, kd_logits):
    """ref_logits: [B, 500] f32, kd_logits: [B, 8, 1591] f32 ->
    (ref_probs [B,500], kd_probs [B,8,1591], ref_lse [B,1], kd_lse [B,8,1])."""
    B = ref_logits.shape[0]
    if B <= 32:
        TB = _round_up(B, 8)
        Bp = TB
    else:
        TB = 32                              # ~1.8 MB/block: fits every chip's
        Bp = _round_up(B, 32)                # scoped-VMEM default (incl. v5e)
    if Bp != B:
        ref_logits = jnp.pad(ref_logits, ((0, Bp - B), (0, 0)))
        kd_logits = jnp.pad(kd_logits, ((0, Bp - B), (0, 0), (0, 0)))

    ref_probs, kd_probs, ref_lse, kd_lse = pl.pallas_call(
        _softmax_heads_kernel,
        out_shape=(
            jax.ShapeDtypeStruct((Bp, N_REF), jnp.float32),
            jax.ShapeDtypeStruct((Bp, N_KEY, N_VOCAB), jnp.float32),
            jax.ShapeDtypeStruct((Bp, 1), jnp.float32),
            jax.ShapeDtypeStruct((Bp, N_KEY, 1), jnp.float32),
        ),
        grid=(Bp // TB,),
        in_specs=[
            pl.BlockSpec((TB, N_REF), lambda r: (r, 0)),
            pl.BlockSpec((TB, N_KEY, N_VOCAB), lambda r: (r, 0, 0)),
        ],
        out_specs=[
            pl.BlockSpec((TB, N_REF), lambda r: (r, 0)),
            pl.BlockSpec((TB, N_KEY, N_VOCAB), lambda r: (r, 0, 0)),
            pl.BlockSpec((TB, 1), lambda r: (r, 0)),
            pl.BlockSpec((TB, N_KEY, 1), lambda r: (r, 0, 0)),
        ],
        compiler_params=pltpu.CompilerParams(
            dimension_semantics=("parallel",)),
    )(ref_logits, kd_logits)
    return ref_probs[:B], kd_probs[:B], ref_lse[:B], kd_lse[:B]


# ---------------------------------------------------------------------------
# ActorCritic.evaluate — JAX glue around the two Pallas kernels.
# (Categorical log_prob == selected logit - logsumexp of that row.)
# ---------------------------------------------------------------------------
def actor_critic_evaluate(ccnet5_output, action, ref, keydown,
                          w1_q, w1_scale, b1_p, w2_row, b2_p):
    B = ccnet5_output.shape[0]

    # --- action binary probs: min-max normalize [a, 1-a], clamp degenerate ---
    a0 = ccnet5_output[:, 0]
    pp = jnp.stack([a0, 1.0 - a0], axis=1)                      # [B, 2]
    mn = jnp.min(pp, axis=1, keepdims=True)
    mx = jnp.max(pp, axis=1, keepdims=True)
    denom = mx - mn
    # guard a0 == 0.5 (original PyTorch divides by zero -> NaN); normal-case
    # results are identical.
    norm = jnp.where(denom > 0, (pp - mn) / jnp.where(denom > 0, denom, 1.0), 0.5)
    p0_is_one = norm[:, 0:1] == 1.0
    p1_is_one = norm[:, 1:2] == 1.0
    action_probs = jnp.where(p0_is_one, jnp.array([0.9, 0.1]),
                             jnp.where(p1_is_one, jnp.array([0.1, 0.9]), norm))
    action_logprobs = jnp.log(
        jnp.take_along_axis(action_probs, action[:, None], axis=1)[:, 0])
    action_dist_probs = action_probs

    # --- fused ref + keydown softmaxes (one Pallas call, no staging buffer) --
    ref_logits = ccnet5_output[:, 1:1 + N_REF]                   # [B, 500]
    kd_logits = ccnet5_output[:, 1 + N_REF:].reshape(B, N_KEY, N_VOCAB)

    ref_probs, kd_probs, ref_lse, kd_lse = softmax_heads(ref_logits, kd_logits)
    ref_dist_probs = ref_probs
    keydown_dist_probs = [kd_probs[:, i:i + 1, :] for i in range(N_KEY)]  # [B,1,1591]

    # log-probs via logit - logsumexp (exact; no exp->reciprocal->log round trip)
    ref_sel = jnp.take_along_axis(ref_logits, ref[:, None], axis=1)[:, 0]
    ref_logprobs = ref_sel - ref_lse[:, 0]

    kd_sel = jnp.take_along_axis(kd_logits, keydown[:, :, None], axis=2)[:, :, 0]
    kd_logp = kd_sel - kd_lse[:, :, 0]                           # [B, 8]
    keydown_logprobs = [kd_logp[:, i:i + 1] for i in range(N_KEY)]        # [B,1] each

    # --- value head (Pallas MLP kernel, int8 W1 stream) -----------------------
    state_value = value_head(ccnet5_output, w1_q, w1_scale, b1_p, w2_row, b2_p)

    # TODO(synk): remote CCNet-T5 HTTP call / tokenizer / Categorical sampling
    # in `act` have no tensor-compute equivalent and are not translated.
    return (action_logprobs, state_value, action_dist_probs,
            ref_logprobs, ref_dist_probs, keydown_logprobs, keydown_dist_probs)


# ---------------------------------------------------------------------------
if __name__ == "__main__":
    key = jax.random.PRNGKey(0)
    k1, k2, k3, k4, k5 = jax.random.split(key, 5)

    B = 2
    # synthetic "ccnet5_output_tensor" [B, 13229]
    ccnet_out = jax.random.normal(k1, (B, D_IN), jnp.float32)

    # deterministic value-layer parameters (torch Linear weight is (out, in);
    # here we pass the (in, out) transpose directly).
    w1 = jax.random.normal(k2, (D_IN, D_HID), jnp.float32) * 0.02
    b1 = jax.random.normal(k3, (D_HID,), jnp.float32) * 0.01
    w2 = jax.random.normal(k4, (D_HID, 1), jnp.float32) * 0.02
    b2 = jnp.zeros((1,), jnp.float32)

    # one-time weight prep (pad + per-column int8 quant) — NOT repeated per call
    params = prepare_value_params(w1, b1, w2, b2, quantize_w1=True)

    action = jnp.array([0, 1], dtype=jnp.int32)
    ref = jnp.array([3, 417], dtype=jnp.int32)
    keydown = jax.random.randint(k5, (B, N_KEY), 0, N_VOCAB, dtype=jnp.int32)

    eval_fn = jax.jit(actor_critic_evaluate)
    outs = eval_fn(ccnet_out, action, ref, keydown, *params)
    jax.block_until_ready(outs)
    print("KERNEL_OK")
</pallas_src>

<mosaic_0001>
module attributes {stable_mosaic.version = 11 : i64} {
  func.func @_value_mlp_kernel(%arg0: i32, %arg1: i32, %arg2: i32, %arg3: memref<8x3328xbf16, #tpu.memory_space<vmem>>, %arg4: memref<3328x256xi8, #tpu.memory_space<vmem>>, %arg5: memref<1x256xf32, #tpu.memory_space<vmem>>, %arg6: memref<1x256xf32, #tpu.memory_space<vmem>>, %arg7: memref<1x256xf32, #tpu.memory_space<vmem>>, %arg8: memref<1x8x1xf32, #tpu.memory_space<vmem>>, %arg9: memref<8x256xf32, #tpu.memory_space<vmem>>) attributes {dimension_semantics = [#tpu.dimension_semantics<parallel>, #tpu.dimension_semantics<parallel>, #tpu.dimension_semantics<arbitrary>], iteration_bounds = array<i64: 1, 2, 4>, scalar_prefetch = 0 : i64, scratch_operands = 1 : i64, tpu.core_type = #tpu.core_type<tc>, window_params = [{transform_indices = @transform_0, window_bounds = array<i64: 8, 3328>}, {transform_indices = @transform_1, window_bounds = array<i64: 3328, 256>}, {transform_indices = @transform_2, window_bounds = array<i64: 1, 256>}, {transform_indices = @transform_3, window_bounds = array<i64: 1, 256>}, {transform_indices = @transform_4, window_bounds = array<i64: 1, 256>}, {transform_indices = @transform_5, window_bounds = array<i64: 1, 8, 1>}]} {
    %c0_i32 = arith.constant 0 : i32
    %0 = arith.cmpi eq, %arg2, %c0_i32 : i32
    %1 = arith.extui %0 : i1 to i32
    %c0_i32_0 = arith.constant 0 : i32
    %2 = arith.cmpi ne, %1, %c0_i32_0 : i32
    scf.if %2 {
      %cst_9 = arith.constant 0.000000e+00 : f32
      %13 = vector.broadcast %cst_9 : f32 to vector<8x256xf32>
      %c0_10 = arith.constant 0 : index
      %c0_11 = arith.constant 0 : index
      %14 = vector.load %arg9[%c0_10, %c0_11] : memref<8x256xf32, #tpu.memory_space<vmem>>, vector<8x256xf32>
      tpu.vector_store %arg9[%c0_10, %c0_11], %13 {strides = array<i32>} : memref<8x256xf32, #tpu.memory_space<vmem>>, vector<8x256xf32>,
    } else {
    }
    %c0 = arith.constant 0 : index
    %c0_1 = arith.constant 0 : index
    %3 = vector.load %arg9[%c0, %c0_1] : memref<8x256xf32, #tpu.memory_space<vmem>>, vector<8x256xf32>
    %c0_2 = arith.constant 0 : index
    %c0_3 = arith.constant 0 : index
    %4 = vector.load %arg3[%c0_2, %c0_3] : memref<8x3328xbf16, #tpu.memory_space<vmem>>, vector<8x3328xbf16>
    %c0_4 = arith.constant 0 : index
    %c0_5 = arith.constant 0 : index
    %5 = vector.load %arg4[%c0_4, %c0_5] : memref<3328x256xi8, #tpu.memory_space<vmem>>, vector<3328x256xi8>
    %6 = arith.sitofp %5 : vector<3328x256xi8> to vector<3328x256xbf16>
    %cst = arith.constant dense<0.000000e+00> : vector<8x256xf32>
    %7 = tpu.matmul %4, %6, %cst {dimension_numbers = #tpu.dot_dimension_numbers<[1], [0], [0], [1], [0, 0, 1, 1], [], []>} : vector<8x3328xbf16>, vector<3328x256xbf16>, vector<8x256xf32> -> vector<8x256xf32>
    %8 = arith.addf %3, %7 : vector<8x256xf32>
    %c0_6 = arith.constant 0 : index
    %c0_7 = arith.constant 0 : index
    %9 = vector.load %arg9[%c0_6, %c0_7] : memref<8x256xf32, #tpu.memory_space<vmem>>, vector<8x256xf32>
    tpu.vector_store %arg9[%c0_6, %c0_7], %8 {strides = array<i32>} : memref<8x256xf32, #tpu.memory_space<vmem>>, vector<8x256xf32>,
    %c3_i32 = arith.constant 3 : i32
    %10 = arith.cmpi eq, %arg2, %c3_i32 : i32
    %11 = arith.extui %10 : i1 to i32
    %c0_i32_8 = arith.constant 0 : i32
    %12 = arith.cmpi ne, %11, %c0_i32_8 : i32
    scf.if %12 {
      %c0_9 = arith.constant 0 : index
      %c0_10 = arith.constant 0 : index
      %13 = vector.load %arg9[%c0_9, %c0_10] : memref<8x256xf32, #tpu.memory_space<vmem>>, vector<8x256xf32>
      %c0_11 = arith.constant 0 : index
      %c0_12 = arith.constant 0 : index
      %14 = vector.load %arg5[%c0_11, %c0_12] : memref<1x256xf32, #tpu.memory_space<vmem>>, vector<1x256xf32>
      %15 = vector.broadcast %14 : vector<1x256xf32> to vector<8x256xf32>
      %16 = arith.mulf %13, %15 : vector<8x256xf32>
      %c0_13 = arith.constant 0 : index
      %c0_14 = arith.constant 0 : index
      %17 = vector.load %arg6[%c0_13, %c0_14] : memref<1x256xf32, #tpu.memory_space<vmem>>, vector<1x256xf32>
      %18 = vector.broadcast %17 : vector<1x256xf32> to vector<8x256xf32>
      %19 = arith.addf %16, %18 : vector<8x256xf32>
      %20 = math.tanh %19 : vector<8x256xf32>
      %c0_15 = arith.constant 0 : index
      %c0_16 = arith.constant 0 : index
      %21 = vector.load %arg7[%c0_15, %c0_16] : memref<1x256xf32, #tpu.memory_space<vmem>>, vector<1x256xf32>
      %22 = vector.broadcast %21 : vector<1x256xf32> to vector<8x256xf32>
      %23 = arith.mulf %20, %22 : vector<8x256xf32>
      %cst_17 = arith.constant dense<0.000000e+00> : vector<8xf32>
      %24 = vector.multi_reduction <add>, %23, %cst_17 [1] : vector<8x256xf32> to vector<8xf32>
      %25 = vector.shape_cast %24 : vector<8xf32> to vector<8x1xf32>
      %c0_18 = arith.constant 0 : index
      %c0_19 = arith.constant 0 : index
      %c0_20 = arith.constant 0 : index
      %26 = vector.load %arg8[%c0_18, %c0_19, %c0_20] : memref<1x8x1xf32, #tpu.memory_space<vmem>>, vector<1x8x1xf32>
      %27 = vector.shape_cast %26 : vector<1x8x1xf32> to vector<8x1xf32>
      %28 = vector.shape_cast %25 : vector<8x1xf32> to vector<1x8x1xf32>
      tpu.vector_store %arg8[%c0_18, %c0_19, %c0_20], %28 {strides = array<i32>} : memref<1x8x1xf32, #tpu.memory_space<vmem>>, vector<1x8x1xf32>,
    } else {
    }
    return
  }
  func.func @transform_0(%arg0: i32, %arg1: i32, %arg2: i32) -> (i32, i32) {
    %c0_i32 = arith.constant 0 : i32
    return %arg0, %arg2 : i32, i32
  }
  func.func @transform_1(%arg0: i32, %arg1: i32, %arg2: i32) -> (i32, i32) {
    %c0_i32 = arith.constant 0 : i32
    return %arg2, %arg1 : i32, i32
  }
  func.func @transform_2(%arg0: i32, %arg1: i32, %arg2: i32) -> (i32, i32) {
    %c0_i32 = arith.constant 0 : i32
    %c0_i32_0 = arith.constant 0 : i32
    return %c0_i32, %arg1 : i32, i32
  }
  func.func @transform_3(%arg0: i32, %arg1: i32, %arg2: i32) -> (i32, i32) {
    %c0_i32 = arith.constant 0 : i32
    %c0_i32_0 = arith.constant 0 : i32
    return %c0_i32, %arg1 : i32, i32
  }
  func.func @transform_4(%arg0: i32, %arg1: i32, %arg2: i32) -> (i32, i32) {
    %c0_i32 = arith.constant 0 : i32
    %c0_i32_0 = arith.constant 0 : i32
    return %c0_i32, %arg1 : i32, i32
  }
  func.func @transform_5(%arg0: i32, %arg1: i32, %arg2: i32) -> (i32, i32, i32) {
    %c0_i32 = arith.constant 0 : i32
    %c0_i32_0 = arith.constant 0 : i32
    return %arg1, %arg0, %c0_i32 : i32, i32, i32
  }
}

module attributes {stable_mosaic.version = 11 : i64} {
  func.func @_softmax_heads_kernel(%arg0: i32, %arg1: memref<8x500xf32, #tpu.memory_space<vmem>>, %arg2: memref<8x8x1591xf32, #tpu.memory_space<vmem>>, %arg3: memref<8x500xf32, #tpu.memory_space<vmem>>, %arg4: memref<8x8x1591xf32, #tpu.memory_space<vmem>>, %arg5: memref<8x1xf32, #tpu.memory_space<vmem>>, %arg6: memref<8x8x1xf32, #tpu.memory_space<vmem>>) attributes {dimension_semantics = [#tpu.dimension_semantics<parallel>], iteration_bounds = array<i64: 1>, scalar_prefetch = 0 : i64, scratch_operands = 0 : i64, tpu.core_type = #tpu.core_type<tc>, window_params = [{transform_indices = @transform_0, window_bounds = array<i64: 8, 500>}, {transform_indices = @transform_1, window_bounds = array<i64: 8, 8, 1591>}, {transform_indices = @transform_2, window_bounds = array<i64: 8, 500>}, {transform_indices = @transform_3, window_bounds = array<i64: 8, 8, 1591>}, {transform_indices = @transform_4, window_bounds = array<i64: 8, 1>}, {transform_indices = @transform_5, window_bounds = array<i64: 8, 8, 1>}]} {
    %c0 = arith.constant 0 : index
    %c0_0 = arith.constant 0 : index
    %0 = vector.load %arg1[%c0, %c0_0] : memref<8x500xf32, #tpu.memory_space<vmem>>, vector<8x500xf32>
    %cst = arith.constant dense<0xFF800000> : vector<8xf32>
    %1 = vector.multi_reduction <maximumf>, %0, %cst [1] : vector<8x500xf32> to vector<8xf32>
    %2 = vector.shape_cast %1 : vector<8xf32> to vector<8x1xf32>
    %3 = vector.broadcast %2 : vector<8x1xf32> to vector<8x500xf32>
    %4 = arith.subf %0, %3 : vector<8x500xf32>
    %5 = math.exp %4 : vector<8x500xf32>
    %cst_1 = arith.constant dense<0.000000e+00> : vector<8xf32>
    %6 = vector.multi_reduction <add>, %5, %cst_1 [1] : vector<8x500xf32> to vector<8xf32>
    %7 = vector.shape_cast %6 : vector<8xf32> to vector<8x1xf32>
    %8 = vector.broadcast %7 : vector<8x1xf32> to vector<8x500xf32>
    %9 = arith.divf %5, %8 : vector<8x500xf32>
    %c0_2 = arith.constant 0 : index
    %c0_3 = arith.constant 0 : index
    %10 = vector.load %arg3[%c0_2, %c0_3] : memref<8x500xf32, #tpu.memory_space<vmem>>, vector<8x500xf32>
    tpu.vector_store %arg3[%c0_2, %c0_3], %9 {strides = array<i32>} : memref<8x500xf32, #tpu.memory_space<vmem>>, vector<8x500xf32>,
    %11 = math.log %7 : vector<8x1xf32>
    %12 = arith.addf %2, %11 : vector<8x1xf32>
    %c0_4 = arith.constant 0 : index
    %c0_5 = arith.constant 0 : index
    %13 = vector.load %arg5[%c0_4, %c0_5] : memref<8x1xf32, #tpu.memory_space<vmem>>, vector<8x1xf32>
    tpu.vector_store %arg5[%c0_4, %c0_5], %12 {strides = array<i32>} : memref<8x1xf32, #tpu.memory_space<vmem>>, vector<8x1xf32>,
    %c0_6 = arith.constant 0 : index
    %c0_7 = arith.constant 0 : index
    %c0_8 = arith.constant 0 : index
    %14 = vector.load %arg2[%c0_6, %c0_7, %c0_8] : memref<8x8x1591xf32, #tpu.memory_space<vmem>>, vector<8x8x1591xf32>
    %cst_9 = arith.constant dense<0xFF800000> : vector<8x8xf32>
    %15 = vector.multi_reduction <maximumf>, %14, %cst_9 [2] : vector<8x8x1591xf32> to vector<8x8xf32>
    %16 = vector.shape_cast %15 : vector<8x8xf32> to vector<8x8x1xf32>
    %17 = vector.broadcast %16 : vector<8x8x1xf32> to vector<8x8x1591xf32>
    %18 = arith.subf %14, %17 : vector<8x8x1591xf32>
    %19 = math.exp %18 : vector<8x8x1591xf32>
    %cst_10 = arith.constant dense<0.000000e+00> : vector<8x8xf32>
    %20 = vector.multi_reduction <add>, %19, %cst_10 [2] : vector<8x8x1591xf32> to vector<8x8xf32>
    %21 = vector.shape_cast %20 : vector<8x8xf32> to vector<8x8x1xf32>
    %22 = vector.broadcast %21 : vector<8x8x1xf32> to vector<8x8x1591xf32>
    %23 = arith.divf %19, %22 : vector<8x8x1591xf32>
    %c0_11 = arith.constant 0 : index
    %c0_12 = arith.constant 0 : index
    %c0_13 = arith.constant 0 : index
    %24 = vector.load %arg4[%c0_11, %c0_12, %c0_13] : memref<8x8x1591xf32, #tpu.memory_space<vmem>>, vector<8x8x1591xf32>
    tpu.vector_store %arg4[%c0_11, %c0_12, %c0_13], %23 {strides = array<i32>} : memref<8x8x1591xf32, #tpu.memory_space<vmem>>, vector<8x8x1591xf32>,
    %25 = math.log %21 : vector<8x8x1xf32>
    %26 = arith.addf %16, %25 : vector<8x8x1xf32>
    %c0_14 = arith.constant 0 : index
    %c0_15 = arith.constant 0 : index
    %c0_16 = arith.constant 0 : index
    %27 = vector.load %arg6[%c0_14, %c0_15, %c0_16] : memref<8x8x1xf32, #tpu.memory_space<vmem>>, vector<8x8x1xf32>
    tpu.vector_store %arg6[%c0_14, %c0_15, %c0_16], %26 {strides = array<i32>} : memref<8x8x1xf32, #tpu.memory_space<vmem>>, vector<8x8x1xf32>,
    return
  }
  func.func @transform_0(%arg0: i32) -> (i32, i32) {
    %c0_i32 = arith.constant 0 : i32
    %c0_i32_0 = arith.constant 0 : i32
    return %arg0, %c0_i32 : i32, i32
  }
  func.func @transform_1(%arg0: i32) -> (i32, i32, i32) {
    %c0_i32 = arith.constant 0 : i32
    %c0_i32_0 = arith.constant 0 : i32
    %c0_i32_1 = arith.constant 0 : i32
    return %arg0, %c0_i32, %c0_i32_0 : i32, i32, i32
  }
  func.func @transform_2(%arg0: i32) -> (i32, i32) {
    %c0_i32 = arith.constant 0 : i32
    %c0_i32_0 = arith.constant 0 : i32
    return %arg0, %c0_i32 : i32, i32
  }
  func.func @transform_3(%arg0: i32) -> (i32, i32, i32) {
    %c0_i32 = arith.constant 0 : i32
    %c0_i32_0 = arith.constant 0 : i32
    %c0_i32_1 = arith.constant 0 : i32
    return %arg0, %c0_i32, %c0_i32_0 : i32, i32, i32
  }
  func.func @transform_4(%arg0: i32) -> (i32, i32) {
    %c0_i32 = arith.constant 0 : i32
    %c0_i32_0 = arith.constant 0 : i32
    return %arg0, %c0_i32 : i32, i32
  }
  func.func @transform_5(%arg0: i32) -> (i32, i32, i32) {
    %c0_i32 = arith.constant 0 : i32
    %c0_i32_0 = arith.constant 0 : i32
    %c0_i32_1 = arith.constant 0 : i32
    return %arg0, %c0_i32, %c0_i32_0 : i32, i32, i32
  }
}

</mosaic_0001>

<bundles_post_ra>
// kernel: actor_critic_evaluate.2
= control target key start
LH: loop header
LB: loop body
LE: loop exit
PB: predicated region body
PF: predicated region fallthrough
CT: control target
= control target key end

     0   :  { %vm173_vm0 = vcmask 449536   ;;  %vm19_vm1 = vcmask 949248   ;;  %vm56_vm2 = vcmask 7168   ;;  %s2971_s1 = inlined_call_operand.vmem [shape: f32[8,8,1591], index: 1, kind: input, shape index: {}]   ;;  %s2972_s0 = inlined_call_operand.vmem [shape: f32[8,500], index: 0, kind: input, shape index: {}]   ;;  %s2973_s3 = inlined_call_operand.vmem [shape: f32[8,8,1591], index: 3, kind: output, shape index: {1}]   ;;  %s2974_s5 = inlined_call_operand.vmem [shape: f32[8,8,1], index: 5, kind: output, shape index: {3}]   ;;  %s2975_s2 = inlined_call_operand.vmem [shape: f32[8,500], index: 2, kind: output, shape index: {0}]   ;;  %s2976_s4 = inlined_call_operand.vmem [shape: f32[8,1], index: 4, kind: output, shape index: {2}]  }
   0x1   :  { %v1288_v0 = vld [vmem:[%s2971_s1 + $0xd0] sm:$0xff]  ;;  %v1293_v1 = vld [vmem:[%s2971_s1 + $0xd8] sm:$0xff]  ;;  %v1298_v2 = vld [vmem:[%s2971_s1 + $0xe0] sm:$0xff] }
   0x2   :  { %v193_v3 = vmax.f32 %v1288_v0, %v1293_v1  ;;  %v1305_v4 = vld [vmem:[%s2971_s1 + $0xe8] sm:$0xff]  ;;  %v1311_v6 = vld [vmem:[%s2971_s1 + $0xf0] sm:$0xff]  ;;  %v1316_v7 = vld [vmem:[%s2971_s1] sm:$0xff] }
   0x3   :  { %v1321_v8 = vld [vmem:[%s2971_s1 + $0x8] sm:$0xff]  ;;  %v1327_v10 = vld [vmem:[%s2971_s1 + $0x10] sm:$0xff]  ;;  %v1334_v12 = vld [vmem:[%s2971_s1 + $0xf8] sm:$0xff] }
   0x4   :  { %v194_v5 = vmax.f32 %v193_v3, %v1298_v2  ;;  %v162_v11 = vmax.f32 %v1316_v7, %v1321_v8  ;;  %v1339_v13 = vld [vmem:[%s2971_s1 + $0x18] sm:$0xff]  ;;  %v1346_v16 = vld [vmem:[%s2971_s1 + $0x100] sm:$0xff]  ;;  %v1368_v22 = vld [vmem:[%s2971_s1 + $0x148] sm:$0xff] }
   0x5   :  { %v1351_v17 = vld [vmem:[%s2971_s1 + $0x20] sm:$0xff]  ;;  %v1356_v18 = vld [vmem:[%s2971_s1 + $0x138] sm:$0xff]  ;;  %3077 = vst [vmem:[#allocation4_spill] sm:$0xff] %v1368_v22  ;;  %v1373_v23 = vld [vmem:[%s2971_s1 + $0x108] sm:$0xff] }
   0x6   :  { %v195_v9 = vmax.f32 %v194_v5, %v1305_v4  ;;  %v163_v15 = vmax.f32 %v162_v11, %v1327_v10  ;;  %3075 = vst [vmem:[#allocation2_spill] sm:$0xff] %v1356_v18  ;;  %v1363_v21 = vld [vmem:[%s2971_s1 + $0x140] sm:$0xff]  ;;  %v1378_v24 = vld [vmem:[%s2971_s1 + $0x28] sm:$0xff]  ;;  %v1387_v28 = vld [vmem:[%s2971_s1 + $0x150] sm:$0xff] }
   0x7   :  { %3076 = vst [vmem:[#allocation3_spill] sm:$0xff] %v1363_v21  ;;  %v208_v25 = vmax.f32 %v1356_v18, %v1363_v21  ;;  %3078 = vst [vmem:[#allocation5_spill] sm:$0xff] %v1387_v28  ;;  %v1392_v29 = vld [vmem:[%s2971_s1 + $0x110] sm:$0xff]  ;;  %v1402_v31 = vld [vmem:[%s2971_s1 + $0x158] sm:$0xff] }
   0x8   :  { %v196_v14 = vmax.f32 %v195_v9, %v1311_v6  ;;  %v164_v20 = vmax.f32 %v163_v15, %v1339_v13  ;;  %v1397_v30 = vld [vmem:[%s2971_s1 + $0x30] sm:$0xff]  ;;  %3079 = vst [vmem:[#allocation6_spill] sm:$0xff] %v1402_v31  ;;  %v1410_v35 = vld [vmem:[%s2971_s1 + $0x68] sm:$0xff]  ;;  %v1420_v37 = vld [vmem:[%s2971_s1 + $0x78] sm:$0xff] }
   0x9   :  { %v209_v32 = vmax.f32 %v208_v25, %v1368_v22  ;;  %v1415_v36 = vld [vmem:[%s2971_s1 + $0x70] sm:$0xff]  ;;  %v1425_v38 = vld [vmem:[%s2971_s1 + $0x118] sm:$0xff]  ;;  %v1438_v42 = vld [vmem:[%s2971_s1 + $0x120] sm:$0xff] }
   0xa   :  { %v197_v19 = vmax.f32 %v196_v14, %v1334_v12  ;;  %v165_v27 = vmax.f32 %v164_v20, %v1351_v17  ;;  %v1430_v39 = vld [vmem:[%s2971_s1 + $0x38] sm:$0xff]  ;;  %v178_v41 = vmax.f32 %v1410_v35, %v1415_v36  ;;  %v1445_v45 = vld [vmem:[%s2971_s1 + $0x160] sm:$0xff]  ;;  %v1455_v47 = vld [vmem:[%s2971_s1 + $0x130] sm:$0xff] }
   0xb   :  { %v210_v40 = vmax.f32 %v209_v32, %v1387_v28  ;;  %3080 = vst [vmem:[#allocation7_spill] sm:$0xff] %v1445_v45  ;;  %v1450_v46 = vld [vmem:[%s2971_s1 + $0x80] sm:$0xff]  ;;  %v1465_v49 = vld [vmem:[%s2971_s1 + $0x168] sm:$0xff]  ;;  %v124_v56 = vld [vmem:[%s2971_s1 + $0x210] sm:$0xff]  ;;  %v204_v14 = vsel %vm173_vm0, %v1455_v47, -inf }
   0xc   :  { %v198_v26 = vmax.f32 %v197_v19, %v1346_v16  ;;  %v166_v34 = vmax.f32 %v165_v27, %v1378_v24  ;;  %v1460_v48 = vld [vmem:[%s2971_s1 + $0x40] sm:$0xff]  ;;  %3081 = vst [vmem:[#allocation8_spill] sm:$0xff] %v1465_v49  ;;  %v179_v51 = vmax.f32 %v178_v41, %v1420_v37  ;;  %v1474_v54 = vld [vmem:[%s2971_s1 + $0x88] sm:$0xff]  ;;  %v125_v61 = vld [vmem:[%s2971_s1 + $0x218] sm:$0xff] }
   0xd   :  { %v211_v50 = vmax.f32 %v210_v40, %v1402_v31  ;;  %v123_v55 = vld [vmem:[%s2971_s1 + $0x208] sm:$0xff]  ;;  %v1502_v5 = vld [vmem:[%s2971_s1 + $0x170] sm:$0xff]  ;;  %v126_v11 = vld [vmem:[%s2971_s1 + $0x220] sm:$0xff] }
   0xe   :  { %v199_v33 = vmax.f32 %v198_v26, %v1373_v23  ;;  %v167_v44 = vmax.f32 %v166_v34, %v1397_v30  ;;  %v1485_v57 = vld [vmem:[%s2971_s1 + $0x128] sm:$0xff]  ;;  %v180_v60 = vmax.f32 %v179_v51, %v1450_v46  ;;  %v238_v62 = vmax.f32 %v123_v55, %v124_v56  ;;  %3082 = vst [vmem:[#allocation9_spill] sm:$0xff] %v1502_v5  ;;  %v1507_v9 = vld [vmem:[%s2971_s1 + $0x90] sm:$0xff]  ;;  %v1522_v19 = vld [vmem:[%s2971_s1 + $0x60] sm:$0xff] }
   0xf   :  { %v1490_v58 = vld [vmem:[%s2971_s1 + $0x48] sm:$0xff]  ;;  %v212_v59 = vmax.f32 %v211_v50, %v1445_v45  ;;  %v1517_v15 = vld [vmem:[%s2971_s1 + $0x50] sm:$0xff]  ;;  %v1527_v20 = vld [vmem:[%s2971_s1 + $0x178] sm:$0xff] }
  0x10   :  { %v200_v43 = vmax.f32 %v199_v33, %v1392_v29  ;;  %v168_v53 = vmax.f32 %v167_v44, %v1430_v39  ;;  %3083 = vst [vmem:[#allocation10_spill] sm:$0xff] %v1527_v20  ;;  %v181_v26 = vmax.f32 %v180_v60, %v1474_v54  ;;  %v239_v27 = vmax.f32 %v238_v62, %v125_v61  ;;  %v1536_v34 = vld [vmem:[%s2971_s1 + $0x98] sm:$0xff]  ;;  %v127_v40 = vld [vmem:[%s2971_s1 + $0x228] sm:$0xff]  ;;  %v1544_v41 = vld [vmem:[%s2971_s1 + $0x1a0] sm:$0xff] }
  0x11   :  { %v213_v25 = vmax.f32 %v212_v59, %v1465_v49  ;;  %v1567_v59 = vld [vmem:[%s2971_s1 + $0x180] sm:$0xff]  ;;  %v128_v61 = vld [vmem:[%s2971_s1 + $0x230] sm:$0xff]  ;;  %v151_v49 = vld [vmem:[%s2971_s1 + $0x2e8] sm:$0xff] }
  0x12   :  { %v201_v52 = vmax.f32 %v200_v43, %v1425_v38  ;;  %v169_v3 = vmax.f32 %v168_v53, %v1460_v48  ;;  %v1549_v43 = vld [vmem:[%s2971_s1 + $0x58] sm:$0xff]  ;;  %v182_v50 = vmax.f32 %v181_v26, %v1507_v9  ;;  %v240_v51 = vmax.f32 %v239_v27, %v126_v11  ;;  %v1561_v53 = vld [vmem:[%s2971_s1 + $0x1b0] sm:$0xff]  ;;  %3085 = vst [vmem:[#allocation12_spill] sm:$0xff] %v1567_v59  ;;  %v1572_v60 = vld [vmem:[%s2971_s1 + $0xa0] sm:$0xff] }
  0x13   :  { %v214_v44 = vmax.f32 %v213_v25, %v1502_v5  ;;  %3084 = vst [vmem:[#allocation11_spill] sm:$0xff] %v1561_v53  ;;  %v1589_v11 = vld [vmem:[%s2971_s1 + $0x198] sm:$0xff]  ;;  %v150_v5 = vld [vmem:[%s2971_s1 + $0x2e0] sm:$0xff]  ;;  %v1648_v28 = vld [vmem:[%s2971_s1 + $0x1c8] sm:$0xff] }
  0x14   :  { %v202_v63 = vmax.f32 %v201_v52, %v1438_v42  ;;  %v170_v33 = vmax.f32 %v169_v3, %v1490_v58  ;;  %v1556_v52 = vld [vmem:[%s2971_s1 + $0x1a8] sm:$0xff]  ;;  %3087 = vst [vmem:[#allocation14_spill] sm:$0xff] %v1589_v11  ;;  %v183_v25 = vmax.f32 %v182_v50, %v1536_v34  ;;  %v241_v26 = vmax.f32 %v240_v51, %v127_v40  ;;  %v1596_v27 = vld [vmem:[%s2971_s1 + $0x1b8] sm:$0xff]  ;;  %v1610_v40 = vld [vmem:[%s2971_s1 + $0x1c0] sm:$0xff] }
  0x15   :  { %v223_v62 = vmax.f32 %v1544_v41, %v1556_v52  ;;  %v1584_v3 = vld [vmem:[%s2971_s1 + $0x188] sm:$0xff]  ;;  %3088 = vst [vmem:[#allocation15_spill] sm:$0xff] %v1596_v27  ;;  %3089 = vst [vmem:[#allocation16_spill] sm:$0xff] %v1610_v40  ;;  %v153_v22 = vld [vmem:[%s2971_s1 + $0x2f8] sm:$0xff] }
  0x16   :  { %v203_v32 = vmax.f32 %v202_v63, %v1485_v57  ;;  %v171_v56 = vmax.f32 %v170_v33, %v1517_v15  ;;  %v174_v63 = vsel %vm173_vm0, %v1522_v19, -inf  ;;  %3086 = vst [vmem:[#allocation13_spill] sm:$0xff] %v1584_v3  ;;  %v1602_v33 = vld [vmem:[%s2971_s1 + $0xa8] sm:$0xff]  ;;  %3091 = vst [vmem:[#allocation18_spill] sm:$0xff] %v1648_v28  ;;  %v1679_v21 = vld [vmem:[%s2971_s1 + $0x270] sm:$0xff] }
  0x17   :  { %v224_v50 = vmax.f32 %v223_v62, %v1561_v53  ;;  %v1627_v62 = vld [vmem:[%s2971_s1 + $0x190] sm:$0xff]  ;;  %3094 = vst [vmem:[#allocation21_spill] sm:$0xff] %v1679_v21  ;;  %v1684_v18 = vld [vmem:[%s2971_s1 + $0x278] sm:$0xff]  ;;  %v155_v53 = vld [vmem:[%s2971_s1 + $0x308] sm:$0xff] }
  0x18   :  { %v205_v55 = vmax.f32 %v203_v32, %v204_v14  ;;  %v215_v14 = vmax.f32 %v214_v44, %v1527_v20  ;;  %v172_v32 = vmax.f32 %v171_v56, %v1549_v43  ;;  %v129_v44 = vld [vmem:[%s2971_s1 + $0x238] sm:$0xff]  ;;  %v242_v56 = vmax.f32 %v241_v26, %v128_v61  ;;  %3090 = vst [vmem:[#allocation17_spill] sm:$0xff] %v1627_v62  ;;  %v1632_v61 = vld [vmem:[%s2971_s1 + $0xb0] sm:$0xff] }
  0x19   :  { %v149_v20 = vld [vmem:[%s2971_s1 + $0x2d8] sm:$0xff]  ;;  %3095 = vst [vmem:[#allocation22_spill] sm:$0xff] %v1684_v18 }
  0x1a   :  { %206 = vmax.xlane.f32.xlu1 %v205_v55  ;;  %v216_v51 = vmax.f32 %v215_v14, %v1567_v59  ;;  %v184_v55 = vmax.f32 %v183_v25, %v1572_v60  ;;  %v175_v45 = vmax.f32 %v172_v32, %v174_v63  ;;  %v130_v14 = vld [vmem:[%s2971_s1 + $0x240] sm:$0xff]  ;;  %v225_v25 = vmax.f32 %v224_v50, %v1596_v27  ;;  %v1642_v63 = vld [vmem:[%s2971_s1 + $0xb8] sm:$0xff]  ;;  %v152_v50 = vld [vmem:[%s2971_s1 + $0x2f0] sm:$0xff] }
  0x1b   :  { %v268_v26 = vmax.f32 %v149_v20, %v150_v5  ;;  %v243_v31 = vmax.f32 %v242_v56, %v129_v44  ;;  %v219_v5 = vsel %vm173_vm0, %v1589_v11, -inf  ;;  %v1658_v20 = vld [vmem:[%s2971_s1 + $0xc8] sm:$0xff]  ;;  %v1709_v27 = vld [vmem:[%s2971_s1 + $0x1d8] sm:$0xff] }
  0x1c   :  { %v217_v59 = vmax.f32 %v216_v51, %v1584_v3  ;;  %v185_v32 = vmax.f32 %v184_v55, %v1602_v33  ;;  %176 = vmax.xlane.f32.xlu0 %v175_v45  ;;  %v1663_v44 = vld [vmem:[%s2971_s1 + $0x248] sm:$0xff]  ;;  %v1668_v51 = vld [vmem:[%s2971_s1 + $0x1d0] sm:$0xff]  ;;  %v226_v45 = vmax.f32 %v225_v25, %v1610_v40  ;;  %v1700_v25 = vld [vmem:[%s2971_s1 + $0x280] sm:$0xff] }
  0x1d   :  { %3092 = vst [vmem:[#allocation19_spill] sm:$0xff] %v1663_v44  ;;  %3093 = vst [vmem:[#allocation20_spill] sm:$0xff] %v1668_v51  ;;  %v269_v55 = vmax.f32 %v268_v26, %v151_v49  ;;  %v244_v3 = vmax.f32 %v243_v31, %v130_v14  ;;  %v1689_v49 = vld [vmem:[%s2971_s1 + $0xc0] sm:$0xff]  ;;  %v1694_v31 = vld [vmem:[%s2971_s1 + $0x250] sm:$0xff]  ;;  %v253_v26 = vmax.f32 %v1679_v21, %v1684_v18 }
  0x1e   :  { %v218_v56 = vmax.f32 %v217_v59, %v1627_v62  ;;  %v186_v11 = vmax.f32 %v185_v32, %v1632_v61  ;;  %3096 = vst [vmem:[#allocation23_spill] sm:$0xff] %v1694_v31  ;;  %v227_v59 = vmax.f32 %v226_v45, %v1648_v28  ;;  %3097 = vst [vmem:[#allocation24_spill] sm:$0xff] %v1700_v25  ;;  %v1717_v45 = vld [vmem:[%s2971_s1 + $0x288] sm:$0xff]  ;;  %v1734_v28 = vld [vmem:[%s2971_s1 + $0x1e0] sm:$0xff] }
  0x1f   :  { %v270_v14 = vmax.f32 %v269_v55, %v152_v50  ;;  %v245_v40 = vmax.f32 %v244_v3, %v1663_v44  ;;  %v154_v50 = vld [vmem:[%s2971_s1 + $0x300] sm:$0xff]  ;;  %3098 = vst [vmem:[#allocation25_spill] sm:$0xff] %v1717_v45  ;;  %v133_v3 = vld [vmem:[%s2971_s1 + $0x258] sm:$0xff]  ;;  %v254_v44 = vmax.f32 %v253_v26, %v1700_v25  ;;  %v156_v25 = vld [vmem:[%s2971_s1 + $0x310] sm:$0xff] }
  0x20   :  { %v220_v32 = vmax.f32 %v218_v56, %v219_v5  ;;  %v187_v62 = vmax.f32 %v186_v11, %v1642_v63  ;;  %v189_v5 = vsel %vm173_vm0, %v1658_v20, -inf  ;;  %v135_v11 = vld [vmem:[%s2971_s1 + $0x268] sm:$0xff]  ;;  %v228_v55 = vmax.f32 %v227_v59, %v1668_v51  ;;  %v1760_v51 = vld [vmem:[%s2971_s1 + $0x298] sm:$0xff] }
  0x21   :  { %v271_v56 = vmax.f32 %v270_v14, %v153_v22  ;;  %v246_v21 = vmax.f32 %v245_v40, %v1694_v31  ;;  %v1742_v22 = vld [vmem:[%s2971_s1 + $0x290] sm:$0xff]  ;;  %v255_v14 = vmax.f32 %v254_v44, %v1717_v45  ;;  %v1752_v31 = vld [vmem:[%s2971_s1 + $0x1e8] sm:$0xff]  ;;  %3100 = vst [vmem:[#allocation27_spill] sm:$0xff] %v1760_v51  ;;  %v1827_v45 = vld [vmem:[%s2972_s0 + $0x18] sm:$0xff] }
  0x22   :  { %221 = vmax.xlane.f32.xlu1 %v220_v32  ;;  %v188_v18 = vmax.f32 %v187_v62, %v1689_v49  ;;  %3099 = vst [vmem:[#allocation26_spill] sm:$0xff] %v1742_v22  ;;  %v134_v62 = vld [vmem:[%s2971_s1 + $0x260] sm:$0xff]  ;;  %v229_v40 = vmax.f32 %v228_v55, %v1709_v27  ;;  %v157_v55 = vld [vmem:[%s2971_s1 + $0x318] sm:$0xff] }
  0x23   :  { %v272_v59 = vmax.f32 %v271_v56, %v154_v50  ;;  %v247_v32 = vmax.f32 %v246_v21, %v133_v3  ;;  %v249_v50 = vsel %vm173_vm0, %v135_v11, -inf  ;;  %v256_v21 = vmax.f32 %v255_v14, %v1742_v22  ;;  %v1768_v3 = vld [vmem:[%s2971_s1 + $0x1f0] sm:$0xff]  ;;  %v1776_v11 = vld [vmem:[%s2971_s1 + $0x2a0] sm:$0xff]  ;;  %v1788_v14 = vld [vmem:[%s2971_s1 + $0x1f8] sm:$0xff] }
  0x24   :  { %v190_v26 = vmax.f32 %v188_v18, %v189_v5  ;;  %v230_v44 = vmax.f32 %v229_v40, %v1734_v28  ;;  %3101 = vst [vmem:[#allocation28_spill] sm:$0xff] %v1768_v3  ;;  %3102 = vst [vmem:[#allocation29_spill] sm:$0xff] %v1776_v11 }
  0x25   :  { %v273_v18 = vmax.f32 %v272_v59, %v155_v53  ;;  %v248_v5 = vmax.f32 %v247_v32, %v134_v62  ;;  %v1781_v53 = vld [vmem:[%s2971_s1 + $0x200] sm:$0xff]  ;;  %v257_v40 = vmax.f32 %v256_v21, %v1760_v51  ;;  %3104 = vst [vmem:[#allocation31_spill] sm:$0xff] %v1788_v14  ;;  %v1796_v32 = vld [vmem:[%s2971_s1 + $0x2a8] sm:$0xff] }
  0x26   :  { %191 = vmax.xlane.f32.xlu0 %v190_v26  ;;  %3103 = vst [vmem:[#allocation30_spill] sm:$0xff] %v1781_v53  ;;  %v231_v56 = vmax.f32 %v230_v44, %v1752_v31  ;;  %v158_v26 = vld [vmem:[%s2971_s1 + $0x320] sm:$0xff]  ;;  %3105 = vst [vmem:[#allocation32_spill] sm:$0xff] %v1796_v32  ;;  %v159_v21 = vld [vmem:[%s2971_s1 + $0x328] sm:$0xff] }
  0x27   :  { %v274_v62 = vmax.f32 %v273_v18, %v156_v25  ;;  %v250_v59 = vmax.f32 %v248_v5, %v249_v50  ;;  %v258_v18 = vmax.f32 %v257_v40, %v1776_v11  ;;  %v234_v50 = vsel %vm173_vm0, %v1781_v53, -inf  ;;  %v1808_v5 = vld [vmem:[%s2971_s1 + $0x2b0] sm:$0xff] }
  0x28   :  { %v232_v44 = vmax.f32 %v231_v56, %v1768_v3  ;;  %3106 = vst [vmem:[#allocation33_spill] sm:$0xff] %v1808_v5  ;;  %v160_v40 = vld [vmem:[%s2971_s1 + $0x330] sm:$0xff] }
  0x29   :  { %v275_v25 = vmax.f32 %v274_v62, %v157_v55  ;;  %251 = vmax.xlane.f32.xlu1 %v250_v59  ;;  %v161_v55 = vld [vmem:[%s2971_s1 + $0x338] sm:$0xff]  ;;  %v259_v62 = vmax.f32 %v258_v18, %v1796_v32 }
  0x2a   :  { %v233_v51 = vmax.f32 %v232_v44, %v1788_v14  ;;  %v1821_v59 = vld [vmem:[%s2971_s1 + $0x2b8] sm:$0xff] }
  0x2b   :  { %v276_v56 = vmax.f32 %v275_v25, %v158_v26  ;;  %3107 = vst [vmem:[#allocation34_spill] sm:$0xff] %v1821_v59  ;;  %v260_v44 = vmax.f32 %v259_v62, %v1808_v5  ;;  %v279_v26 = vsel %vm173_vm0, %v161_v55, -inf  ;;  %v1833_v25 = vld [vmem:[%s2971_s1 + $0x2c0] sm:$0xff] }
  0x2c   :  { %v235_v11 = vmax.f32 %v233_v51, %v234_v50  ;;  %v1838_v51 = vld [vmem:[%s2971_s1 + $0x2c8] sm:$0xff]  ;;  %v1843_v50 = vld [vmem:[%s2971_s1 + $0x2d0] sm:$0xff]  ;;  %v1849_v55 = vld [vmem:[%s2972_s0] sm:$0xff] }
  0x2d   :  { %v277_v22 = vmax.f32 %v276_v56, %v159_v21  ;;  %v261_v21 = vmax.f32 %v260_v44, %v1821_v59  ;;  %v20_v56 = vsel %vm19_vm1, %v1827_v45, -inf  ;;  %v264_v44 = vsel %vm173_vm0, %v1843_v50, -inf }
  0x2e   :  { %236 = vmax.xlane.f32.xlu0 %v235_v11  ;;  %v1859_v11 = vld [vmem:[%s2972_s0 + $0x10] sm:$0xff] }
  0x2f   :  { %v278_v18 = vmax.f32 %v277_v22, %v160_v40  ;;  %v1854_v22 = vld [vmem:[%s2972_s0 + $0x8] sm:$0xff]  ;;  %v262_v40 = vmax.f32 %v261_v21, %v1833_v25  ;;  %v22_v32 = vmax.f32 %v1859_v11, %v20_v56 }
  0x30   :  { %v21_v5 = vmax.f32 %v1849_v55, %v1854_v22 }
  0x31   :  { %v280_v62 = vmax.f32 %v278_v18, %v279_v26  ;;  %v263_v59 = vmax.f32 %v262_v40, %v1838_v51 }
  0x32   :  { %v23_v14 = vmax.f32 %v21_v5, %v22_v32 }
  0x33   :  { %281 = vmax.xlane.f32.xlu1 %v280_v62  ;;  %v265_v53 = vmax.f32 %v263_v59, %v264_v44 }
  0x35   :  { %266 = vmax.xlane.f32.xlu0 %v265_v53 }
  0x39   :  { %24 = vmax.xlane.f32.xlu0 %v23_v14 }
  0xa3   :  { %v1870_v3 = vpop.xlane.xlu1 %206 }
  0xa4   :  { %3108 = vst [vmem:[#allocation35_spill] sm:$0xff] %v1870_v3  ;;  %v309_v26 = vsub.f32 %v1288_v0, %v1870_v3 }
  0xa5   :  { %v1874_v18 = vpop.xlane.xlu0 %176 }
  0xa6   :  { %v439_v21 = vmul.f32 1.442695, %v309_v26  ;;  %v283_v62 = vsub.f32 %v1316_v7, %v1874_v18  ;;  %v284_v40 = vsub.f32 %v1321_v8, %v1874_v18  ;;  %v285_v59 = vsub.f32 %v1327_v10, %v1874_v18 }
  0xa7   :  { %v286_v53 = vsub.f32 %v1339_v13, %v1874_v18  ;;  %v287_v14 = vsub.f32 %v1351_v17, %v1874_v18  ;;  %v288_v0 = vsub.f32 %v1378_v24, %v1874_v18  ;;  %v289_v32 = vsub.f32 %v1397_v30, %v1874_v18 }
  0xa8   :  { %v387_v5 = vmul.f32 1.442695, %v283_v62  ;;  %v389_v7 = vmul.f32 1.442695, %v284_v40  ;;  %v391_v56 = vmul.f32 1.442695, %v285_v59  ;;  %v290_v8 = vsub.f32 %v1430_v39, %v1874_v18 }
  0xa9   :  { %v393_v44 = vmul.f32 1.442695, %v286_v53  ;;  %979 = vpow2.f32 %v439_v21  ;;  %v291_v10 = vsub.f32 %v1460_v48, %v1874_v18  ;;  %v395_v13 = vmul.f32 1.442695, %v287_v14 }
  0xaa   :  { %981 = vpow2.f32 %v387_v5  ;;  %v292_v17 = vsub.f32 %v1490_v58, %v1874_v18  ;;  %v397_v24 = vmul.f32 1.442695, %v288_v0  ;;  %v293_v30 = vsub.f32 %v1517_v15, %v1874_v18 }
  0xab   :  { %983 = vpow2.f32 %v389_v7  ;;  %v399_v26 = vmul.f32 1.442695, %v289_v32  ;;  %v294_v39 = vsub.f32 %v1549_v43, %v1874_v18  ;;  %v401_v21 = vmul.f32 1.442695, %v290_v8 }
  0xac   :  { %985 = vpow2.f32 %v391_v56  ;;  %v295_v48 = vsub.f32 %v1522_v19, %v1874_v18  ;;  %v403_v62 = vmul.f32 1.442695, %v291_v10  ;;  %v405_v40 = vmul.f32 1.442695, %v292_v17 }
  0xad   :  { %987 = vpow2.f32 %v393_v44  ;;  %v310_v58 = vsub.f32 %v1293_v1, %v1870_v3  ;;  %v407_v59 = vmul.f32 1.442695, %v293_v30  ;;  %v311_v15 = vsub.f32 %v1298_v2, %v1870_v3 }
  0xae   :  { %989 = vpow2.f32 %v395_v13  ;;  %v409_v53 = vmul.f32 1.442695, %v294_v39  ;;  %v312_v43 = vsub.f32 %v1305_v4, %v1870_v3  ;;  %v411_v19 = vmul.f32 1.442695, %v295_v48 }
  0xaf   :  { %991 = vpow2.f32 %v397_v24  ;;  %v1908_v14 = vpop.xlane.xlu0 %191  ;;  %v313_v0 = vsub.f32 %v1311_v6, %v1870_v3  ;;  %v314_v1 = vsub.f32 %v1334_v12, %v1870_v3  ;;  %v441_v32 = vmul.f32 1.442695, %v310_v58 }
  0xb0   :  { %993 = vpow2.f32 %v399_v26  ;;  %3109 = vst [vmem:[#allocation36_spill] sm:$0xff] %v1908_v14  ;;  %v315_v2 = vsub.f32 %v1346_v16, %v1870_v3  ;;  %v443_v5 = vmul.f32 1.442695, %v311_v15  ;;  %v316_v4 = vsub.f32 %v1373_v23, %v1870_v3 }
  0xb1   :  { %995 = vpow2.f32 %v401_v21  ;;  %v445_v7 = vmul.f32 1.442695, %v312_v43  ;;  %v317_v6 = vsub.f32 %v1392_v29, %v1870_v3  ;;  %v447_v8 = vmul.f32 1.442695, %v313_v0 }
  0xb2   :  { %997 = vpow2.f32 %v403_v62  ;;  %v318_v12 = vsub.f32 %v1425_v38, %v1870_v3  ;;  %v449_v16 = vmul.f32 1.442695, %v314_v1  ;;  %v319_v23 = vsub.f32 %v1438_v42, %v1870_v3 }
  0xb3   :  { %999 = vpow2.f32 %v405_v40  ;;  %v451_v17 = vmul.f32 1.442695, %v315_v2  ;;  %v320_v30 = vsub.f32 %v1485_v57, %v1870_v3  ;;  %v453_v38 = vmul.f32 1.442695, %v316_v4 }
  0xb4   :  { %1001 = vpow2.f32 %v407_v59  ;;  %v321_v39 = vsub.f32 %v1455_v47, %v1870_v3  ;;  %v455_v21 = vmul.f32 1.442695, %v317_v6  ;;  %v457_v62 = vmul.f32 1.442695, %v318_v12 }
  0xb5   :  { %1003 = vpow2.f32 %v409_v53  ;;  %v459_v58 = vmul.f32 1.442695, %v319_v23  ;;  %v296_v57 = vsub.f32 %v1410_v35, %v1908_v14  ;;  %v461_v47 = vmul.f32 1.442695, %v320_v30 }
  0xb6   :  { %v1918_v56 = vpop.eup %979  ;;  %1005 = vpow2.f32 %v411_v19  ;;  %v463_v19 = vmul.f32 1.442695, %v321_v39  ;;  %v297_v0 = vsub.f32 %v1415_v36, %v1908_v14  ;;  %v298_v36 = vsub.f32 %v1420_v37, %v1908_v14 }
  0xb7   :  { %v1922_v44 = vpop.eup %981  ;;  %1007 = vpow2.f32 %v441_v32  ;;  %v1928_v13 = vpop.xlane.xlu0 %236  ;;  %v413_v2 = vmul.f32 1.442695, %v296_v57  ;;  %v299_v37 = vsub.f32 %v1450_v46, %v1908_v14  ;;  %v300_v57 = vsub.f32 %v1474_v54, %v1908_v14 }
  0xb8   :  { %v1926_v10 = vpop.eup %983  ;;  %3110 = vst [vmem:[#allocation37_spill] sm:$0xff] %v1928_v13  ;;  %1009 = vpow2.f32 %v443_v5 }
  0xb9   :  { %v1932_v24 = vpop.eup %985  ;;  %v595_v29 = vadd.f32 %v1926_v10, %v1922_v44  ;;  %1011 = vpow2.f32 %v445_v7 }
  0xba   :  { %v1938_v26 = vpop.eup %987  ;;  %1013 = vpow2.f32 %v447_v8  ;;  %v415_v8 = vmul.f32 1.442695, %v297_v0 }
  0xbb   :  { %v1942_v42 = vpop.eup %989  ;;  %v596_v48 = vadd.f32 %v1932_v24, %v595_v29  ;;  %1015 = vpow2.f32 %v449_v16 }
  0xbc   :  { %v1945_v40 = vpop.eup %991  ;;  %1017 = vpow2.f32 %v451_v17 }
  0xbd   :  { %v1949_v59 = vpop.eup %993  ;;  %v597_v15 = vadd.f32 %v1938_v26, %v596_v48  ;;  %1019 = vpow2.f32 %v453_v38 }
  0xbe   :  { %v1952_v53 = vpop.eup %995  ;;  %v1954_v43 = vpop.xlane.xlu0 %266  ;;  %1021 = vpow2.f32 %v455_v21 }
  0xbf   :  { %3111 = vst [vmem:[#allocation38_spill] sm:$0xff] %v1954_v43  ;;  %v1958_v1 = vpop.eup %997  ;;  %v598_v32 = vadd.f32 %v1942_v42, %v597_v15  ;;  %1023 = vpow2.f32 %v457_v62  ;;  %v417_v15 = vmul.f32 1.442695, %v298_v36  ;;  %v302_v36 = vsub.f32 %v1536_v34, %v1908_v14 }
  0xc0   :  { %v1961_v35 = vpop.eup %999  ;;  %1025 = vpow2.f32 %v459_v58  ;;  %v306_v34 = vsub.f32 %v1642_v63, %v1908_v14 }
  0xc1   :  { %v1963_v5 = vpop.eup %1001  ;;  %v599_v4 = vadd.f32 %v1945_v40, %v598_v32  ;;  %1027 = vpow2.f32 %v461_v47 }
  0xc2   :  { %v1966_v7 = vpop.eup %1003  ;;  %v1968_v6 = vpop.xlane.xlu0 %24  ;;  %1029 = vpow2.f32 %v463_v19 }
  0xc3   :  { %v1972_v12 = vpop.eup %1005  ;;  %v26_v16 = vsub.f32 %v1849_v55, %v1968_v6  ;;  %v27_v23 = vsub.f32 %v1854_v22, %v1968_v6  ;;  %v28_v17 = vsub.f32 %v1859_v11, %v1968_v6  ;;  %v29_v29 = vsub.f32 %v1827_v45, %v1968_v6 }
  0xc4   :  { %v1982_v30 = vpop.eup %1007  ;;  %v600_v38 = vadd.f32 %v1949_v59, %v599_v4  ;;  %1031 = vpow2.f32 %v413_v2  ;;  %v301_v2 = vsub.f32 %v1507_v9, %v1908_v14  ;;  %v419_v4 = vmul.f32 1.442695, %v299_v37 }
  0xc5   :  { %v1987_v39 = vpop.eup %1009  ;;  %v30_v55 = vmul.f32 1.442695, %v26_v16  ;;  %v32_v21 = vmul.f32 1.442695, %v27_v23  ;;  %v34_v48 = vmul.f32 1.442695, %v28_v17  ;;  %v625_v22 = vadd.f32 %v1982_v30, %v1918_v56 }
  0xc6   :  { %v1991_v11 = vpop.eup %1011  ;;  %v36_v62 = vmul.f32 1.442695, %v29_v29  ;;  %v601_v45 = vadd.f32 %v1952_v53, %v600_v38  ;;  %1033 = vpow2.f32 %v415_v8  ;;  %v303_v16 = vsub.f32 %v1572_v60, %v1908_v14 }
  0xc7   :  { %v1994_v58 = vpop.eup %1013  ;;  %1035 = vpow2.f32 %v30_v55  ;;  %v626_v46 = vadd.f32 %v1987_v39, %v625_v22  ;;  %v421_v29 = vmul.f32 1.442695, %v300_v57  ;;  %v304_v37 = vsub.f32 %v1602_v33, %v1908_v14 }
  0xc8   :  { %v1999_v47 = vpop.eup %1015  ;;  %1037 = vpow2.f32 %v32_v21  ;;  %v602_v19 = vadd.f32 %v1958_v1, %v601_v45  ;;  %v305_v55 = vsub.f32 %v1632_v61, %v1908_v14  ;;  %v423_v22 = vmul.f32 1.442695, %v301_v2 }
  0xc9   :  { %v2002_v0 = vpop.eup %1017  ;;  %1039 = vpow2.f32 %v34_v48  ;;  %v627_v32 = vadd.f32 %v1991_v11, %v626_v46  ;;  %v307_v48 = vsub.f32 %v1689_v49, %v1908_v14  ;;  %v425_v33 = vmul.f32 1.442695, %v302_v36 }
  0xca   :  { %v2007_v8 = vpop.eup %1019  ;;  %1041 = vpow2.f32 %v36_v62  ;;  %v603_v54 = vadd.f32 %v1961_v35, %v602_v19  ;;  %v427_v46 = vmul.f32 1.442695, %v303_v16  ;;  %v335_v61 = vsub.f32 %v1544_v41, %v1928_v13 }
  0xcb   :  { %v2014_v23 = vpop.eup %1021  ;;  %v628_v17 = vadd.f32 %v1994_v58, %v627_v32  ;;  %1043 = vpow2.f32 %v417_v15  ;;  %v606_v63 = vsel %vm173_vm0, %v1972_v12, 0.0  ;;  %v336_v49 = vsub.f32 %v1556_v52, %v1928_v13 }
  0xcc   :  { %v2017_v38 = vpop.eup %1023  ;;  %v604_v9 = vadd.f32 %v1963_v5, %v603_v54  ;;  %1045 = vpow2.f32 %v419_v4  ;;  %v308_v32 = vsub.f32 %v1658_v20, %v1908_v14  ;;  %v429_v2 = vmul.f32 1.442695, %v304_v37  ;;  %v3113_v4 = vld [vmem:[#allocation11_spill] sm:$0xff] }
  0xcd   :  { %v2026_v60 = vpop.eup %1025  ;;  %v629_v21 = vadd.f32 %v1999_v47, %v628_v17  ;;  %1047 = vpow2.f32 %v421_v29  ;;  %v337_v54 = vsub.f32 %v3113_v4, %v1928_v13  ;;  %v431_v16 = vmul.f32 1.442695, %v305_v55  ;;  %v3116_v20 = vld [vmem:[#allocation15_spill] sm:$0xff] }
  0xce   :  { %v2031_v62 = vpop.eup %1027  ;;  %v605_v45 = vadd.f32 %v1966_v7, %v604_v9  ;;  %1049 = vpow2.f32 %v423_v22  ;;  %v433_v17 = vmul.f32 1.442695, %v306_v34  ;;  %v491_v29 = vmul.f32 1.442695, %v335_v61 }
  0xcf   :  { %v2036_v57 = vpop.eup %1029  ;;  %v630_v15 = vadd.f32 %v2002_v0, %v629_v21  ;;  %1051 = vpow2.f32 %v425_v33  ;;  %v338_v37 = vsub.f32 %v3116_v20, %v1928_v13  ;;  %v493_v21 = vmul.f32 1.442695, %v336_v49 }
  0xd0   :  { %3112 = vst [vmem:[#allocation39_spill] sm:$0xff] %v2036_v57  ;;  %v607_v19 = vadd.f32 %v606_v63, %v605_v45  ;;  %1053 = vpow2.f32 %v427_v46  ;;  %v435_v63 = vmul.f32 1.442695, %v307_v48  ;;  %v495_v22 = vmul.f32 1.442695, %v337_v54  ;;  %v3117_v46 = vld [vmem:[#allocation16_spill] sm:$0xff] }
  0xd1   :  { %v2047_v41 = vpop.eup %1031  ;;  %v631_v36 = vadd.f32 %v2007_v8, %v630_v15  ;;  %1055 = vpow2.f32 %v429_v2  ;;  %v437_v15 = vmul.f32 1.442695, %v308_v32  ;;  %v339_v61 = vsub.f32 %v3117_v46, %v1928_v13  ;;  %v3118_v48 = vld [vmem:[#allocation18_spill] sm:$0xff]  ;;  %v3119_v2 = vld [vmem:[#allocation20_spill] sm:$0xff]  ;;  %v2079_v46 = vpop.xlane.xlu1 %221 }
  0xd2   :  { %3114 = vst [vmem:[#allocation11_spill] sm:$0xff] %v2047_v41  ;;  %608 = vadd.xlane.f32.xlu0 %v607_v19  ;;  %1057 = vpow2.f32 %v431_v16  ;;  %v340_v32 = vsub.f32 %v3118_v48, %v1928_v13  ;;  %v341_v4 = vsub.f32 %v3119_v2, %v1928_v13  ;;  %v342_v16 = vsub.f32 %v1709_v27, %v1928_v13 }
  0xd3   :  { %v2050_v9 = vpop.eup %1033  ;;  %v632_v52 = vadd.f32 %v2014_v23, %v631_v36  ;;  %1059 = vpow2.f32 %v491_v29  ;;  %3121 = vst [vmem:[#allocation16_spill] sm:$0xff] %v2079_v46  ;;  %v343_v29 = vsub.f32 %v1734_v28, %v1928_v13  ;;  %v3123_v28 = vld [vmem:[#allocation2_spill] sm:$0xff] }
  0xd4   :  { %3115 = vst [vmem:[#allocation40_spill] sm:$0xff] %v2050_v9  ;;  %v2055_v45 = vpop.eup %1035  ;;  %v610_v33 = vadd.f32 %v2050_v9, %v2047_v41  ;;  %1061 = vpow2.f32 %v493_v21  ;;  %v499_v21 = vmul.f32 1.442695, %v339_v61  ;;  %v636_v9 = vsel %vm173_vm0, %v2036_v57, 0.0  ;;  %v3148_v57 = vld [vmem:[#allocation21_spill] sm:$0xff] }
  0xd5   :  { %v2057_v55 = vpop.eup %1037  ;;  %v633_v34 = vadd.f32 %v2017_v38, %v632_v52  ;;  %v497_v52 = vmul.f32 1.442695, %v338_v37  ;;  %1063 = vpow2.f32 %v495_v22  ;;  %v322_v22 = vsub.f32 %v3123_v28, %v2079_v46 }
  0xd6   :  { %v2064_v19 = vpop.eup %1039  ;;  %v38_v49 = vadd.f32 %v2057_v55, %v2055_v45  ;;  %1065 = vpow2.f32 %v433_v17  ;;  %v344_v17 = vsub.f32 %v1752_v31, %v1928_v13 }
  0xd7   :  { %v2072_v54 = vpop.eup %1041  ;;  %v634_v36 = vadd.f32 %v2026_v60, %v633_v34  ;;  %1067 = vpow2.f32 %v435_v63  ;;  %v505_v63 = vmul.f32 1.442695, %v342_v16  ;;  %v3132_v16 = vld [vmem:[#allocation30_spill] sm:$0xff] }
  0xd8   :  { %v2077_v20 = vpop.eup %1043  ;;  %v39_v14 = vadd.f32 %v2064_v19, %v38_v49  ;;  %v40_v48 = vsel %vm19_vm1, %v2072_v54, 0.0  ;;  %v501_v49 = vmul.f32 1.442695, %v340_v32  ;;  %1069 = vpow2.f32 %v497_v52  ;;  %v3126_v32 = vld [vmem:[#allocation4_spill] sm:$0xff] }
  0xd9   :  { %3120 = vst [vmem:[#allocation15_spill] sm:$0xff] %v2077_v20  ;;  %v635_v34 = vadd.f32 %v2031_v62, %v634_v36  ;;  %v611_v27 = vadd.f32 %v2077_v20, %v610_v33  ;;  %v2088_v37 = vpop.eup %1045  ;;  %1071 = vpow2.f32 %v437_v15  ;;  %v3125_v33 = vld [vmem:[#allocation3_spill] sm:$0xff]  ;;  %v324_v52 = vsub.f32 %v3126_v32, %v2079_v46 }
  0xda   :  { %3122 = vst [vmem:[#allocation18_spill] sm:$0xff] %v2088_v37  ;;  %v41_v2 = vadd.f32 %v40_v48, %v39_v14  ;;  %v2095_v36 = vpop.eup %1047  ;;  %v503_v14 = vmul.f32 1.442695, %v341_v4  ;;  %v323_v61 = vsub.f32 %v3125_v33, %v2079_v46  ;;  %1073 = vpow2.f32 %v499_v21 }
  0xdb   :  { %v637_v41 = vadd.f32 %v636_v9, %v635_v34  ;;  %v612_v3 = vadd.f32 %v2088_v37, %v611_v27  ;;  %3124 = vst [vmem:[#allocation20_spill] sm:$0xff] %v2095_v36  ;;  %v2104_v48 = vpop.eup %1049  ;;  %v3128_v34 = vld [vmem:[#allocation28_spill] sm:$0xff]  ;;  %v3129_v27 = vld [vmem:[#allocation31_spill] sm:$0xff]  ;;  %v507_v4 = vmul.f32 1.442695, %v343_v29  ;;  %v347_v21 = vsub.f32 %v3132_v16, %v1928_v13 }
  0xdc   :  { %42 = vadd.xlane.f32.xlu1 %v41_v2  ;;  %3127 = vst [vmem:[#allocation2_spill] sm:$0xff] %v2104_v48  ;;  %v345_v15 = vsub.f32 %v3128_v34, %v1928_v13  ;;  %v346_v31 = vsub.f32 %v3129_v27, %v1928_v13  ;;  %v3130_v2 = vld [vmem:[#allocation5_spill] sm:$0xff]  ;;  %1075 = vpow2.f32 %v501_v49  ;;  %v465_v33 = vmul.f32 1.442695, %v322_v22 }
  0xdd   :  { %638 = vadd.xlane.f32.xlu0 %v637_v41  ;;  %v613_v9 = vadd.f32 %v2095_v36, %v612_v3  ;;  %v325_v28 = vsub.f32 %v3130_v2, %v2079_v46  ;;  %v2112_v41 = vpop.eup %1051  ;;  %1077 = vpow2.f32 %v503_v14  ;;  %v467_v34 = vmul.f32 1.442695, %v323_v61 }
  0xde   :  { %3131 = vst [vmem:[#allocation3_spill] sm:$0xff] %v2112_v41  ;;  %v2117_v32 = vpop.eup %1053  ;;  %1079 = vpow2.f32 %v505_v63  ;;  %v509_v27 = vmul.f32 1.442695, %v344_v17  ;;  %v469_v2 = vmul.f32 1.442695, %v324_v52  ;;  %v3139_v17 = vld [vmem:[#allocation7_spill] sm:$0xff] }
  0xdf   :  { %v614_v3 = vadd.f32 %v2104_v48, %v613_v9  ;;  %3133 = vst [vmem:[#allocation4_spill] sm:$0xff] %v2117_v32  ;;  %v2119_v36 = vpop.eup %1055  ;;  %1081 = vpow2.f32 %v507_v4  ;;  %v511_v9 = vmul.f32 1.442695, %v345_v15  ;;  %v3136_v48 = vld [vmem:[#allocation6_spill] sm:$0xff]  ;;  %v471_v49 = vmul.f32 1.442695, %v325_v28 }
  0xe0   :  { %3134 = vst [vmem:[#allocation28_spill] sm:$0xff] %v2119_v36  ;;  %v2122_v37 = vpop.eup %1057  ;;  %v326_v16 = vsub.f32 %v3136_v48, %v2079_v46  ;;  %v513_v61 = vmul.f32 1.442695, %v346_v31  ;;  %v515_v13 = vmul.f32 1.442695, %v347_v21  ;;  %1083 = vpow2.f32 %v465_v33  ;;  %v3140_v52 = vld [vmem:[#allocation8_spill] sm:$0xff] }
  0xe1   :  { %v615_v29 = vadd.f32 %v2112_v41, %v614_v3  ;;  %3135 = vst [vmem:[#allocation31_spill] sm:$0xff] %v2122_v37  ;;  %v2126_v22 = vpop.eup %1059  ;;  %v327_v63 = vsub.f32 %v3139_v17, %v2079_v46  ;;  %v328_v4 = vsub.f32 %v3140_v52, %v2079_v46  ;;  %v3141_v15 = vld [vmem:[#allocation9_spill] sm:$0xff]  ;;  %1085 = vpow2.f32 %v467_v34  ;;  %v3143_v21 = vld [vmem:[#allocation10_spill] sm:$0xff]  ;;  %v3144_v17 = vld [vmem:[#allocation12_spill] sm:$0xff] }
  0xe2   :  { %3137 = vst [vmem:[#allocation5_spill] sm:$0xff] %v2126_v22  ;;  %v2129_v20 = vpop.eup %1061  ;;  %v329_v3 = vsub.f32 %v3141_v15, %v2079_v46  ;;  %v330_v33 = vsub.f32 %v3143_v21, %v2079_v46  ;;  %1087 = vpow2.f32 %v469_v2  ;;  %v331_v52 = vsub.f32 %v3144_v17, %v2079_v46  ;;  %v3146_v21 = vld [vmem:[#allocation17_spill] sm:$0xff] }
  0xe3   :  { %v616_v14 = vadd.f32 %v2117_v32, %v615_v29  ;;  %3138 = vst [vmem:[#allocation30_spill] sm:$0xff] %v2129_v20  ;;  %v2137_v48 = vpop.eup %1063  ;;  %v655_v31 = vadd.f32 %v2129_v20, %v2126_v22  ;;  %v3145_v32 = vld [vmem:[#allocation13_spill] sm:$0xff]  ;;  %1089 = vpow2.f32 %v471_v49  ;;  %v473_v34 = vmul.f32 1.442695, %v326_v16 }
  0xe4   :  { %3142 = vst [vmem:[#allocation6_spill] sm:$0xff] %v2137_v48  ;;  %v2144_v29 = vpop.eup %1065  ;;  %v332_v15 = vsub.f32 %v3145_v32, %v2079_v46  ;;  %1091 = vpow2.f32 %v509_v27  ;;  %v333_v2 = vsub.f32 %v3146_v21, %v2079_v46  ;;  %v477_v17 = vmul.f32 1.442695, %v328_v4  ;;  %v3152_v21 = vld [vmem:[#allocation14_spill] sm:$0xff]  ;;  %v3153_v4 = vld [vmem:[#allocation24_spill] sm:$0xff] }
  0xe5   :  { %v617_v28 = vadd.f32 %v2119_v36, %v616_v14  ;;  %v2150_v41 = vpop.eup %1067  ;;  %v656_v20 = vadd.f32 %v2137_v48, %v655_v31  ;;  %1093 = vpow2.f32 %v511_v9  ;;  %v475_v36 = vmul.f32 1.442695, %v327_v63 }
  0xe6   :  { %v2156_v22 = vpop.eup %1069  ;;  %v361_v32 = vsub.f32 %v3148_v57, %v1954_v43  ;;  %1095 = vpow2.f32 %v515_v13  ;;  %v334_v9 = vsub.f32 %v3152_v21, %v2079_v46  ;;  %v479_v63 = vmul.f32 1.442695, %v329_v3 }
  0xe7   :  { %v618_v14 = vadd.f32 %v2122_v37, %v617_v28  ;;  %3147 = vst [vmem:[#allocation7_spill] sm:$0xff] %v2156_v22  ;;  %v2160_v49 = vpop.eup %1071  ;;  %v657_v27 = vadd.f32 %v2156_v22, %v656_v20  ;;  %v3150_v28 = vld [vmem:[#allocation22_spill] sm:$0xff]  ;;  %1097 = vpow2.f32 %v473_v34  ;;  %v363_v57 = vsub.f32 %v3153_v4, %v1954_v43  ;;  %v3154_v22 = vld [vmem:[#allocation25_spill] sm:$0xff] }
  0xe8   :  { %3149 = vst [vmem:[#allocation8_spill] sm:$0xff] %v2160_v49  ;;  %v362_v31 = vsub.f32 %v3150_v28, %v1954_v43  ;;  %v2166_v48 = vpop.eup %1073  ;;  %1099 = vpow2.f32 %v513_v61  ;;  %v621_v28 = vsel %vm173_vm0, %v2160_v49, 0.0  ;;  %v364_v21 = vsub.f32 %v3154_v22, %v1954_v43  ;;  %v3156_v22 = vld [vmem:[#allocation26_spill] sm:$0xff] }
  0xe9   :  { %v619_v16 = vadd.f32 %v2144_v29, %v618_v14  ;;  %3151 = vst [vmem:[#allocation9_spill] sm:$0xff] %v2166_v48  ;;  %v658_v13 = vadd.f32 %v2166_v48, %v657_v27  ;;  %v481_v14 = vmul.f32 1.442695, %v330_v33  ;;  %v2174_v20 = vpop.eup %1075  ;;  %1101 = vpow2.f32 %v475_v36 }
  0xea   :  { %v543_v34 = vmul.f32 1.442695, %v361_v32  ;;  %v2180_v3 = vpop.eup %1077  ;;  %1103 = vpow2.f32 %v477_v17  ;;  %v545_v61 = vmul.f32 1.442695, %v362_v31  ;;  %v547_v33 = vmul.f32 1.442695, %v363_v57 }
  0xeb   :  { %v620_v37 = vadd.f32 %v2150_v41, %v619_v16  ;;  %v659_v4 = vadd.f32 %v2174_v20, %v658_v13  ;;  %v2183_v16 = vpop.eup %1079  ;;  %1105 = vpow2.f32 %v479_v63  ;;  %v483_v48 = vmul.f32 1.442695, %v331_v52  ;;  %v3159_v57 = vld [vmem:[#allocation27_spill] sm:$0xff]  ;;  %v2199_v52 = vpop.xlane.xlu1 %251 }
  0xec   :  { %3155 = vst [vmem:[#allocation10_spill] sm:$0xff] %v2183_v16  ;;  %v2185_v27 = vpop.eup %1081  ;;  %1107 = vpow2.f32 %v481_v14  ;;  %v365_v32 = vsub.f32 %v3156_v22, %v1954_v43  ;;  %v487_v13 = vmul.f32 1.442695, %v333_v2  ;;  %v489_v17 = vmul.f32 1.442695, %v334_v9  ;;  %3161 = vst [vmem:[#allocation21_spill] sm:$0xff] %v2199_v52 }
  0xed   :  { %v622_v46 = vadd.f32 %v621_v28, %v620_v37  ;;  %v660_v36 = vadd.f32 %v2180_v3, %v659_v4  ;;  %v2190_v49 = vpop.eup %1083  ;;  %v485_v37 = vmul.f32 1.442695, %v332_v15  ;;  %1109 = vpow2.f32 %v543_v34  ;;  %v3162_v15 = vld [vmem:[#allocation29_spill] sm:$0xff]  ;;  %v3163_v9 = vld [vmem:[#allocation32_spill] sm:$0xff] }
  0xee   :  { %3157 = vst [vmem:[#allocation12_spill] sm:$0xff] %v2190_v49  ;;  %v2192_v31 = vpop.eup %1085  ;;  %1111 = vpow2.f32 %v545_v61  ;;  %v549_v28 = vmul.f32 1.442695, %v364_v21  ;;  %v367_v2 = vsub.f32 %v3162_v15, %v1954_v43  ;;  %v368_v34 = vsub.f32 %v3163_v9, %v1954_v43  ;;  %v3165_v21 = vld [vmem:[#allocation33_spill] sm:$0xff]  ;;  %v3167_v15 = vld [vmem:[#allocation34_spill] sm:$0xff] }
  0xef   :  { %623 = vadd.xlane.f32.xlu1 %v622_v46  ;;  %3158 = vst [vmem:[#allocation13_spill] sm:$0xff] %v2192_v31  ;;  %v661_v63 = vadd.f32 %v2183_v16, %v660_v36  ;;  %v366_v46 = vsub.f32 %v3159_v57, %v1954_v43  ;;  %v2197_v14 = vpop.eup %1087  ;;  %v640_v4 = vadd.f32 %v2192_v31, %v2190_v49  ;;  %1113 = vpow2.f32 %v547_v33 }
  0xf0   :  { %3160 = vst [vmem:[#allocation17_spill] sm:$0xff] %v2197_v14  ;;  %v2207_v36 = vpop.eup %1089  ;;  %1115 = vpow2.f32 %v483_v48  ;;  %v369_v61 = vsub.f32 %v3165_v21, %v1954_v43  ;;  %v551_v57 = vmul.f32 1.442695, %v365_v32  ;;  %v370_v49 = vsub.f32 %v3167_v15, %v1954_v43  ;;  %v1231_v32 = vld [vmem:[%s2971_s1 + $0x208] sm:$0xff] }
  0xf1   :  { %3164 = vst [vmem:[#allocation22_spill] sm:$0xff] %v2207_v36  ;;  %v662_v22 = vadd.f32 %v2185_v27, %v661_v63  ;;  %v2212_v16 = vpop.eup %1091  ;;  %1117 = vpow2.f32 %v485_v37  ;;  %v641_v31 = vadd.f32 %v2197_v14, %v640_v4  ;;  %v371_v33 = vsub.f32 %v1833_v25, %v1954_v43  ;;  %v1232_v25 = vld [vmem:[%s2971_s1 + $0x210] sm:$0xff] }
  0xf2   :  { %3166 = vst [vmem:[#allocation14_spill] sm:$0xff] %v2212_v16  ;;  %v2219_v9 = vpop.eup %1093  ;;  %1119 = vpow2.f32 %v549_v28  ;;  %v553_v48 = vmul.f32 1.442695, %v366_v46  ;;  %v348_v37 = vsub.f32 %v1231_v32, %v2199_v52  ;;  %v555_v15 = vmul.f32 1.442695, %v367_v2  ;;  %v1233_v32 = vld [vmem:[%s2971_s1 + $0x218] sm:$0xff] }
  0xf3   :  { %3168 = vst [vmem:[#allocation24_spill] sm:$0xff] %v2219_v9  ;;  %v663_v63 = vadd.f32 %v2212_v16, %v662_v22  ;;  %v2226_v21 = vpop.eup %1095  ;;  %1121 = vpow2.f32 %v489_v17  ;;  %v642_v4 = vadd.f32 %v2207_v36, %v641_v31  ;;  %v349_v22 = vsub.f32 %v1232_v25, %v2199_v52  ;;  %v1234_v25 = vld [vmem:[%s2971_s1 + $0x220] sm:$0xff] }
  0xf4   :  { %v2233_v28 = vpop.eup %1097  ;;  %1123 = vpow2.f32 %v551_v57  ;;  %v557_v14 = vmul.f32 1.442695, %v368_v34  ;;  %v350_v17 = vsub.f32 %v1233_v32, %v2199_v52  ;;  %v559_v36 = vmul.f32 1.442695, %v369_v61 }
  0xf5   :  { %3169 = vst [vmem:[#allocation25_spill] sm:$0xff] %v2233_v28  ;;  %v664_v46 = vadd.f32 %v2219_v9, %v663_v63  ;;  %v2240_v31 = vpop.eup %1099  ;;  %1125 = vpow2.f32 %v487_v13  ;;  %v643_v2 = vadd.f32 %v2233_v28, %v642_v4  ;;  %v351_v63 = vsub.f32 %v1234_v25, %v2199_v52 }
  0xf6   :  { %3170 = vst [vmem:[#allocation26_spill] sm:$0xff] %v2240_v31  ;;  %v2247_v57 = vpop.eup %1101  ;;  %v372_v9 = vsub.f32 %v1838_v51, %v1954_v43  ;;  %1127 = vpow2.f32 %v553_v48  ;;  %v517_v32 = vmul.f32 1.442695, %v348_v37  ;;  %v666_v13 = vsel %vm173_vm0, %v2226_v21, 0.0  ;;  %v1235_v37 = vld [vmem:[%s2971_s1 + $0x228] sm:$0xff] }
  0xf7   :  { %v665_v34 = vadd.f32 %v2240_v31, %v664_v46  ;;  %v2252_v16 = vpop.eup %1103  ;;  %v644_v61 = vadd.f32 %v2247_v57, %v643_v2  ;;  %1129 = vpow2.f32 %v555_v15  ;;  %v519_v4 = vmul.f32 1.442695, %v349_v22 }
  0xf8   :  { %3171 = vst [vmem:[#allocation27_spill] sm:$0xff] %v2252_v16  ;;  %v2257_v28 = vpop.eup %1105  ;;  %v373_v46 = vsub.f32 %v1843_v50, %v1954_v43  ;;  %1131 = vpow2.f32 %v557_v14  ;;  %v521_v31 = vmul.f32 1.442695, %v350_v17  ;;  %v352_v15 = vsub.f32 %v1235_v37, %v2199_v52 }
  0xf9   :  { %3172 = vst [vmem:[#allocation29_spill] sm:$0xff] %v2257_v28  ;;  %v667_v25 = vadd.f32 %v666_v13, %v665_v34  ;;  %v2261_v51 = vpop.eup %1107  ;;  %v645_v48 = vadd.f32 %v2252_v16, %v644_v61  ;;  %1133 = vpow2.f32 %v559_v36  ;;  %v523_v22 = vmul.f32 1.442695, %v351_v63  ;;  %v1236_v36 = vld [vmem:[%s2971_s1 + $0x230] sm:$0xff]  ;;  %v2279_v63 = vpop.xlane.xlu1 %281 }
  0xfa   :  { %3173 = vst [vmem:[#allocation32_spill] sm:$0xff] %v2261_v51  ;;  %v2268_v2 = vpop.eup %1109  ;;  %v561_v34 = vmul.f32 1.442695, %v370_v49  ;;  %v563_v13 = vmul.f32 1.442695, %v371_v33  ;;  %1135 = vpow2.f32 %v517_v32  ;;  %v353_v61 = vsub.f32 %v1236_v36, %v2199_v52  ;;  %3177 = vst [vmem:[#allocation42_spill] sm:$0xff] %v2279_v63 }
  0xfb   :  { %3174 = vst [vmem:[#allocation33_spill] sm:$0xff] %v2268_v2  ;;  %668 = vadd.xlane.f32.xlu0 %v667_v25  ;;  %v2270_v50 = vpop.eup %1111  ;;  %v646_v14 = vadd.f32 %v2257_v28, %v645_v48  ;;  %v565_v17 = vmul.f32 1.442695, %v372_v9  ;;  %1137 = vpow2.f32 %v519_v4  ;;  %v567_v25 = vmul.f32 1.442695, %v373_v46  ;;  %v1237_v33 = vld [vmem:[%s2971_s1 + $0x238] sm:$0xff] }
  0xfc   :  { %3175 = vst [vmem:[#allocation34_spill] sm:$0xff] %v2270_v50  ;;  %v2277_v37 = vpop.eup %1113  ;;  %v685_v49 = vadd.f32 %v2270_v50, %v2268_v2  ;;  %v354_v9 = vsub.f32 %v1237_v33, %v2199_v52  ;;  %1139 = vpow2.f32 %v521_v31  ;;  %v1238_v4 = vld [vmem:[%s2971_s1 + $0x240] sm:$0xff]  ;;  %v525_v36 = vmul.f32 1.442695, %v352_v15  ;;  %v3180_v33 = vld [vmem:[#allocation19_spill] sm:$0xff]  ;;  %v1239_v15 = vld [vmem:[%s2971_s1 + $0x2d8] sm:$0xff] }
  0xfd   :  { %3176 = vst [vmem:[#allocation41_spill] sm:$0xff] %v2277_v37  ;;  %v2287_v32 = vpop.eup %1115  ;;  %v647_v48 = vadd.f32 %v2261_v51, %v646_v14  ;;  %v355_v46 = vsub.f32 %v1238_v4, %v2199_v52  ;;  %1141 = vpow2.f32 %v523_v22  ;;  %v356_v31 = vsub.f32 %v3180_v33, %v2199_v52  ;;  %v3181_v2 = vld [vmem:[#allocation23_spill] sm:$0xff] }
  0xfe   :  { %3178 = vst [vmem:[#allocation43_spill] sm:$0xff] %v2287_v32  ;;  %v2294_v43 = vpop.eup %1117  ;;  %1143 = vpow2.f32 %v561_v34  ;;  %v686_v50 = vadd.f32 %v2277_v37, %v685_v49  ;;  %v357_v28 = vsub.f32 %v3181_v2, %v2199_v52  ;;  %v527_v16 = vmul.f32 1.442695, %v353_v61  ;;  %v1240_v2 = vld [vmem:[%s2971_s1 + $0x2e0] sm:$0xff] }
  0xff   :  { %3179 = vst [vmem:[#allocation44_spill] sm:$0xff] %v2294_v43  ;;  %v2301_v14 = vpop.eup %1119  ;;  %v648_v51 = vadd.f32 %v2287_v32, %v647_v48  ;;  %1145 = vpow2.f32 %v563_v13  ;;  %v374_v22 = vsub.f32 %v1239_v15, %v2279_v63  ;;  %v529_v4 = vmul.f32 1.442695, %v354_v9  ;;  %v1241_v15 = vld [vmem:[%s2971_s1 + $0x2e8] sm:$0xff] }
 0x100   :  { %3182 = vst [vmem:[#allocation19_spill] sm:$0xff] %v2301_v14  ;;  %v2308_v34 = vpop.eup %1121  ;;  %1147 = vpow2.f32 %v567_v25  ;;  %v687_v49 = vadd.f32 %v2301_v14, %v686_v50  ;;  %v375_v48 = vsub.f32 %v1240_v2, %v2279_v63  ;;  %v531_v33 = vmul.f32 1.442695, %v355_v46  ;;  %v1242_v2 = vld [vmem:[%s2971_s1 + $0x2f0] sm:$0xff] }
 0x101   :  { %v2315_v13 = vpop.eup %1123  ;;  %v649_v61 = vadd.f32 %v2294_v43, %v648_v51  ;;  %1149 = vpow2.f32 %v525_v36  ;;  %v376_v25 = vsub.f32 %v1241_v15, %v2279_v63  ;;  %v533_v14 = vmul.f32 1.442695, %v356_v31  ;;  %v1243_v15 = vld [vmem:[%s2971_s1 + $0x258] sm:$0xff] }
 0x102   :  { %3183 = vst [vmem:[#allocation23_spill] sm:$0xff] %v2315_v13  ;;  %v2322_v50 = vpop.eup %1125  ;;  %1151 = vpow2.f32 %v565_v17  ;;  %v688_v9 = vadd.f32 %v2315_v13, %v687_v49  ;;  %v377_v51 = vsub.f32 %v1242_v2, %v2279_v63  ;;  %v358_v37 = vsub.f32 %v1243_v15, %v2199_v52 }
 0x103   :  { %3184 = vst [vmem:[#allocation45_spill] sm:$0xff] %v2322_v50  ;;  %v2329_v36 = vpop.eup %1127  ;;  %v650_v46 = vadd.f32 %v2322_v50, %v649_v61  ;;  %1153 = vpow2.f32 %v527_v16  ;;  %v569_v17 = vmul.f32 1.442695, %v374_v22  ;;  %v651_v31 = vsel %vm173_vm0, %v2308_v34, 0.0  ;;  %v1244_v50 = vld [vmem:[%s2971_s1 + $0x268] sm:$0xff] }
 0x104   :  { %v2336_v49 = vpop.eup %1129  ;;  %v689_v13 = vadd.f32 %v2329_v36, %v688_v9  ;;  %1155 = vpow2.f32 %v529_v4  ;;  %v571_v2 = vmul.f32 1.442695, %v375_v48  ;;  %v360_v15 = vsub.f32 %v1244_v50, %v2199_v52  ;;  %v1245_v4 = vld [vmem:[%s2971_s1 + $0x2f8] sm:$0xff] }
 0x105   :  { %3185 = vst [vmem:[#allocation46_spill] sm:$0xff] %v2336_v49  ;;  %v2341_v43 = vpop.eup %1131  ;;  %v652_v61 = vadd.f32 %v651_v31, %v650_v46  ;;  %1157 = vpow2.f32 %v531_v33  ;;  %v573_v16 = vmul.f32 1.442695, %v376_v25  ;;  %v378_v48 = vsub.f32 %v1245_v4, %v2279_v63  ;;  %v1246_v33 = vld [vmem:[%s2971_s1 + $0x260] sm:$0xff] }
 0x106   :  { %v2347_v22 = vpop.eup %1133  ;;  %v690_v32 = vadd.f32 %v2336_v49, %v689_v13  ;;  %1159 = vpow2.f32 %v533_v14  ;;  %v575_v9 = vmul.f32 1.442695, %v377_v51  ;;  %v359_v25 = vsub.f32 %v1246_v33, %v2199_v52  ;;  %v1247_v51 = vld [vmem:[%s2971_s1 + $0x300] sm:$0xff] }
 0x107   :  { %v2354_v46 = vpop.eup %1135  ;;  %653 = vadd.xlane.f32.xlu1 %v652_v61  ;;  %v535_v50 = vmul.f32 1.442695, %v357_v28  ;;  %1161 = vpow2.f32 %v569_v17  ;;  %v537_v31 = vmul.f32 1.442695, %v358_v37  ;;  %v379_v4 = vsub.f32 %v1247_v51, %v2279_v63  ;;  %v1248_v37 = vld [vmem:[%s2971_s1 + $0x308] sm:$0xff] }
 0x108   :  { %3186 = vst [vmem:[#allocation47_spill] sm:$0xff] %v2354_v46  ;;  %v2360_v13 = vpop.eup %1137  ;;  %v691_v14 = vadd.f32 %v2341_v43, %v690_v32  ;;  %1163 = vpow2.f32 %v571_v2  ;;  %v541_v49 = vmul.f32 1.442695, %v360_v15  ;;  %v380_v32 = vsub.f32 %v1248_v37, %v2279_v63 }
 0x109   :  { %3187 = vst [vmem:[#allocation48_spill] sm:$0xff] %v2360_v13  ;;  %v2367_v61 = vpop.eup %1139  ;;  %v670_v33 = vadd.f32 %v2360_v13, %v2354_v46  ;;  %1165 = vpow2.f32 %v573_v16  ;;  %v577_v51 = vmul.f32 1.442695, %v378_v48  ;;  %v539_v15 = vmul.f32 1.442695, %v359_v25 }
 0x10a   :  { %3188 = vst [vmem:[#allocation49_spill] sm:$0xff] %v2367_v61  ;;  %v2371_v28 = vpop.eup %1141  ;;  %v692_v17 = vadd.f32 %v2347_v22, %v691_v14  ;;  %1167 = vpow2.f32 %v575_v9  ;;  %v1249_v14 = vld [vmem:[%s2971_s1 + $0x310] sm:$0xff]  ;;  %v579_v37 = vmul.f32 1.442695, %v379_v4 }
 0x10b   :  { %3189 = vst [vmem:[#allocation50_spill] sm:$0xff] %v2371_v28  ;;  %v2378_v2 = vpop.eup %1143  ;;  %1169 = vpow2.f32 %v535_v50  ;;  %v671_v52 = vadd.f32 %v2367_v61, %v670_v33  ;;  %v381_v46 = vsub.f32 %v1249_v14, %v2279_v63 }
 0x10c   :  { %3190 = vst [vmem:[#allocation51_spill] sm:$0xff] %v2378_v2  ;;  %v2381_v13 = vpop.eup %1145  ;;  %v693_v16 = vadd.f32 %v2378_v2, %v692_v17  ;;  %1171 = vpow2.f32 %v537_v31  ;;  %v1250_v31 = vld [vmem:[%s2971_s1 + $0x318] sm:$0xff]  ;;  %v581_v17 = vmul.f32 1.442695, %v380_v32 }
 0x10d   :  { %3191 = vst [vmem:[#allocation52_spill] sm:$0xff] %v2381_v13  ;;  %v2388_v9 = vpop.eup %1147  ;;  %1173 = vpow2.f32 %v541_v49  ;;  %v672_v48 = vadd.f32 %v2371_v28, %v671_v52  ;;  %v382_v33 = vsub.f32 %v1250_v31, %v2279_v63  ;;  %v583_v28 = vmul.f32 1.442695, %v381_v46 }
 0x10e   :  { %3192 = vst [vmem:[#allocation53_spill] sm:$0xff] %v2388_v9  ;;  %v2391_v25 = vpop.eup %1149  ;;  %v694_v50 = vadd.f32 %v2381_v13, %v693_v16  ;;  %1175 = vpow2.f32 %v577_v51  ;;  %v1251_v16 = vld [vmem:[%s2971_s1 + $0x320] sm:$0xff]  ;;  %v696_v32 = vsel %vm173_vm0, %v2388_v9, 0.0  ;;  %v1253_v9 = vld [vmem:[%s2971_s1 + $0x338] sm:$0xff] }
 0x10f   :  { %3193 = vst [vmem:[#allocation54_spill] sm:$0xff] %v2391_v25  ;;  %v2398_v61 = vpop.eup %1151  ;;  %1177 = vpow2.f32 %v539_v15  ;;  %v673_v4 = vadd.f32 %v2391_v25, %v672_v48  ;;  %v383_v14 = vsub.f32 %v1251_v16, %v2279_v63  ;;  %v585_v16 = vmul.f32 1.442695, %v382_v33 }
 0x110   :  { %3194 = vst [vmem:[#allocation55_spill] sm:$0xff] %v2398_v61  ;;  %v2401_v49 = vpop.eup %1153  ;;  %v695_v52 = vadd.f32 %v2398_v61, %v694_v50  ;;  %1179 = vpow2.f32 %v579_v37  ;;  %v1252_v50 = vld [vmem:[%s2971_s1 + $0x328] sm:$0xff] }
 0x111   :  { %3195 = vst [vmem:[#allocation56_spill] sm:$0xff] %v2401_v49  ;;  %v2408_v31 = vpop.eup %1155  ;;  %v674_v51 = vadd.f32 %v2401_v49, %v673_v4  ;;  %v384_v25 = vsub.f32 %v1252_v50, %v2279_v63  ;;  %1181 = vpow2.f32 %v581_v17  ;;  %v386_v4 = vsub.f32 %v1253_v9, %v2279_v63 }
 0x112   :  { %3196 = vst [vmem:[#allocation57_spill] sm:$0xff] %v2408_v31  ;;  %v2413_v15 = vpop.eup %1157  ;;  %v697_v48 = vadd.f32 %v696_v32, %v695_v52  ;;  %v1254_v52 = vld [vmem:[%s2971_s1 + $0x330] sm:$0xff]  ;;  %1183 = vpow2.f32 %v583_v28  ;;  %v587_v33 = vmul.f32 1.442695, %v383_v14 }
 0x113   :  { %v2419_v37 = vpop.eup %1159  ;;  %v675_v46 = vadd.f32 %v2408_v31, %v674_v51  ;;  %v385_v17 = vsub.f32 %v1254_v52, %v2279_v63  ;;  %1185 = vpow2.f32 %v585_v16  ;;  %v589_v31 = vmul.f32 1.442695, %v384_v25 }
 0x114   :  { %v2426_v49 = vpop.eup %1161  ;;  %698 = vadd.xlane.f32.xlu0 %v697_v48  ;;  %v593_v13 = vmul.f32 1.442695, %v386_v4  ;;  %1187 = vpow2.f32 %v587_v33 }
 0x115   :  { %v2432_v32 = vpop.eup %1163  ;;  %v676_v51 = vadd.f32 %v2413_v15, %v675_v46  ;;  %v591_v28 = vmul.f32 1.442695, %v385_v17  ;;  %1189 = vpow2.f32 %v589_v31 }
 0x116   :  { %3197 = vst [vmem:[#allocation58_spill] sm:$0xff] %v2432_v32  ;;  %v2435_v50 = vpop.eup %1165  ;;  %v700_v9 = vadd.f32 %v2432_v32, %v2426_v49  ;;  %1191 = vpow2.f32 %v593_v13 }
 0x117   :  { %3198 = vst [vmem:[#allocation59_spill] sm:$0xff] %v2435_v50  ;;  %v2439_v48 = vpop.eup %1167  ;;  %v677_v61 = vadd.f32 %v2419_v37, %v676_v51  ;;  %1193 = vpow2.f32 %v591_v28 }
 0x118   :  { %3199 = vst [vmem:[#allocation60_spill] sm:$0xff] %v2439_v48  ;;  %v2442_v2 = vpop.eup %1169  ;;  %v701_v14 = vadd.f32 %v2435_v50, %v700_v9 }
 0x119   :  { %v2445_v52 = vpop.eup %1171  ;;  %v678_v46 = vadd.f32 %v2442_v2, %v677_v61 }
 0x11a   :  { %v2448_v16 = vpop.eup %1173  ;;  %v702_v25 = vadd.f32 %v2439_v48, %v701_v14 }
 0x11b   :  { %v2451_v63 = vpop.eup %1175  ;;  %v679_v51 = vadd.f32 %v2445_v52, %v678_v46  ;;  %v681_v61 = vsel %vm173_vm0, %v2448_v16, 0.0 }
 0x11c   :  { %3200 = vst [vmem:[#allocation61_spill] sm:$0xff] %v2451_v63  ;;  %v2454_v4 = vpop.eup %1177  ;;  %v703_v17 = vadd.f32 %v2451_v63, %v702_v25 }
 0x11d   :  { %v2457_v33 = vpop.eup %1179  ;;  %v680_v9 = vadd.f32 %v2454_v4, %v679_v51 }
 0x11e   :  { %v704_v31 = vadd.f32 %v2457_v33, %v703_v17  ;;  %v2463_v14 = vpop.eup %1181 }
 0x11f   :  { %v682_v48 = vadd.f32 %v681_v61, %v680_v9  ;;  %v2466_v13 = vpop.eup %1183 }
 0x120   :  { %v705_v46 = vadd.f32 %v2463_v14, %v704_v31  ;;  %v2469_v25 = vpop.eup %1185 }
 0x121   :  { %683 = vadd.xlane.f32.xlu1 %v682_v48  ;;  %3201 = vst [vmem:[#allocation62_spill] sm:$0xff] %v2469_v25  ;;  %v2472_v51 = vpop.eup %1187 }
 0x122   :  { %v706_v28 = vadd.f32 %v2466_v13, %v705_v46  ;;  %3202 = vst [vmem:[#allocation63_spill] sm:$0xff] %v2472_v51  ;;  %v2475_v32 = vpop.eup %1189 }
 0x123   :  { %3203 = vst [vmem:[#allocation64_spill] sm:$0xff] %v2475_v32  ;;  %v2477_v17 = vpop.eup %1191 }
 0x124   :  { %v707_v63 = vadd.f32 %v2469_v25, %v706_v28  ;;  %3204 = vst [vmem:[#allocation65_spill] sm:$0xff] %v2477_v17  ;;  %v2480_v61 = vpop.eup %1193  ;;  %v711_v31 = vsel %vm173_vm0, %v2477_v17, 0.0 }
 0x125   :  { %3205 = vst [vmem:[#allocation66_spill] sm:$0xff] %v2480_v61 }
 0x126   :  { %v708_v50 = vadd.f32 %v2472_v51, %v707_v63 }
 0x128   :  { %v709_v9 = vadd.f32 %v2475_v32, %v708_v50 }
 0x12a   :  { %v710_v48 = vadd.f32 %v2480_v61, %v709_v9 }
 0x12c   :  { %v712_v46 = vadd.f32 %v711_v31, %v710_v48 }
 0x12e   :  { %713 = vadd.xlane.f32.xlu1 %v712_v46 }
 0x15b   :  { %v609_v28 = vpop.xlane.xlu0 %608 }
 0x15c   :  { %1195 = vrcp.f32 %v609_v28 }
 0x15d   :  { %1197 = vlog2.f32 %v609_v28 }
 0x165   :  { %v43_v25 = vpop.xlane.xlu1 %42 }
 0x166   :  { %1199 = vrcp.f32 %v43_v25  ;;  %v639_v63 = vpop.xlane.xlu0 %638 }
 0x167   :  { %1201 = vlog2.f32 %v43_v25 }
 0x168   :  { %1203 = vrcp.f32 %v639_v63 }
 0x169   :  { %v1196_v51 = vpop.eup %1195  ;;  %1205 = vlog2.f32 %v639_v63 }
 0x16a   :  { %v1198_v50 = vpop.eup %1197  ;;  %v716_v32 = vmul.f32 %v1196_v51, %v1922_v44  ;;  %v717_v9 = vmul.f32 %v1196_v51, %v1926_v10  ;;  %v718_v61 = vmul.f32 %v1196_v51, %v1932_v24  ;;  %v719_v48 = vmul.f32 %v1196_v51, %v1938_v26 }
 0x16b   :  { %v720_v31 = vmul.f32 %v1196_v51, %v1942_v42  ;;  %v721_v46 = vmul.f32 %v1196_v51, %v1945_v40  ;;  %v722_v28 = vmul.f32 %v1196_v51, %v1949_v59  ;;  %v723_v25 = vmul.f32 %v1196_v51, %v1952_v53 }
 0x16c   :  { %v724_v17 = vmul.f32 %v1196_v51, %v1958_v1  ;;  %v725_v63 = vmul.f32 %v1196_v51, %v1961_v35  ;;  %v726_v44 = vmul.f32 %v1196_v51, %v1963_v5  ;;  %v727_v10 = vmul.f32 %v1196_v51, %v1966_v7  ;;  %827 = vst [vmem:[%s2973_s3] sm:$0xff] %v716_v32 }
 0x16d   :  { %828 = vst [vmem:[%s2973_s3 + $0x8] sm:$0xff] %v717_v9  ;;  %829 = vst [vmem:[%s2973_s3 + $0x10] sm:$0xff] %v718_v61  ;;  %v728_v24 = vmul.f32 %v1196_v51, %v1972_v12  ;;  %v932_v26 = vmul.f32 0.6931472, %v1198_v50 }
 0x16e   :  { %830 = vst [vmem:[%s2973_s3 + $0x18] sm:$0xff] %v719_v48  ;;  %831 = vst [vmem:[%s2973_s3 + $0x20] sm:$0xff] %v720_v31 }
 0x16f   :  { %832 = vst [vmem:[%s2973_s3 + $0x28] sm:$0xff] %v721_v46  ;;  %833 = vst [vmem:[%s2973_s3 + $0x30] sm:$0xff] %v722_v28  ;;  %v947_v42 = vadd.f32 %v932_v26, %v1874_v18  ;;  %v3210_v46 = vld [vmem:[#allocation15_spill] sm:$0xff]  ;;  %v3213_v26 = vld [vmem:[#allocation2_spill] sm:$0xff] }
 0x170   :  { %834 = vst [vmem:[%s2973_s3 + $0x38] sm:$0xff] %v723_v25  ;;  %835 = vst [vmem:[%s2973_s3 + $0x40] sm:$0xff] %v724_v17  ;;  %v3211_v25 = vld [vmem:[#allocation18_spill] sm:$0xff] }
 0x171   :  { %836 = vst [vmem:[%s2973_s3 + $0x48] sm:$0xff] %v725_v63  ;;  %837 = vst [vmem:[%s2973_s3 + $0x50] sm:$0xff] %v726_v44 }
 0x172   :  { %838 = vst [vmem:[%s2973_s3 + $0x58] sm:$0xff] %v727_v10  ;;  %839 = vst.msk [vmem:[%s2973_s3 + $0x60] sm:$0xff] %vm173_vm0, %v728_v24  ;;  %v3212_v10 = vld [vmem:[#allocation20_spill] sm:$0xff] }
 0x173   :  { %955 = vst.msk [vmem:[%s2974_s5] sm:$0xff] %vm56_vm2, %v947_v42  ;;  %v1200_v40 = vpop.eup %1199 }
 0x174   :  { %v1202_v59 = vpop.eup %1201  ;;  %v45_v53 = vmul.f32 %v1200_v40, %v2055_v45  ;;  %v46_v1 = vmul.f32 %v1200_v40, %v2057_v55  ;;  %v47_v35 = vmul.f32 %v1200_v40, %v2064_v19  ;;  %v48_v5 = vmul.f32 %v1200_v40, %v2072_v54  ;;  %v3214_v40 = vld [vmem:[#allocation3_spill] sm:$0xff] }
 0x175   :  { %v1204_v7 = vpop.eup %1203  ;;  %v54_v12 = vmul.f32 0.6931472, %v1202_v59 }
 0x176   :  { %v1206_v32 = vpop.eup %1205  ;;  %49 = vst [vmem:[%s2975_s2] sm:$0xff] %v45_v53  ;;  %50 = vst [vmem:[%s2975_s2 + $0x8] sm:$0xff] %v46_v1  ;;  %v744_v18 = vmul.f32 %v1204_v7, %v1918_v56  ;;  %v745_v45 = vmul.f32 %v1204_v7, %v1982_v30  ;;  %v746_v55 = vmul.f32 %v1204_v7, %v1987_v39  ;;  %v3206_v39 = vld [vmem:[#allocation39_spill] sm:$0xff]  ;;  %v3215_v53 = vld [vmem:[#allocation4_spill] sm:$0xff] }
 0x177   :  { %51 = vst [vmem:[%s2975_s2 + $0x10] sm:$0xff] %v47_v35  ;;  %52 = vst.msk [vmem:[%s2975_s2 + $0x18] sm:$0xff] %vm19_vm1, %v48_v5  ;;  %v747_v19 = vmul.f32 %v1204_v7, %v1991_v11  ;;  %v55_v54 = vadd.f32 %v54_v12, %v1968_v6  ;;  %v748_v51 = vmul.f32 %v1204_v7, %v1994_v58  ;;  %v936_v58 = vmul.f32 0.6931472, %v1206_v32  ;;  %v3216_v35 = vld [vmem:[#allocation28_spill] sm:$0xff] }
 0x178   :  { %v749_v17 = vmul.f32 %v1204_v7, %v1999_v47  ;;  %v750_v61 = vmul.f32 %v1204_v7, %v2002_v0  ;;  %v624_v50 = vpop.xlane.xlu1 %623  ;;  %v751_v9 = vmul.f32 %v1204_v7, %v2007_v8  ;;  %v752_v48 = vmul.f32 %v1204_v7, %v2014_v23  ;;  %853 = vst [vmem:[%s2973_s3 + $0xd0] sm:$0xff] %v744_v18  ;;  %v3207_v47 = vld [vmem:[#allocation35_spill] sm:$0xff] }
 0x179   :  { %v753_v56 = vmul.f32 %v1204_v7, %v2017_v38  ;;  %v754_v30 = vmul.f32 %v1204_v7, %v2026_v60  ;;  %854 = vst [vmem:[%s2973_s3 + $0xd8] sm:$0xff] %v745_v45  ;;  %855 = vst [vmem:[%s2973_s3 + $0xe0] sm:$0xff] %v746_v55  ;;  %1207 = vrcp.f32 %v624_v50  ;;  %v755_v6 = vmul.f32 %v1204_v7, %v2031_v62  ;;  %v3208_v38 = vld [vmem:[#allocation11_spill] sm:$0xff]  ;;  %v3209_v62 = vld [vmem:[#allocation40_spill] sm:$0xff] }
 0x17a   :  { %856 = vst [vmem:[%s2973_s3 + $0xe8] sm:$0xff] %v747_v19  ;;  %57 = vst.msk [vmem:[%s2976_s4] sm:$0xff] %vm56_vm2, %v55_v54  ;;  %v756_v11 = vmul.f32 %v1204_v7, %v3206_v39  ;;  %1209 = vlog2.f32 %v624_v50  ;;  %v949_v0 = vadd.f32 %v936_v58, %v3207_v47  ;;  %v3217_v7 = vld [vmem:[#allocation31_spill] sm:$0xff]  ;;  %v3218_v45 = vld [vmem:[#allocation8_spill] sm:$0xff] }
 0x17b   :  { %857 = vst [vmem:[%s2973_s3 + $0xf0] sm:$0xff] %v748_v51  ;;  %858 = vst [vmem:[%s2973_s3 + $0xf8] sm:$0xff] %v749_v17  ;;  %v3219_v55 = vld [vmem:[#allocation36_spill] sm:$0xff] }
 0x17c   :  { %859 = vst [vmem:[%s2973_s3 + $0x100] sm:$0xff] %v750_v61  ;;  %860 = vst [vmem:[%s2973_s3 + $0x108] sm:$0xff] %v751_v9  ;;  %v3220_v61 = vld [vmem:[#allocation5_spill] sm:$0xff]  ;;  %v3221_v9 = vld [vmem:[#allocation30_spill] sm:$0xff] }
 0x17d   :  { %861 = vst [vmem:[%s2973_s3 + $0x110] sm:$0xff] %v752_v48  ;;  %862 = vst [vmem:[%s2973_s3 + $0x118] sm:$0xff] %v753_v56  ;;  %v3222_v56 = vld [vmem:[#allocation6_spill] sm:$0xff] }
 0x17e   :  { %863 = vst [vmem:[%s2973_s3 + $0x120] sm:$0xff] %v754_v30  ;;  %864 = vst [vmem:[%s2973_s3 + $0x128] sm:$0xff] %v755_v6  ;;  %v3223_v6 = vld [vmem:[#allocation7_spill] sm:$0xff] }
 0x17f   :  { %865 = vst.msk [vmem:[%s2973_s3 + $0x130] sm:$0xff] %vm173_vm0, %v756_v11  ;;  %v3224_v11 = vld [vmem:[#allocation9_spill] sm:$0xff] }
 0x180   :  { %957 = vst.msk [vmem:[%s2974_s5 + $0x10] sm:$0xff] %vm56_vm2, %v949_v0 }
 0x184   :  { %v669_v44 = vpop.xlane.xlu0 %668 }
 0x185   :  { %1211 = vrcp.f32 %v669_v44 }
 0x186   :  { %v1208_v8 = vpop.eup %1207  ;;  %1213 = vlog2.f32 %v669_v44 }
 0x187   :  { %v1210_v23 = vpop.eup %1209  ;;  %v730_v60 = vmul.f32 %v1208_v8, %v3208_v38  ;;  %v731_v31 = vmul.f32 %v1208_v8, %v3209_v62  ;;  %v732_v28 = vmul.f32 %v1208_v8, %v3210_v46  ;;  %v733_v63 = vmul.f32 %v1208_v8, %v3211_v25 }
 0x188   :  { %v734_v24 = vmul.f32 %v1208_v8, %v3212_v10  ;;  %v735_v42 = vmul.f32 %v1208_v8, %v3213_v26  ;;  %v736_v59 = vmul.f32 %v1208_v8, %v3214_v40  ;;  %v737_v1 = vmul.f32 %v1208_v8, %v3215_v53 }
 0x189   :  { %v738_v5 = vmul.f32 %v1208_v8, %v3216_v35  ;;  %v739_v12 = vmul.f32 %v1208_v8, %v3217_v7  ;;  %v740_v32 = vmul.f32 %v1208_v8, %v2144_v29  ;;  %v741_v18 = vmul.f32 %v1208_v8, %v2150_v41  ;;  %840 = vst [vmem:[%s2973_s3 + $0x68] sm:$0xff] %v730_v60  ;;  %v3226_v60 = vld [vmem:[#allocation14_spill] sm:$0xff] }
 0x18a   :  { %841 = vst [vmem:[%s2973_s3 + $0x70] sm:$0xff] %v731_v31  ;;  %842 = vst [vmem:[%s2973_s3 + $0x78] sm:$0xff] %v732_v28  ;;  %v742_v29 = vmul.f32 %v1208_v8, %v3218_v45  ;;  %v934_v41 = vmul.f32 0.6931472, %v1210_v23  ;;  %v3225_v8 = vld [vmem:[#allocation10_spill] sm:$0xff]  ;;  %v3227_v31 = vld [vmem:[#allocation24_spill] sm:$0xff] }
 0x18b   :  { %843 = vst [vmem:[%s2973_s3 + $0x80] sm:$0xff] %v733_v63  ;;  %844 = vst [vmem:[%s2973_s3 + $0x88] sm:$0xff] %v734_v24  ;;  %v3228_v28 = vld [vmem:[#allocation26_spill] sm:$0xff]  ;;  %v3230_v24 = vld [vmem:[#allocation12_spill] sm:$0xff] }
 0x18c   :  { %845 = vst [vmem:[%s2973_s3 + $0x90] sm:$0xff] %v735_v42  ;;  %846 = vst [vmem:[%s2973_s3 + $0x98] sm:$0xff] %v736_v59  ;;  %v948_v19 = vadd.f32 %v934_v41, %v3219_v55  ;;  %v3231_v42 = vld [vmem:[#allocation13_spill] sm:$0xff]  ;;  %v3237_v41 = vld [vmem:[#allocation32_spill] sm:$0xff] }
 0x18d   :  { %847 = vst [vmem:[%s2973_s3 + $0xa0] sm:$0xff] %v737_v1  ;;  %848 = vst [vmem:[%s2973_s3 + $0xa8] sm:$0xff] %v738_v5  ;;  %v3232_v59 = vld [vmem:[#allocation17_spill] sm:$0xff]  ;;  %v3233_v1 = vld [vmem:[#allocation22_spill] sm:$0xff] }
 0x18e   :  { %849 = vst [vmem:[%s2973_s3 + $0xb0] sm:$0xff] %v739_v12  ;;  %850 = vst [vmem:[%s2973_s3 + $0xb8] sm:$0xff] %v740_v32  ;;  %v3234_v5 = vld [vmem:[#allocation25_spill] sm:$0xff]  ;;  %v3235_v32 = vld [vmem:[#allocation27_spill] sm:$0xff] }
 0x18f   :  { %851 = vst [vmem:[%s2973_s3 + $0xc0] sm:$0xff] %v741_v18  ;;  %852 = vst.msk [vmem:[%s2973_s3 + $0xc8] sm:$0xff] %vm173_vm0, %v742_v29  ;;  %v3236_v45 = vld [vmem:[#allocation29_spill] sm:$0xff] }
 0x190   :  { %956 = vst.msk [vmem:[%s2974_s5 + $0x8] sm:$0xff] %vm56_vm2, %v948_v19  ;;  %v654_v54 = vpop.xlane.xlu1 %653  ;;  %v3238_v19 = vld [vmem:[#allocation43_spill] sm:$0xff] }
 0x191   :  { %1215 = vrcp.f32 %v654_v54 }
 0x192   :  { %1217 = vlog2.f32 %v654_v54  ;;  %v1212_v51 = vpop.eup %1211 }
 0x193   :  { %v1214_v17 = vpop.eup %1213  ;;  %v772_v50 = vmul.f32 %v1212_v51, %v3220_v61  ;;  %v773_v48 = vmul.f32 %v1212_v51, %v3221_v9  ;;  %v774_v30 = vmul.f32 %v1212_v51, %v3222_v56  ;;  %v775_v39 = vmul.f32 %v1212_v51, %v3223_v6  ;;  %v3240_v61 = vld [vmem:[#allocation45_spill] sm:$0xff] }
 0x194   :  { %v776_v58 = vmul.f32 %v1212_v51, %v3224_v11  ;;  %v777_v47 = vmul.f32 %v1212_v51, %v2174_v20  ;;  %v778_v0 = vmul.f32 %v1212_v51, %v2180_v3  ;;  %v779_v23 = vmul.f32 %v1212_v51, %v3225_v8  ;;  %v3242_v6 = vld [vmem:[#allocation33_spill] sm:$0xff]  ;;  %v3243_v11 = vld [vmem:[#allocation34_spill] sm:$0xff]  ;;  %v3245_v8 = vld [vmem:[#allocation19_spill] sm:$0xff] }
 0x195   :  { %v780_v38 = vmul.f32 %v1212_v51, %v2185_v27  ;;  %v781_v62 = vmul.f32 %v1212_v51, %v3226_v60  ;;  %v782_v46 = vmul.f32 %v1212_v51, %v3227_v31  ;;  %v783_v25 = vmul.f32 %v1212_v51, %v3228_v28  ;;  %879 = vst [vmem:[%s2973_s3 + $0x1a0] sm:$0xff] %v772_v50  ;;  %v3229_v27 = vld [vmem:[#allocation37_spill] sm:$0xff]  ;;  %v3247_v31 = vld [vmem:[#allocation46_spill] sm:$0xff] }
 0x196   :  { %880 = vst [vmem:[%s2973_s3 + $0x1a8] sm:$0xff] %v773_v48  ;;  %881 = vst [vmem:[%s2973_s3 + $0x1b0] sm:$0xff] %v774_v30  ;;  %v784_v20 = vmul.f32 %v1212_v51, %v2226_v21  ;;  %v940_v3 = vmul.f32 0.6931472, %v1214_v17  ;;  %v3239_v51 = vld [vmem:[#allocation44_spill] sm:$0xff] }
 0x197   :  { %882 = vst [vmem:[%s2973_s3 + $0x1b8] sm:$0xff] %v775_v39  ;;  %883 = vst [vmem:[%s2973_s3 + $0x1c0] sm:$0xff] %v776_v58 }
 0x198   :  { %884 = vst [vmem:[%s2973_s3 + $0x1c8] sm:$0xff] %v777_v47  ;;  %885 = vst [vmem:[%s2973_s3 + $0x1d0] sm:$0xff] %v778_v0  ;;  %v951_v21 = vadd.f32 %v940_v3, %v3229_v27  ;;  %v3244_v47 = vld [vmem:[#allocation41_spill] sm:$0xff]  ;;  %v3249_v27 = vld [vmem:[#allocation52_spill] sm:$0xff] }
 0x199   :  { %886 = vst [vmem:[%s2973_s3 + $0x1d8] sm:$0xff] %v779_v23  ;;  %887 = vst [vmem:[%s2973_s3 + $0x1e0] sm:$0xff] %v780_v38  ;;  %v3246_v38 = vld [vmem:[#allocation23_spill] sm:$0xff] }
 0x19a   :  { %888 = vst [vmem:[%s2973_s3 + $0x1e8] sm:$0xff] %v781_v62  ;;  %889 = vst [vmem:[%s2973_s3 + $0x1f0] sm:$0xff] %v782_v46 }
 0x19b   :  { %890 = vst [vmem:[%s2973_s3 + $0x1f8] sm:$0xff] %v783_v25  ;;  %891 = vst.msk [vmem:[%s2973_s3 + $0x200] sm:$0xff] %vm173_vm0, %v784_v20  ;;  %v3248_v20 = vld [vmem:[#allocation51_spill] sm:$0xff] }
 0x19c   :  { %959 = vst.msk [vmem:[%s2974_s5 + $0x20] sm:$0xff] %vm56_vm2, %v951_v21 }
 0x19d   :  { %v699_v63 = vpop.xlane.xlu0 %698 }
 0x19e   :  { %v1216_v44 = vpop.eup %1215  ;;  %1219 = vrcp.f32 %v699_v63 }
 0x19f   :  { %v1218_v10 = vpop.eup %1217  ;;  %v758_v26 = vmul.f32 %v1216_v44, %v3230_v24  ;;  %v759_v40 = vmul.f32 %v1216_v44, %v3231_v42  ;;  %v760_v53 = vmul.f32 %v1216_v44, %v3232_v59  ;;  %v761_v35 = vmul.f32 %v1216_v44, %v3233_v1  ;;  %v3252_v24 = vld [vmem:[#allocation38_spill] sm:$0xff] }
 0x1a0   :  { %v762_v7 = vmul.f32 %v1216_v44, %v3234_v5  ;;  %v763_v12 = vmul.f32 %v1216_v44, %v2247_v57  ;;  %v764_v18 = vmul.f32 %v1216_v44, %v3235_v32  ;;  %v765_v29 = vmul.f32 %v1216_v44, %v3236_v45  ;;  %v3256_v32 = vld [vmem:[#allocation50_spill] sm:$0xff] }
 0x1a1   :  { %v766_v55 = vmul.f32 %v1216_v44, %v3237_v41  ;;  %v767_v54 = vmul.f32 %v1216_v44, %v3238_v19  ;;  %v768_v17 = vmul.f32 %v1216_v44, %v3239_v51  ;;  %v769_v50 = vmul.f32 %v1216_v44, %v3240_v61  ;;  %866 = vst [vmem:[%s2973_s3 + $0x138] sm:$0xff] %v758_v26  ;;  %v3257_v45 = vld [vmem:[#allocation54_spill] sm:$0xff]  ;;  %v3258_v41 = vld [vmem:[#allocation56_spill] sm:$0xff]  ;;  %v3259_v19 = vld [vmem:[#allocation57_spill] sm:$0xff] }
 0x1a2   :  { %867 = vst [vmem:[%s2973_s3 + $0x140] sm:$0xff] %v759_v40  ;;  %868 = vst [vmem:[%s2973_s3 + $0x148] sm:$0xff] %v760_v53  ;;  %v770_v57 = vmul.f32 %v1216_v44, %v2308_v34  ;;  %v938_v9 = vmul.f32 0.6931472, %v1218_v10  ;;  %1221 = vlog2.f32 %v699_v63  ;;  %v3241_v34 = vld [vmem:[#allocation16_spill] sm:$0xff]  ;;  %v3253_v53 = vld [vmem:[#allocation47_spill] sm:$0xff] }
 0x1a3   :  { %869 = vst [vmem:[%s2973_s3 + $0x150] sm:$0xff] %v761_v35  ;;  %870 = vst [vmem:[%s2973_s3 + $0x158] sm:$0xff] %v762_v7  ;;  %v3254_v35 = vld [vmem:[#allocation48_spill] sm:$0xff]  ;;  %v3255_v7 = vld [vmem:[#allocation49_spill] sm:$0xff] }
 0x1a4   :  { %871 = vst [vmem:[%s2973_s3 + $0x160] sm:$0xff] %v763_v12  ;;  %872 = vst [vmem:[%s2973_s3 + $0x168] sm:$0xff] %v764_v18  ;;  %v950_v48 = vadd.f32 %v938_v9, %v3241_v34  ;;  %v3261_v9 = vld [vmem:[#allocation58_spill] sm:$0xff] }
 0x1a5   :  { %873 = vst [vmem:[%s2973_s3 + $0x170] sm:$0xff] %v765_v29  ;;  %874 = vst [vmem:[%s2973_s3 + $0x178] sm:$0xff] %v766_v55 }
 0x1a6   :  { %875 = vst [vmem:[%s2973_s3 + $0x180] sm:$0xff] %v767_v54  ;;  %876 = vst [vmem:[%s2973_s3 + $0x188] sm:$0xff] %v768_v17 }
 0x1a7   :  { %877 = vst [vmem:[%s2973_s3 + $0x190] sm:$0xff] %v769_v50  ;;  %878 = vst.msk [vmem:[%s2973_s3 + $0x198] sm:$0xff] %vm173_vm0, %v770_v57 }
 0x1a8   :  { %958 = vst.msk [vmem:[%s2974_s5 + $0x18] sm:$0xff] %vm56_vm2, %v950_v48  ;;  %v3262_v48 = vld [vmem:[#allocation59_spill] sm:$0xff] }
 0x1aa   :  { %v684_v56 = vpop.xlane.xlu1 %683 }
 0x1ab   :  { %v1220_v30 = vpop.eup %1219  ;;  %1223 = vrcp.f32 %v684_v56 }
 0x1ac   :  { %1225 = vlog2.f32 %v684_v56  ;;  %v800_v39 = vmul.f32 %v1220_v30, %v3242_v6  ;;  %v801_v58 = vmul.f32 %v1220_v30, %v3243_v11  ;;  %v802_v0 = vmul.f32 %v1220_v30, %v3244_v47 }
 0x1ad   :  { %v803_v23 = vmul.f32 %v1220_v30, %v3245_v8  ;;  %v804_v60 = vmul.f32 %v1220_v30, %v3246_v38  ;;  %v805_v62 = vmul.f32 %v1220_v30, %v2329_v36  ;;  %v806_v46 = vmul.f32 %v1220_v30, %v3247_v31  ;;  %v3265_v8 = vld [vmem:[#allocation62_spill] sm:$0xff]  ;;  %v3266_v38 = vld [vmem:[#allocation63_spill] sm:$0xff] }
 0x1ae   :  { %v807_v28 = vmul.f32 %v1220_v30, %v2341_v43  ;;  %v808_v25 = vmul.f32 %v1220_v30, %v2347_v22  ;;  %v809_v3 = vmul.f32 %v1220_v30, %v3248_v20  ;;  %v810_v21 = vmul.f32 %v1220_v30, %v3249_v27  ;;  %905 = vst [vmem:[%s2973_s3 + $0x270] sm:$0xff] %v800_v39  ;;  %v3250_v43 = vld [vmem:[#allocation55_spill] sm:$0xff]  ;;  %v3251_v22 = vld [vmem:[#allocation53_spill] sm:$0xff]  ;;  %v3268_v31 = vld [vmem:[#allocation66_spill] sm:$0xff] }
 0x1af   :  { %906 = vst [vmem:[%s2973_s3 + $0x278] sm:$0xff] %v801_v58  ;;  %907 = vst [vmem:[%s2973_s3 + $0x280] sm:$0xff] %v802_v0  ;;  %v1222_v36 = vpop.eup %1221  ;;  %v811_v63 = vmul.f32 %v1220_v30, %v3250_v43  ;;  %v812_v44 = vmul.f32 %v1220_v30, %v3251_v22  ;;  %v3263_v30 = vld [vmem:[#allocation60_spill] sm:$0xff]  ;;  %v3264_v39 = vld [vmem:[#allocation61_spill] sm:$0xff] }
 0x1b0   :  { %908 = vst [vmem:[%s2973_s3 + $0x288] sm:$0xff] %v803_v23  ;;  %909 = vst [vmem:[%s2973_s3 + $0x290] sm:$0xff] %v804_v60  ;;  %v944_v10 = vmul.f32 0.6931472, %v1222_v36 }
 0x1b1   :  { %910 = vst [vmem:[%s2973_s3 + $0x298] sm:$0xff] %v805_v62  ;;  %911 = vst [vmem:[%s2973_s3 + $0x2a0] sm:$0xff] %v806_v46  ;;  %v3267_v62 = vld [vmem:[#allocation64_spill] sm:$0xff] }
 0x1b2   :  { %912 = vst [vmem:[%s2973_s3 + $0x2a8] sm:$0xff] %v807_v28  ;;  %913 = vst [vmem:[%s2973_s3 + $0x2b0] sm:$0xff] %v808_v25  ;;  %v953_v26 = vadd.f32 %v944_v10, %v3252_v24  ;;  %v3270_v25 = vld [vmem:[#allocation42_spill] sm:$0xff] }
 0x1b3   :  { %914 = vst [vmem:[%s2973_s3 + $0x2b8] sm:$0xff] %v809_v3  ;;  %915 = vst [vmem:[%s2973_s3 + $0x2c0] sm:$0xff] %v810_v21 }
 0x1b4   :  { %916 = vst [vmem:[%s2973_s3 + $0x2c8] sm:$0xff] %v811_v63  ;;  %917 = vst.msk [vmem:[%s2973_s3 + $0x2d0] sm:$0xff] %vm173_vm0, %v812_v44 }
 0x1b5   :  { %961 = vst.msk [vmem:[%s2974_s5 + $0x30] sm:$0xff] %vm56_vm2, %v953_v26 }
 0x1b7   :  { %v714_v42 = vpop.xlane.xlu1 %713 }
 0x1b8   :  { %v1224_v40 = vpop.eup %1223  ;;  %1227 = vrcp.f32 %v714_v42 }
 0x1b9   :  { %v1226_v59 = vpop.eup %1225  ;;  %v786_v1 = vmul.f32 %v1224_v40, %v3253_v53  ;;  %v787_v5 = vmul.f32 %v1224_v40, %v3254_v35  ;;  %v788_v12 = vmul.f32 %v1224_v40, %v3255_v7  ;;  %v789_v18 = vmul.f32 %v1224_v40, %v3256_v32 }
 0x1ba   :  { %v790_v29 = vmul.f32 %v1224_v40, %v3257_v45  ;;  %v791_v55 = vmul.f32 %v1224_v40, %v3258_v41  ;;  %v792_v54 = vmul.f32 %v1224_v40, %v3259_v19  ;;  %v793_v51 = vmul.f32 %v1224_v40, %v2413_v15 }
 0x1bb   :  { %v794_v17 = vmul.f32 %v1224_v40, %v2419_v37  ;;  %v795_v61 = vmul.f32 %v1224_v40, %v2442_v2  ;;  %v796_v50 = vmul.f32 %v1224_v40, %v2445_v52  ;;  %v797_v57 = vmul.f32 %v1224_v40, %v2454_v4  ;;  %892 = vst [vmem:[%s2973_s3 + $0x208] sm:$0xff] %v786_v1  ;;  %v3260_v37 = vld [vmem:[#allocation21_spill] sm:$0xff] }
 0x1bc   :  { %893 = vst [vmem:[%s2973_s3 + $0x210] sm:$0xff] %v787_v5  ;;  %894 = vst [vmem:[%s2973_s3 + $0x218] sm:$0xff] %v788_v12  ;;  %v798_v2 = vmul.f32 %v1224_v40, %v2448_v16  ;;  %v942_v15 = vmul.f32 0.6931472, %v1226_v59  ;;  %1229 = vlog2.f32 %v714_v42 }
 0x1bd   :  { %895 = vst [vmem:[%s2973_s3 + $0x220] sm:$0xff] %v789_v18  ;;  %896 = vst [vmem:[%s2973_s3 + $0x228] sm:$0xff] %v790_v29 }
 0x1be   :  { %897 = vst [vmem:[%s2973_s3 + $0x230] sm:$0xff] %v791_v55  ;;  %898 = vst [vmem:[%s2973_s3 + $0x238] sm:$0xff] %v792_v54  ;;  %v952_v52 = vadd.f32 %v942_v15, %v3260_v37 }
 0x1bf   :  { %899 = vst [vmem:[%s2973_s3 + $0x240] sm:$0xff] %v793_v51  ;;  %900 = vst [vmem:[%s2973_s3 + $0x248] sm:$0xff] %v794_v17 }
 0x1c0   :  { %901 = vst [vmem:[%s2973_s3 + $0x250] sm:$0xff] %v795_v61  ;;  %902 = vst [vmem:[%s2973_s3 + $0x258] sm:$0xff] %v796_v50 }
 0x1c1   :  { %903 = vst [vmem:[%s2973_s3 + $0x260] sm:$0xff] %v797_v57  ;;  %904 = vst.msk [vmem:[%s2973_s3 + $0x268] sm:$0xff] %vm173_vm0, %v798_v2 }
 0x1c2   :  { %960 = vst.msk [vmem:[%s2974_s5 + $0x28] sm:$0xff] %vm56_vm2, %v952_v52 }
 0x1c5   :  { %v1228_v16 = vpop.eup %1227 }
 0x1c6   :  { %v814_v4 = vmul.f32 %v1228_v16, %v2426_v49  ;;  %v815_v34 = vmul.f32 %v1228_v16, %v3261_v9  ;;  %v816_v56 = vmul.f32 %v1228_v16, %v3262_v48  ;;  %v817_v6 = vmul.f32 %v1228_v16, %v3263_v30 }
 0x1c7   :  { %v818_v11 = vmul.f32 %v1228_v16, %v3264_v39  ;;  %v819_v58 = vmul.f32 %v1228_v16, %v2457_v33  ;;  %v820_v47 = vmul.f32 %v1228_v16, %v2463_v14  ;;  %v821_v0 = vmul.f32 %v1228_v16, %v2466_v13  ;;  %v3269_v14 = vld [vmem:[#allocation65_spill] sm:$0xff] }
 0x1c8   :  { %v822_v23 = vmul.f32 %v1228_v16, %v3265_v8  ;;  %v823_v60 = vmul.f32 %v1228_v16, %v3266_v38  ;;  %v824_v49 = vmul.f32 %v1228_v16, %v3267_v62  ;;  %v825_v46 = vmul.f32 %v1228_v16, %v3268_v31  ;;  %918 = vst [vmem:[%s2973_s3 + $0x2d8] sm:$0xff] %v814_v4 }
 0x1c9   :  { %919 = vst [vmem:[%s2973_s3 + $0x2e0] sm:$0xff] %v815_v34  ;;  %920 = vst [vmem:[%s2973_s3 + $0x2e8] sm:$0xff] %v816_v56  ;;  %v1230_v33 = vpop.eup %1229  ;;  %v826_v13 = vmul.f32 %v1228_v16, %v3269_v14 }
 0x1ca   :  { %921 = vst [vmem:[%s2973_s3 + $0x2f0] sm:$0xff] %v817_v6  ;;  %922 = vst [vmem:[%s2973_s3 + $0x2f8] sm:$0xff] %v818_v11  ;;  %v946_v28 = vmul.f32 0.6931472, %v1230_v33 }
 0x1cb   :  { %923 = vst [vmem:[%s2973_s3 + $0x300] sm:$0xff] %v819_v58  ;;  %924 = vst [vmem:[%s2973_s3 + $0x308] sm:$0xff] %v820_v47 }
 0x1cc   :  { %925 = vst [vmem:[%s2973_s3 + $0x310] sm:$0xff] %v821_v0  ;;  %926 = vst [vmem:[%s2973_s3 + $0x318] sm:$0xff] %v822_v23  ;;  %v954_v20 = vadd.f32 %v946_v28, %v3270_v25 }
 0x1cd   :  { %927 = vst [vmem:[%s2973_s3 + $0x320] sm:$0xff] %v823_v60  ;;  %928 = vst [vmem:[%s2973_s3 + $0x328] sm:$0xff] %v824_v49 }
 0x1ce   :  { %929 = vst [vmem:[%s2973_s3 + $0x330] sm:$0xff] %v825_v46  ;;  %930 = vst.msk [vmem:[%s2973_s3 + $0x338] sm:$0xff] %vm173_vm0, %v826_v13 }
 0x1cf   :  { %962 = vst.msk [vmem:[%s2974_s5 + $0x38] sm:$0xff] %vm56_vm2, %v954_v20 }

// kernel: actor_critic_evaluate.3
= control target key start
LH: loop header
LB: loop body
LE: loop exit
PB: predicated region body
PF: predicated region fallthrough
CT: control target
= control target key end

     0   :  { %s2971_s0 = inlined_call_operand.vmem [shape: bf16[8,13312], index: 0, kind: input, shape index: {}]   ;;  %s2972_s1 = inlined_call_operand.hbm [shape: s8[13312,512], index: 1, kind: input, shape index: {}]   ;;  %s2973_s2 = inlined_call_operand.hbm [shape: f32[1,512], index: 2, kind: input, shape index: {}]   ;;  %s2974_s3 = inlined_call_operand.hbm [shape: f32[1,512], index: 3, kind: input, shape index: {}]   ;;  %s2975_s4 = inlined_call_operand.hbm [shape: f32[1,512], index: 4, kind: input, shape index: {}]   ;;  %s2976_s5 = inlined_call_operand.vmem [shape: f32[2,8,1], index: 5, kind: output, shape index: {}]  }
   0x1   :  { %2986 = sst [smem:[#allocation22_spill]] %s2971_s0 }
   0x2   :  { %2987 = sst [smem:[#allocation23_spill]] %s2973_s2 }
   0x3   :  { %2988 = sst [smem:[#allocation24_spill]] %s2976_s5 }
   0x4   :  { %10 = vsyncpa [#allocation4], 0 }
   0x5   :  { %12 = vsyncpa [#allocation4 + $0x1], 0 }
   0x6   :  { %13 = vsyncpa [#allocation6], 0 }
   0x7   :  { %15 = vsyncpa [#allocation6 + $0x1], 0 }
   0x8   :  { %16 = vsyncpa [#allocation9], 0 }
   0x9   :  { %18 = vsyncpa [#allocation9 + $0x1], 0  ;;  %s2383_s18 = smov 0   ;;  %s2385_s19 = smov 0  }
   0xa   :  { %s2387_s20 = smov 0   ;;  %s2389_s21 = smov 0  }
   0xb   :  { %s2391_s22 = smov 0   ;;  %s2393_s23 = smov 0  }
   0xc   :  { %s2395_s24 = smov 0   ;;  %s2397_s25 = smov 0  }
   0xd   :  { %s2399_s26 = smov 0   ;;  %s2401_s27 = smov 0  }
   0xe   :  { %s2403_s28 = smov 0  }
   0xf LB: > { %2989 = sst [smem:[#allocation13_spill]] %s2323_s23  ;;  %s2977_s29 = sadd.s32 4294967295, %s2343_s28   ;;  %s2343_s28 = sphi %s2403_s28, %s24_s28   ;;  %s2339_s27 = sphi %s2401_s27, %s3020_s27   ;;  %s2335_s26 = sphi %s2399_s26, %s3019_s26   ;;  %s2331_s25 = sphi %s2397_s25, %s3018_s25   ;;  %s2327_s24 = sphi %s2395_s24, %s3017_s24   ;;  %s2323_s23 = sphi %s2393_s23, %s3026_s23   ;;  %s2319_s22 = sphi %s2391_s22, %s3025_s22   ;;  %s2315_s21 = sphi %s2389_s21, %s3024_s21   ;;  %s2311_s20 = sphi %s2387_s20, %s3023_s20   ;;  %s2307_s19 = sphi %s2385_s19, %s3022_s19   ;;  %s2303_s18 = sphi %s2383_s18, %s3021_s18  }
  0x10   : > { %2990 = sst [smem:[#allocation14_spill]] %s2327_s24  ;;  %s36_s30 = sadd.s32 1, %s2335_s26 }
  0x11   : > { %2991 = sst [smem:[#allocation15_spill]] %s2331_s25  ;;  %p37_p0 = scmp.ge.s32.totalorder %s36_s30, 4 }
  0x12   : > { %2992 = sst [smem:[#allocation16_spill]] %s2335_s26  ;;  %s39_s6 = sadd.s32 1, %s2339_s27 }
  0x13   : > { %2993 = sst [smem:[#allocation17_spill]] %s2339_s27  ;;  %s80_s7 = sadd.s32 1, %s2323_s23 }
  0x14   : > { %p87_p1 = scmp.ne.s32.totalorder %s2323_s23, %s2319_s22  ;;  %s3028_s30 = smov (%p37_p0, %s36_s30), 0 }
  0x15   : > { %2994 = sst [smem:[#allocation18_spill]] %s3028_s30  ;;  %s3030_s6 = smov (!%p37_p0, %s39_s6), %s2339_s27 }
  0x16   : > { %s75_s8 = ssub.s32 %s2335_s26, %s3028_s30  ;;  %p88_p2 = scmp.eq.s32.totalorder %s2343_s28, 0 }
  0x17   : > { %p41_p3 = scmp.ge.s32.totalorder %s3030_s6, 2  ;;  %p93_p4 = scmp.ne.s32.totalorder %s2319_s22, %s2315_s21 }
  0x18   : > { %p2451_p5 = por %p88_p2, %p87_p1  ;;  %p2457_p6 = scmp.eq.s32.totalorder %s2977_s29, 0 }
  0x19   : > { %s3032_s6 = smov (%p41_p3, %s3030_s6), 0  ;;  %s106_s12 = sadd.s32 1, %s2311_s20 }
  0x1a   : > { %2997 = sst [smem:[#allocation19_spill]] %s3032_s6  ;;  %p2465_p7 = por %p2457_p6, %p93_p4 }
  0x1b   : > { %s76_s13 = ssub.s32 %s2339_s27, %s3032_s6  ;;  %p113_p8 = scmp.ne.s32.totalorder %s2311_s20, %s2307_s19 }
  0x1c   : > { %s77_s14 = sor.u32 %s76_s13, %s75_s8  ;;  %p104_p9 = scmp.eq.s32.totalorder %s76_s13, 0 }
  0x1d   : > { %p78_p10 = scmp.eq.s32.totalorder %s77_s14, 0  ;;  %p2476_p11 = por %p113_p8, %p88_p2 }
  0x1e   : > { %s2481_s16 = scalar_select %p104_p9, %s2311_s20, %s106_s12  }
  0x1f   : > { %s2484_s17 = scalar_select %p78_p10, %s2323_s23, %s80_s7  }
  0x20   : > { %3000 = sst [smem:[#allocation20_spill]] %s2481_s16  ;;  %p119_p12 = scmp.ne.s32.totalorder %s2307_s19, %s2303_s18 }
  0x21   : > { %3001 = sst [smem:[#allocation21_spill]] %s2484_s17  ;;  %p2010_p13 = scmp.lt.s32.totalorder %s2343_s28, 8 }
  0x22   : > { %s260_s21 = sand.u32 1, %s2343_s28   ;;  %p2492_p0 = por %p119_p12, %p2457_p6 }
  0x23   : > { %p2498_p1 = pnand %p2010_p13, %p2451_p5  ;;  %s2980_s14 = sand.u32 1, %s2311_s20  }
  0x24   : > { %s2505_s12 = sshll.u32 %s2980_s14, 1  ;;  %s2508_s7 = sshll.u32 %s2339_s27, 5 }
  0x25   : > { %s3004_s2 = sld [smem:[#allocation23_spill]]  ;;  %s264_s6 = scalar_lea.vmem [#allocation5], %s2505_s12 }
  0x26   : > { %s272_s30 = sshll.u32 %s264_s6, 4  ;;  %p2517_p2 = pnand %p2010_p13, %p2476_p11  ;;  %s273_s30 = int_to_ptr.vmem [resolvable:$true] %s272_s30 }
  0x27   : > { %p1947_p3 = scmp.ge.s32.totalorder %s2343_s28, 1  ;;  %p315_p4 = scmp.lt.s32.totalorder %s2343_s28, 9 }
  0x28   : > { %s2523_s14 = scalar_lea.sflag [#allocation6], %s260_s21  ;;  %p2135_p5 = pneg %p2517_p2 }
  0x29   : > { %s2146_s17 = scalar_lea.vmem %s273_s30, 32  ;;  %s2345_s29 = smov [#allocation5]  }
  0x2a   : > { %p2147_p6 = scmp.ne.s32.totalorder %s273_s30, %s2146_s17  ;;  %s2151_s6 = sshll.u32 %s2345_s29, 4  ;;  %s2152_s6 = int_to_ptr.vmem [resolvable:$false] %s2151_s6 }
  0x2b   : > { %s270_s10 = scalar_lea.hbm %s3004_s2, %s2508_s7  ;;  %s2153_s15 = scalar_lea.vmem %s2152_s6, 64 }
  0x2c   : > { %p2149_p8 = pnand %p2147_p6, %p2135_p5  ;;  %p2154_p10 = scmp.lt.s32.totalorder %s273_s30, %s2152_s6 }
  0x2d   : > { %p2155_p11 = scmp.lt.s32.totalorder %s2153_s15, %s2146_s17 }
  0x2e   : > { %p2150_p9 = pneg %p2149_p8 }
  0x2f   : > { %p2156_p12 = por %p2155_p11, %p2154_p10 }
  0x31   : > { %p2157_p13 = pnand %p2156_p12, %p2150_p9 }
  0x33   : > { %2160 = shalt.err (!%p2157_p13)
}
  0x34   : > { %2003 = dma.hbm_to_vmem [thread:$0]  (!%p2517_p2), %s270_s10, 32, %s273_s30, %s2523_s14  }
  0x35   : > { %p2537_p6 = pnand %p1947_p3, %p315_p4  ;;  %s236_s17 = sand.u32 1, %s2323_s23  }
  0x36   : > { %s1935_s18 = sshll.u32 %s2339_s27, 1  ;;  %s1987_s29 = smul.u32 1664, %s236_s17 }
  0x37   : > { %s1983_s6 = smul.u32 416, %s2335_s26  ;;  %s237_s30 = scalar_lea.sflag [#allocation4], %s236_s17 }
  0x38   : > { %s240_s2 = scalar_lea.vmem [#allocation3], %s1987_s29  ;;  %p2163_p8 = pneg %p2498_p1 }
  0x39   : > { %s247_s15 = sadd.s32 %s1983_s6, %s1935_s18  ;;  %s250_s16 = sshll.u32 %s240_s2, 4  ;;  %s251_s16 = int_to_ptr.vmem [resolvable:$true] %s250_s16 }
  0x3a   : > { %s1937_s0 = sshll.u32 %s247_s15, 7  ;;  %s2174_s10 = scalar_lea.vmem %s251_s16, 26624 }
  0x3b   : > { %s249_s24 = scalar_lea.hbm %s2972_s1, %s1937_s0  ;;  %p2175_p3 = scmp.ne.s32.totalorder %s251_s16, %s2174_s10 }
  0x3c   : > { %s2346_s23 = smov [#allocation3]  }
  0x3d   : > { %p2177_p4 = pnand %p2175_p3, %p2163_p8  ;;  %s2179_s27 = sshll.u32 %s2346_s23, 4  ;;  %s2180_s27 = int_to_ptr.vmem [resolvable:$false] %s2179_s27 }
  0x3e   : > { %s2181_s26 = scalar_lea.vmem %s2180_s27, 53248  ;;  %p2182_p10 = scmp.lt.s32.totalorder %s251_s16, %s2180_s27 }
  0x3f   : > { %p2178_p9 = pneg %p2177_p4  ;;  %p2183_p11 = scmp.lt.s32.totalorder %s2181_s26, %s2174_s10 }
  0x41   : > { %p2184_p12 = por %p2183_p11, %p2182_p10 }
  0x43   : > { %p2185_p13 = pnand %p2184_p12, %p2178_p9 }
  0x45   : > { %2188 = shalt.err (!%p2185_p13)
}
  0x46   : > { %s2347_s2 = smov 512   ;;  %s2348_s0 = smov 256  }
  0x47   : > { %s2349_s5 = smov 16   ;;  %s289_s23 = scalar_lea.hbm %s2974_s3, %s2508_s7 }
  0x48   : > { %2000 = dma.hbm_to_vmem [thread:$0]  (!%p2498_p1), %s249_s24, 26624, %s251_s16, %s237_s30, %s2347_s2, %s2348_s0, %s2349_s5  }
  0x49   : > { %s283_s18 = scalar_lea.vmem [#allocation7], %s2505_s12  ;;  %s2350_s27 = smov [#allocation7]  }
  0x4a   : > { %s291_s29 = sshll.u32 %s283_s18, 4  ;;  %s2207_s6 = sshll.u32 %s2350_s27, 4  ;;  %s292_s29 = int_to_ptr.vmem [resolvable:$true] %s291_s29  ;;  %s2208_s6 = int_to_ptr.vmem [resolvable:$false] %s2207_s6 }
  0x4b   : > { %s2202_s26 = scalar_lea.vmem %s292_s29, 32  ;;  %s2209_s15 = scalar_lea.vmem %s2208_s6, 64 }
  0x4c   : > { %p2203_p8 = scmp.ne.s32.totalorder %s292_s29, %s2202_s26  ;;  %p2210_p9 = scmp.lt.s32.totalorder %s292_s29, %s2208_s6 }
  0x4d   : > { %p2211_p10 = scmp.lt.s32.totalorder %s2209_s15, %s2202_s26 }
  0x4e   : > { %p2205_p3 = pnand %p2203_p8, %p2135_p5 }
  0x4f   : > { %p2212_p1 = por %p2211_p10, %p2210_p9 }
  0x50   : > { %p2206_p4 = pneg %p2205_p3 }
  0x52   : > { %p2213_p11 = pnand %p2212_p1, %p2206_p4 }
  0x54   : > { %2216 = shalt.err (!%p2213_p11)
}
  0x55   : > { %2006 = dma.hbm_to_vmem [thread:$0]  (!%p2517_p2), %s289_s23, 32, %s292_s29, %s2523_s14  }
  0x56   : > { %s308_s13 = scalar_lea.hbm %s2975_s4, %s2508_s7  ;;  %s302_s30 = scalar_lea.vmem [#allocation8], %s2505_s12 }
  0x57   : > { %s310_s10 = sshll.u32 %s302_s30, 4  ;;  %s3007_s2 = sand.u32 1, %s2311_s20   ;;  %s311_s10 = int_to_ptr.vmem [resolvable:$true] %s310_s10 }
  0x58   : > { %s299_s0 = scalar_lea.sflag [#allocation9], %s3007_s2  ;;  %s2230_s5 = scalar_lea.vmem %s311_s10, 32 }
  0x59   : > { %p2231_p12 = scmp.ne.s32.totalorder %s311_s10, %s2230_s5  ;;  %s2351_s25 = smov [#allocation8]  }
  0x5a   : > { %s2235_s17 = sshll.u32 %s2351_s25, 4  ;;  %s2236_s17 = int_to_ptr.vmem [resolvable:$false] %s2235_s17 }
  0x5b   : > { %p2233_p13 = pnand %p2231_p12, %p2135_p5  ;;  %s2237_s18 = scalar_lea.vmem %s2236_s17, 64 }
  0x5c   : > { %p2238_p3 = scmp.lt.s32.totalorder %s311_s10, %s2236_s17  ;;  %p2239_p4 = scmp.lt.s32.totalorder %s2237_s18, %s2230_s5 }
  0x5d   : > { %p2234_p8 = pneg %p2233_p13 }
  0x5e   : > { %p2240_p9 = por %p2239_p4, %p2238_p3 }
  0x60   : > { %p2241_p10 = pnand %p2240_p9, %p2234_p8 }
  0x62   : > { %2244 = shalt.err (!%p2241_p10)
}
  0x63   : > { %2009 = dma.hbm_to_vmem [thread:$0]  (!%p2517_p2), %s308_s13, 32, %s311_s10, %s299_s0  }
  0x64   : > { %319 = sbr.rel (%p2537_p6) target bundleno = 949 (0x3b5), region = 40  ;;  %s321_s14 = sand.u32 (!%p2537_p6), 1, %s2319_s22  }
  0x65   : > { %s1988_s12 = smul.u32 (!%p2537_p6), 1664, %s321_s14  ;;  %s322_s7 = scalar_lea.sflag (!%p2537_p6), [#allocation4], %s321_s14 }
  0x67   : > { %s2577_s23 = scalar_lea.vmem (!%p2537_p6), [#allocation3], %s1988_s12 }
  0x69   : > { %2290 = dma.done.wait (%p2465_p7), %s322_s7, 26624  }
  0x6a   : > { %2292 = vsyncadd (%p2465_p7), %s322_s7, 4294940672  ;;  %s3008_s29 = sadd.s32 4294967295, %s2343_s28   ;;  %s332_s26 = sand.u32 1, %s2307_s19  }
  0x6b   : > { %s330_s9 = sand.u32 1, %s3008_s29   ;;  %s2586_s21 = sshll.u32 %s332_s26, 1 }
  0x6c   : > { %s331_s27 = scalar_lea.sflag [#allocation6], %s330_s9  ;;  %s334_s6 = scalar_lea.vmem [#allocation5], %s2586_s21 }
  0x6d   : > { %2294 = dma.done.wait (%p2492_p0), %s331_s27, 64  }
  0x6e   : > { %2296 = vsyncadd (%p2492_p0), %s331_s27, 4294967232  ;;  %s343_s11 = scalar_lea.vmem [#allocation7], %s2586_s21  ;;  %s349_s15 = scalar_lea.sflag [#allocation9], %s332_s26 }
  0x6f   : > { %s352_s24 = scalar_lea.vmem [#allocation8], %s2586_s21 }
  0x70   : > { %2298 = dma.done.wait (%p2492_p0), %s349_s15, 32  }
  0x71   : > { %2300 = vsyncadd (%p2492_p0), %s349_s15, 4294967264  ;;  %s3009_s16 = sld [smem:[#allocation14_spill]] }
  0x72   : > { %s3010_s13 = sld [smem:[#allocation15_spill]] }
  0x73   : > { %s3011_s25 = sld [smem:[#allocation24_spill]] }
  0x74   : > { %s3012_s12 = sld [smem:[#allocation22_spill]] }
  0x77   : > { %s405_s30 = smul.u32 26, %s3009_s16  ;;  %p1953_p0 = scmp.ne.s32.totalorder %s3009_s16, 0 }
  0x78   : > { %p420_p7 = scmp.lt.s32.totalorder %s3010_s13, 1 }
  0x79   : > { %p408_p2 = scmp.lt.s32.totalorder %s405_s30, 103  ;;  %430 = sbr.rel (%p1953_p0) target bundleno = 128 (0x80), region = 60 }
  0x7a   : > { %s3034_s13 = smov (!%p420_p7, %s3010_s13), 1 }
  0x7b   : > { %s3036_s30 = smov (!%p408_p2, %s405_s30), 103  ;;  %s1952_s10 = sshll.u32 %s3034_s13, 3 }
  0x7c   : > { %s1951_s2 = sshll.u32 %s3036_s30, 2  ;;  %s2605_s17 = scalar_lea.vmem %s3011_s25, %s1952_s10 }
  0x7d   : > { %s2610_s8 = scalar_lea.vmem %s3012_s12, %s1951_s2 }
  0x7e   : > { %v2352_v0 = vmov 0.0  }
  0x7f   : > { %431 = vst [vmem:[#allocation2] sm:$0xff] %v2352_v0  ;;  %432 = vst [vmem:[#allocation2 + $0x8] sm:$0xff] %v2352_v0 }
  0x80 PF: > { %v455_v1 = vld [vmem:[%s2577_s23 + $0x38] sm:$0xff]  ;;  %v454_v3 = vld [vmem:[%s2577_s23 + $0x30] sm:$0xff]  ;;  %v453_v11 = vld [vmem:[%s2577_s23 + $0x28] sm:$0xff]  ;;  %s3013_s7 = sld [smem:[#allocation14_spill]] }
  0x81   : > { %v471_v2 = vld [vmem:[%s2577_s23 + $0xb8] sm:$0xff]  ;;  %v669_v4 = vunpack.c.l.s8.bf16 %v455_v1  ;;  %v671_v5 = vunpack.c.h.s8.bf16 %v455_v1  ;;  %v470_v8 = vld [vmem:[%s2577_s23 + $0xb0] sm:$0xff]  ;;  %v670_v9 = vunpack.c.h.s8.bf16 %v454_v3  ;;  %v469_v12 = vld [vmem:[%s2577_s23 + $0xa8] sm:$0xff]  ;;  %v668_v13 = vunpack.c.l.s8.bf16 %v454_v3 }
  0x82   : > { %v701_v6 = vunpack.c.l.s8.bf16 %v471_v2  ;;  %v703_v7 = vunpack.c.h.s8.bf16 %v471_v2  ;;  %v702_v10 = vunpack.c.h.s8.bf16 %v470_v8  ;;  %v700_v14 = vunpack.c.l.s8.bf16 %v470_v8  ;;  %v452_v17 = vld [vmem:[%s2577_s23 + $0x20] sm:$0xff]  ;;  %v451_v23 = vld [vmem:[%s2577_s23 + $0x18] sm:$0xff]  ;;  %v450_v29 = vld [vmem:[%s2577_s23 + $0x10] sm:$0xff] }
  0x83   : > { %1163 = vmatprep.subr.bf16.mxu0 %v671_v5  ;;  %v667_v15 = vunpack.c.h.s8.bf16 %v453_v11  ;;  %v699_v16 = vunpack.c.h.s8.bf16 %v469_v12  ;;  %v468_v18 = vld [vmem:[%s2577_s23 + $0xa0] sm:$0xff]  ;;  %v666_v19 = vunpack.c.h.s8.bf16 %v452_v17  ;;  %v665_v21 = vunpack.c.l.s8.bf16 %v453_v11  ;;  %v467_v24 = vld [vmem:[%s2577_s23 + $0x98] sm:$0xff]  ;;  %v466_v30 = vld [vmem:[%s2577_s23 + $0x90] sm:$0xff] }
  0x84   : > { %1204 = vmatprep.subr.bf16.mxu1 %v703_v7  ;;  %1164 = vmatpush1.bf16.msra.mxu0 %v670_v9  ;;  %v698_v20 = vunpack.c.h.s8.bf16 %v468_v18  ;;  %v697_v22 = vunpack.c.l.s8.bf16 %v469_v12  ;;  %v664_v25 = vunpack.c.l.s8.bf16 %v452_v17  ;;  %v696_v26 = vunpack.c.l.s8.bf16 %v468_v18  ;;  %v2626_v31 = vld [vmem:[%s2610_s8] sm:$0xff]  ;;  %v2629_v32 = vld [vmem:[%s2610_s8 + $0x8] sm:$0xff]  ;;  %v449_v38 = vld [vmem:[%s2577_s23 + $0x8] sm:$0xff] }
  0x85   : > { %1205 = vmatpush1.bf16.msra.mxu1 %v702_v10  ;;  %1165 = vmatprep.subr.bf16.mxu0 %v669_v4  ;;  %v663_v27 = vunpack.c.h.s8.bf16 %v451_v23  ;;  %v695_v28 = vunpack.c.h.s8.bf16 %v467_v24  ;;  %v662_v33 = vunpack.c.h.s8.bf16 %v450_v29  ;;  %v694_v34 = vunpack.c.h.s8.bf16 %v466_v30  ;;  %v465_v39 = vld [vmem:[%s2577_s23 + $0x88] sm:$0xff]  ;;  %v448_v45 = vld [vmem:[%s2577_s23] sm:$0xff]  ;;  %v463_v51 = vld [vmem:[%s2577_s23 + $0x78] sm:$0xff] }
  0x86   : > { %1206 = vmatprep.subr.bf16.mxu1 %v701_v6  ;;  %v661_v35 = vunpack.c.l.s8.bf16 %v451_v23  ;;  %v693_v36 = vunpack.c.l.s8.bf16 %v467_v24  ;;  %v1955_v37 = vcombine.high %v2626_v31, %v2626_v31  ;;  %v1957_v40 = vcombine.high %v2629_v32, %v2629_v32  ;;  %v464_v46 = vld [vmem:[%s2577_s23 + $0x80] sm:$0xff]  ;;  %v479_v52 = vld [vmem:[%s2577_s23 + $0xf8] sm:$0xff]  ;;  %v462_v57 = vld [vmem:[%s2577_s23 + $0x70] sm:$0xff]  ;;  %p1980_p5 = scmp.ne.s32.totalorder %s3013_s7, 3 }
  0x87   : > { %v660_v41 = vunpack.c.l.s8.bf16 %v450_v29  ;;  %v692_v42 = vunpack.c.l.s8.bf16 %v466_v30  ;;  %v659_v43 = vunpack.c.h.s8.bf16 %v449_v38  ;;  %v691_v44 = vunpack.c.h.s8.bf16 %v465_v39  ;;  %v478_v58 = vld [vmem:[%s2577_s23 + $0xf0] sm:$0xff]  ;;  %v461_v63 = vld [vmem:[%s2577_s23 + $0x68] sm:$0xff]  ;;  %v460_v5 = vld [vmem:[%s2577_s23 + $0x60] sm:$0xff] }
  0x88   : > { %1166 = vmatpush1.bf16.msra.mxu0 %v668_v13  ;;  %1195 = vmatprep.mubr.bf16.mxu0 %v1955_v37  ;;  %v658_v47 = vunpack.c.h.s8.bf16 %v448_v45  ;;  %v690_v48 = vunpack.c.h.s8.bf16 %v464_v46  ;;  %v657_v49 = vunpack.c.l.s8.bf16 %v449_v38  ;;  %v689_v50 = vunpack.c.l.s8.bf16 %v465_v39  ;;  %v477_v0 = vld [vmem:[%s2577_s23 + $0xe8] sm:$0xff]  ;;  %v476_v6 = vld [vmem:[%s2577_s23 + $0xe0] sm:$0xff]  ;;  %v459_v11 = vld [vmem:[%s2577_s23 + $0x58] sm:$0xff] }
  0x89   : > { %1207 = vmatpush1.bf16.msra.mxu1 %v700_v14  ;;  %1167 = vmatprep.subr.bf16.mxu0 %v667_v15  ;;  %v656_v53 = vunpack.c.l.s8.bf16 %v448_v45  ;;  %v688_v54 = vunpack.c.l.s8.bf16 %v464_v46  ;;  %v687_v55 = vunpack.c.h.s8.bf16 %v463_v51  ;;  %v719_v56 = vunpack.c.h.s8.bf16 %v479_v52  ;;  %v475_v12 = vld [vmem:[%s2577_s23 + $0xd8] sm:$0xff]  ;;  %v458_v17 = vld [vmem:[%s2577_s23 + $0x50] sm:$0xff]  ;;  %v457_v23 = vld [vmem:[%s2577_s23 + $0x48] sm:$0xff] }
  0x8a   : > { %1208 = vmatprep.subr.bf16.mxu1 %v699_v16  ;;  %1236 = vmatprep.mubr.bf16.mxu1 %v1957_v40  ;;  %v686_v59 = vunpack.c.h.s8.bf16 %v462_v57  ;;  %v718_v60 = vunpack.c.h.s8.bf16 %v478_v58  ;;  %v685_v61 = vunpack.c.l.s8.bf16 %v463_v51  ;;  %v717_v62 = vunpack.c.l.s8.bf16 %v479_v52  ;;  %v474_v18 = vld [vmem:[%s2577_s23 + $0xd0] sm:$0xff]  ;;  %v473_v24 = vld [vmem:[%s2577_s23 + $0xc8] sm:$0xff]  ;;  %v456_v29 = vld [vmem:[%s2577_s23 + $0x40] sm:$0xff] }
  0x8b   : > { %v684_v1 = vunpack.c.l.s8.bf16 %v462_v57  ;;  %v716_v2 = vunpack.c.l.s8.bf16 %v478_v58  ;;  %v683_v3 = vunpack.c.h.s8.bf16 %v461_v63  ;;  %v715_v4 = vunpack.c.h.s8.bf16 %v477_v0  ;;  %v472_v30 = vld [vmem:[%s2577_s23 + $0xc0] sm:$0xff]  ;;  %v487_v37 = vld [vmem:[%s2577_s23 + $0x138] sm:$0xff] }
  0x8c   : > { %1168 = vmatpush1.bf16.msra.mxu0 %v666_v19  ;;  %v682_v7 = vunpack.c.h.s8.bf16 %v460_v5  ;;  %v714_v8 = vunpack.c.h.s8.bf16 %v476_v6  ;;  %v681_v9 = vunpack.c.l.s8.bf16 %v461_v63  ;;  %v713_v10 = vunpack.c.l.s8.bf16 %v477_v0  ;;  %v503_v38 = vld [vmem:[%s2577_s23 + $0x1b8] sm:$0xff]  ;;  %v484_v58 = vld [vmem:[%s2577_s23 + $0x120] sm:$0xff] }
  0x8d   : > { %1209 = vmatpush1.bf16.msra.mxu1 %v698_v20  ;;  %1169 = vmatprep.subr.bf16.mxu0 %v665_v21  ;;  %v680_v13 = vunpack.c.l.s8.bf16 %v460_v5  ;;  %v712_v14 = vunpack.c.l.s8.bf16 %v476_v6  ;;  %v679_v15 = vunpack.c.h.s8.bf16 %v459_v11  ;;  %v711_v16 = vunpack.c.h.s8.bf16 %v475_v12  ;;  %v482_v6 = vld [vmem:[%s2577_s23 + $0x110] sm:$0xff] }
  0x8e   : > { %1210 = vmatprep.subr.bf16.mxu1 %v697_v22  ;;  %v678_v19 = vunpack.c.h.s8.bf16 %v458_v17  ;;  %v710_v20 = vunpack.c.h.s8.bf16 %v474_v18  ;;  %v677_v21 = vunpack.c.l.s8.bf16 %v459_v11  ;;  %v709_v22 = vunpack.c.l.s8.bf16 %v475_v12 }
  0x8f   : > { %v672_v39 = vunpack.c.l.s8.bf16 %v456_v29  ;;  %v704_v40 = vunpack.c.l.s8.bf16 %v472_v30  ;;  %v1954_v45 = vcombine.low %v2626_v31, %v2626_v31  ;;  %v1956_v46 = vcombine.low %v2629_v32, %v2629_v32 }
  0x90   : > { %1170 = vmatpush1.bf16.msra.mxu0 %v664_v25  ;;  %v676_v25 = vunpack.c.l.s8.bf16 %v458_v17  ;;  %v733_v51 = vunpack.c.l.s8.bf16 %v487_v37  ;;  %v765_v52 = vunpack.c.l.s8.bf16 %v503_v38 }
  0x91   : > { %1211 = vmatpush1.bf16.msra.mxu1 %v696_v26  ;;  %1171 = vmatprep.subr.bf16.mxu0 %v663_v27  ;;  %v708_v26 = vunpack.c.l.s8.bf16 %v474_v18  ;;  %v675_v27 = vunpack.c.h.s8.bf16 %v457_v23  ;;  %v480_v18 = vld [vmem:[%s2577_s23 + $0x100] sm:$0xff] }
  0x92   : > { %1212 = vmatprep.subr.bf16.mxu1 %v695_v28  ;;  %v707_v28 = vunpack.c.h.s8.bf16 %v473_v24 }
  0x94   : > { %1172 = vmatpush1.bf16.msra.mxu0 %v662_v33  ;;  %v674_v33 = vunpack.c.h.s8.bf16 %v456_v29 }
  0x95   : > { %1213 = vmatpush1.bf16.msra.mxu1 %v694_v34  ;;  %1173 = vmatprep.subr.bf16.mxu0 %v661_v35  ;;  %v706_v34 = vunpack.c.h.s8.bf16 %v472_v30  ;;  %v673_v35 = vunpack.c.l.s8.bf16 %v457_v23  ;;  %v494_v30 = vld [vmem:[%s2577_s23 + $0x170] sm:$0xff] }
  0x96   : > { %1214 = vmatprep.subr.bf16.mxu1 %v693_v36  ;;  %v705_v36 = vunpack.c.l.s8.bf16 %v473_v24 }
  0x98   : > { %1174 = vmatpush1.bf16.msra.mxu0 %v660_v41  ;;  %v735_v41 = vunpack.c.h.s8.bf16 %v487_v37 }
  0x99   : > { %1215 = vmatpush1.bf16.msra.mxu1 %v692_v42  ;;  %1175 = vmatprep.subr.bf16.mxu0 %v659_v43  ;;  %v486_v42 = vld [vmem:[%s2577_s23 + $0x130] sm:$0xff]  ;;  %v767_v43 = vunpack.c.h.s8.bf16 %v503_v38 }
  0x9a   : > { %1216 = vmatprep.subr.bf16.mxu1 %v691_v44  ;;  %v502_v44 = vld [vmem:[%s2577_s23 + $0x1b0] sm:$0xff] }
  0x9c   : > { %1176 = vmatpush1.bf16.msra.mxu0 %v658_v47  ;;  %v2664_v47 = vld [vmem:[%s2610_s8 + $0x10] sm:$0xff] }
  0x9d   : > { %1217 = vmatpush1.bf16.msra.mxu1 %v690_v48  ;;  %1177 = vmatprep.subr.bf16.mxu0 %v657_v49  ;;  %v2667_v48 = vld [vmem:[%s2610_s8 + $0x18] sm:$0xff]  ;;  %v734_v49 = vunpack.c.h.s8.bf16 %v486_v42  ;;  %v1959_v31 = vcombine.high %v2664_v47, %v2664_v47 }
  0x9e   : > { %1218 = vmatprep.subr.bf16.mxu1 %v689_v50  ;;  %v766_v50 = vunpack.c.h.s8.bf16 %v502_v44  ;;  %v1961_v32 = vcombine.high %v2667_v48, %v2667_v48 }
  0xa0   : > { %1178 = vmatpush1.bf16.msra.mxu0 %v656_v53  ;;  %v485_v53 = vld [vmem:[%s2577_s23 + $0x128] sm:$0xff] }
  0xa1   : > { %1219 = vmatpush1.bf16.msra.mxu1 %v688_v54  ;;  %1179 = vmatprep.subr.bf16.mxu0 %v687_v55  ;;  %v501_v54 = vld [vmem:[%s2577_s23 + $0x1a8] sm:$0xff]  ;;  %v732_v55 = vunpack.c.l.s8.bf16 %v486_v42  ;;  %v731_v57 = vunpack.c.h.s8.bf16 %v485_v53  ;;  %v729_v63 = vunpack.c.l.s8.bf16 %v485_v53  ;;  %v491_v53 = vld [vmem:[%s2577_s23 + $0x158] sm:$0xff] }
  0xa2   : > { %1220 = vmatprep.subr.bf16.mxu1 %v719_v56  ;;  %v764_v56 = vunpack.c.l.s8.bf16 %v502_v44  ;;  %v761_v0 = vunpack.c.l.s8.bf16 %v501_v54  ;;  %v492_v44 = vld [vmem:[%s2577_s23 + $0x160] sm:$0xff] }
  0xa4   : > { %1180 = vmatpush2.bf16.msra.mxu0 %v686_v59  ;;  %v763_v59 = vunpack.c.h.s8.bf16 %v501_v54  ;;  %v507_v54 = vld [vmem:[%s2577_s23 + $0x1d8] sm:$0xff] }
  0xa5   : > { %1221 = vmatpush2.bf16.msra.mxu1 %v718_v60  ;;  %1181 = vmatprep.subr.bf16.mxu0 %v685_v61  ;;  %v500_v60 = vld [vmem:[%s2577_s23 + $0x1a0] sm:$0xff]  ;;  %v730_v61 = vunpack.c.h.s8.bf16 %v484_v58 }
  0xa6   : > { %1222 = vmatprep.subr.bf16.mxu1 %v717_v62  ;;  %v762_v62 = vunpack.c.h.s8.bf16 %v500_v60 }
  0xa8   : > { %1182 = vmatpush2.bf16.msra.mxu0 %v684_v1  ;;  %v483_v1 = vld [vmem:[%s2577_s23 + $0x118] sm:$0xff] }
  0xa9   : > { %1223 = vmatpush2.bf16.msra.mxu1 %v716_v2  ;;  %1183 = vmatprep.subr.bf16.mxu0 %v683_v3  ;;  %v499_v2 = vld [vmem:[%s2577_s23 + $0x198] sm:$0xff]  ;;  %v728_v3 = vunpack.c.l.s8.bf16 %v484_v58  ;;  %v727_v5 = vunpack.c.h.s8.bf16 %v483_v1  ;;  %v725_v11 = vunpack.c.l.s8.bf16 %v483_v1  ;;  %v506_v58 = vld [vmem:[%s2577_s23 + $0x1d0] sm:$0xff] }
  0xaa   : > { %1224 = vmatprep.subr.bf16.mxu1 %v715_v4  ;;  %v760_v4 = vunpack.c.l.s8.bf16 %v500_v60  ;;  %v757_v12 = vunpack.c.l.s8.bf16 %v499_v2  ;;  %v774_v60 = vunpack.c.h.s8.bf16 %v506_v58 }
  0xac   : > { %1184 = vmatpush2.bf16.msra.mxu0 %v682_v7  ;;  %v759_v7 = vunpack.c.h.s8.bf16 %v499_v2  ;;  %v772_v2 = vunpack.c.l.s8.bf16 %v506_v58  ;;  %v512_v58 = vld [vmem:[%s2577_s23 + $0x200] sm:$0xff] }
  0xad   : > { %1225 = vmatpush2.bf16.msra.mxu1 %v714_v8  ;;  %1185 = vmatprep.subr.bf16.mxu0 %v681_v9  ;;  %v498_v8 = vld [vmem:[%s2577_s23 + $0x190] sm:$0xff]  ;;  %v726_v9 = vunpack.c.h.s8.bf16 %v482_v6 }
  0xae   : > { %1226 = vmatprep.subr.bf16.mxu1 %v713_v10  ;;  %v758_v10 = vunpack.c.h.s8.bf16 %v498_v8 }
  0xb0   : > { %1186 = vmatpush2.bf16.msra.mxu0 %v680_v13  ;;  %v481_v13 = vld [vmem:[%s2577_s23 + $0x108] sm:$0xff] }
  0xb1   : > { %1227 = vmatpush2.bf16.msra.mxu1 %v712_v14  ;;  %1187 = vmatprep.subr.bf16.mxu0 %v679_v15  ;;  %v497_v14 = vld [vmem:[%s2577_s23 + $0x188] sm:$0xff]  ;;  %v724_v15 = vunpack.c.l.s8.bf16 %v482_v6  ;;  %v723_v17 = vunpack.c.h.s8.bf16 %v481_v13  ;;  %v721_v23 = vunpack.c.l.s8.bf16 %v481_v13  ;;  %v504_v6 = vld [vmem:[%s2577_s23 + $0x1c0] sm:$0xff] }
  0xb2   : > { %1228 = vmatprep.subr.bf16.mxu1 %v711_v16  ;;  %v756_v16 = vunpack.c.l.s8.bf16 %v498_v8  ;;  %v753_v24 = vunpack.c.l.s8.bf16 %v497_v14  ;;  %v770_v8 = vunpack.c.h.s8.bf16 %v504_v6 }
  0xb4   : > { %1188 = vmatpush2.bf16.msra.mxu0 %v678_v19  ;;  %v755_v19 = vunpack.c.h.s8.bf16 %v497_v14  ;;  %v768_v14 = vunpack.c.l.s8.bf16 %v504_v6  ;;  %v526_v6 = vld [vmem:[%s2577_s23 + $0x270] sm:$0xff] }
  0xb5   : > { %1229 = vmatpush2.bf16.msra.mxu1 %v710_v20  ;;  %1189 = vmatprep.subr.bf16.mxu0 %v677_v21  ;;  %v496_v20 = vld [vmem:[%s2577_s23 + $0x180] sm:$0xff]  ;;  %v722_v21 = vunpack.c.h.s8.bf16 %v480_v18 }
  0xb6   : > { %1230 = vmatprep.subr.bf16.mxu1 %v709_v22  ;;  %v754_v22 = vunpack.c.h.s8.bf16 %v496_v20 }
  0xb8   : > { %1190 = vmatpush2.bf16.msra.mxu0 %v676_v25  ;;  %v495_v25 = vld [vmem:[%s2577_s23 + $0x178] sm:$0xff] }
  0xb9   : > { %1231 = vmatpush2.bf16.msra.mxu1 %v708_v26  ;;  %1191 = vmatprep.subr.bf16.mxu0 %v675_v27  ;;  %v511_v26 = vld [vmem:[%s2577_s23 + $0x1f8] sm:$0xff]  ;;  %v720_v27 = vunpack.c.l.s8.bf16 %v480_v18  ;;  %v751_v29 = vunpack.c.h.s8.bf16 %v495_v25  ;;  %v749_v37 = vunpack.c.l.s8.bf16 %v495_v25  ;;  %v534_v18 = vld [vmem:[%s2577_s23 + $0x2b0] sm:$0xff] }
  0xba   : > { %1232 = vmatprep.subr.bf16.mxu1 %v707_v28  ;;  %v752_v28 = vunpack.c.l.s8.bf16 %v496_v20  ;;  %v781_v38 = vunpack.c.l.s8.bf16 %v511_v26  ;;  %v1960_v20 = vcombine.low %v2667_v48, %v2667_v48 }
  0xbc   : > { %1192 = vmatpush2.bf16.msra.mxu0 %v674_v33  ;;  %v783_v33 = vunpack.c.h.s8.bf16 %v511_v26 }
  0xbd   : > { %1233 = vmatpush2.bf16.msra.mxu1 %v706_v34  ;;  %1193 = vmatprep.subr.bf16.mxu0 %v673_v35  ;;  %v510_v34 = vld [vmem:[%s2577_s23 + $0x1f0] sm:$0xff]  ;;  %v750_v35 = vunpack.c.h.s8.bf16 %v494_v30 }
  0xbe   : > { %1234 = vmatprep.subr.bf16.mxu1 %v705_v36  ;;  %v782_v36 = vunpack.c.h.s8.bf16 %v510_v34  ;;  %v780_v42 = vunpack.c.l.s8.bf16 %v510_v34  ;;  %v516_v34 = vld [vmem:[%s2577_s23 + $0x220] sm:$0xff] }
  0xc0   : > { %1194 = vmatpush2.bf16.msra.mxu0 %v672_v39  ;;  %v493_v39 = vld [vmem:[%s2577_s23 + $0x168] sm:$0xff] }
  0xc1   : > { %1235 = vmatpush2.bf16.msra.mxu1 %v704_v40  ;;  %1245 = vmatprep.subr.bf16.mxu0 %v735_v41  ;;  %v509_v40 = vld [vmem:[%s2577_s23 + $0x1e8] sm:$0xff]  ;;  %v748_v41 = vunpack.c.l.s8.bf16 %v494_v30  ;;  %v828_v30 = vunpack.c.l.s8.bf16 %v534_v18 }
  0xc2   : > { %1286 = vmatprep.subr.bf16.mxu1 %v767_v43  ;;  %v747_v43 = vunpack.c.h.s8.bf16 %v493_v39 }
  0xc3   : > { %1196 = vmatmul.mubr.bf16.vlgmr.msra.gmra.mxu0 %v1954_v45  ;;  %v779_v45 = vunpack.c.h.s8.bf16 %v509_v40 }
  0xc4   : > { %1237 = vmatmul.mubr.bf16.vlgmr.msra.gmra.mxu1 %v1956_v46  ;;  %1246 = vmatpush1.bf16.msra.mxu0 %v734_v49  ;;  %v508_v46 = vld [vmem:[%s2577_s23 + $0x1e0] sm:$0xff]  ;;  %v746_v49 = vunpack.c.h.s8.bf16 %v492_v44 }
  0xc5   : > { %1287 = vmatpush1.bf16.msra.mxu1 %v766_v50  ;;  %1247 = vmatprep.subr.bf16.mxu0 %v733_v51  ;;  %v778_v50 = vunpack.c.h.s8.bf16 %v508_v46  ;;  %v745_v51 = vunpack.c.l.s8.bf16 %v493_v39 }
  0xc6   : > { %1288 = vmatprep.subr.bf16.mxu1 %v765_v52  ;;  %1277 = vmatprep.mubr.bf16.mxu0 %v1959_v31  ;;  %v777_v52 = vunpack.c.l.s8.bf16 %v509_v40  ;;  %v744_v31 = vunpack.c.l.s8.bf16 %v492_v44 }
  0xc7   : > { %1318 = vmatprep.mubr.bf16.mxu1 %v1961_v32  ;;  %v776_v32 = vunpack.c.l.s8.bf16 %v508_v46  ;;  %v514_v46 = vld [vmem:[%s2577_s23 + $0x210] sm:$0xff] }
  0xc8   : > { %1248 = vmatpush1.bf16.msra.mxu0 %v732_v55  ;;  %v743_v55 = vunpack.c.h.s8.bf16 %v491_v53 }
  0xc9   : > { %1289 = vmatpush1.bf16.msra.mxu1 %v764_v56  ;;  %1249 = vmatprep.subr.bf16.mxu0 %v731_v57  ;;  %v490_v56 = vld [vmem:[%s2577_s23 + $0x150] sm:$0xff]  ;;  %v775_v57 = vunpack.c.h.s8.bf16 %v507_v54 }
  0xca   : > { %1290 = vmatprep.subr.bf16.mxu1 %v763_v59  ;;  %v742_v59 = vunpack.c.h.s8.bf16 %v490_v56  ;;  %v740_v1 = vunpack.c.l.s8.bf16 %v490_v56 }
  0xcc   : > { %1250 = vmatpush1.bf16.msra.mxu0 %v730_v61  ;;  %v741_v61 = vunpack.c.l.s8.bf16 %v491_v53 }
  0xcd   : > { %1291 = vmatpush1.bf16.msra.mxu1 %v762_v62  ;;  %1251 = vmatprep.subr.bf16.mxu0 %v729_v63  ;;  %v773_v62 = vunpack.c.l.s8.bf16 %v507_v54  ;;  %v489_v63 = vld [vmem:[%s2577_s23 + $0x148] sm:$0xff] }
  0xce   : > { %1292 = vmatprep.subr.bf16.mxu1 %v761_v0  ;;  %v505_v0 = vld [vmem:[%s2577_s23 + $0x1c8] sm:$0xff] }
  0xd0   : > { %1252 = vmatpush1.bf16.msra.mxu0 %v728_v3  ;;  %v739_v3 = vunpack.c.h.s8.bf16 %v489_v63 }
  0xd1   : > { %1293 = vmatpush1.bf16.msra.mxu1 %v760_v4  ;;  %1253 = vmatprep.subr.bf16.mxu0 %v727_v5  ;;  %v488_v4 = vld [vmem:[%s2577_s23 + $0x140] sm:$0xff]  ;;  %v771_v5 = vunpack.c.h.s8.bf16 %v505_v0 }
  0xd2   : > { %1294 = vmatprep.subr.bf16.mxu1 %v759_v7  ;;  %v738_v7 = vunpack.c.h.s8.bf16 %v488_v4  ;;  %v736_v13 = vunpack.c.l.s8.bf16 %v488_v4 }
  0xd4   : > { %1254 = vmatpush1.bf16.msra.mxu0 %v726_v9  ;;  %v737_v9 = vunpack.c.l.s8.bf16 %v489_v63 }
  0xd5   : > { %1295 = vmatpush1.bf16.msra.mxu1 %v758_v10  ;;  %1255 = vmatprep.subr.bf16.mxu0 %v725_v11  ;;  %v769_v10 = vunpack.c.l.s8.bf16 %v505_v0  ;;  %v519_v11 = vld [vmem:[%s2577_s23 + $0x238] sm:$0xff] }
  0xd6   : > { %1296 = vmatprep.subr.bf16.mxu1 %v757_v12  ;;  %v535_v12 = vld [vmem:[%s2577_s23 + $0x2b8] sm:$0xff]  ;;  %v797_v25 = vunpack.c.l.s8.bf16 %v519_v11 }
  0xd7   : > { %v829_v26 = vunpack.c.l.s8.bf16 %v535_v12 }
  0xd8   : > { %1256 = vmatpush1.bf16.msra.mxu0 %v724_v15  ;;  %v799_v15 = vunpack.c.h.s8.bf16 %v519_v11 }
  0xd9   : > { %1297 = vmatpush1.bf16.msra.mxu1 %v756_v16  ;;  %1257 = vmatprep.subr.bf16.mxu0 %v723_v17  ;;  %v518_v16 = vld [vmem:[%s2577_s23 + $0x230] sm:$0xff]  ;;  %v831_v17 = vunpack.c.h.s8.bf16 %v535_v12 }
  0xda   : > { %1298 = vmatprep.subr.bf16.mxu1 %v755_v19  ;;  %v1958_v19 = vcombine.low %v2664_v47, %v2664_v47 }
  0xdc   : > { %1258 = vmatpush1.bf16.msra.mxu0 %v722_v21  ;;  %v2710_v21 = vld [vmem:[%s2610_s8 + $0x20] sm:$0xff] }
  0xdd   : > { %1299 = vmatpush1.bf16.msra.mxu1 %v754_v22  ;;  %1259 = vmatprep.subr.bf16.mxu0 %v721_v23  ;;  %v2713_v22 = vld [vmem:[%s2610_s8 + $0x28] sm:$0xff]  ;;  %v798_v23 = vunpack.c.h.s8.bf16 %v518_v16  ;;  %v1963_v47 = vcombine.high %v2710_v21, %v2710_v21 }
  0xde   : > { %1300 = vmatprep.subr.bf16.mxu1 %v753_v24  ;;  %v830_v24 = vunpack.c.h.s8.bf16 %v534_v18  ;;  %v1965_v48 = vcombine.high %v2713_v22, %v2713_v22  ;;  %v524_v18 = vld [vmem:[%s2577_s23 + $0x260] sm:$0xff] }
  0xe0   : > { %1260 = vmatpush1.bf16.msra.mxu0 %v720_v27  ;;  %v517_v27 = vld [vmem:[%s2577_s23 + $0x228] sm:$0xff] }
  0xe1   : > { %1301 = vmatpush1.bf16.msra.mxu1 %v752_v28  ;;  %1261 = vmatprep.subr.bf16.mxu0 %v751_v29  ;;  %v533_v28 = vld [vmem:[%s2577_s23 + $0x2a8] sm:$0xff]  ;;  %v796_v29 = vunpack.c.l.s8.bf16 %v518_v16  ;;  %v793_v39 = vunpack.c.l.s8.bf16 %v517_v27 }
  0xe2   : > { %1302 = vmatprep.subr.bf16.mxu1 %v783_v33  ;;  %v795_v33 = vunpack.c.h.s8.bf16 %v517_v27  ;;  %v825_v40 = vunpack.c.l.s8.bf16 %v533_v28  ;;  %v523_v27 = vld [vmem:[%s2577_s23 + $0x258] sm:$0xff] }
  0xe4   : > { %1262 = vmatpush2.bf16.msra.mxu0 %v750_v35  ;;  %v827_v35 = vunpack.c.h.s8.bf16 %v533_v28  ;;  %v539_v28 = vld [vmem:[%s2577_s23 + $0x2d8] sm:$0xff] }
  0xe5   : > { %1303 = vmatpush2.bf16.msra.mxu1 %v782_v36  ;;  %1263 = vmatprep.subr.bf16.mxu0 %v749_v37  ;;  %v532_v36 = vld [vmem:[%s2577_s23 + $0x2a0] sm:$0xff]  ;;  %v794_v37 = vunpack.c.h.s8.bf16 %v516_v34 }
  0xe6   : > { %1304 = vmatprep.subr.bf16.mxu1 %v781_v38  ;;  %v826_v38 = vunpack.c.h.s8.bf16 %v532_v36  ;;  %v824_v44 = vunpack.c.l.s8.bf16 %v532_v36 }
  0xe8   : > { %1264 = vmatpush2.bf16.msra.mxu0 %v748_v41  ;;  %v515_v41 = vld [vmem:[%s2577_s23 + $0x218] sm:$0xff] }
  0xe9   : > { %1305 = vmatpush2.bf16.msra.mxu1 %v780_v42  ;;  %1265 = vmatprep.subr.bf16.mxu0 %v747_v43  ;;  %v531_v42 = vld [vmem:[%s2577_s23 + $0x298] sm:$0xff]  ;;  %v792_v43 = vunpack.c.l.s8.bf16 %v516_v34  ;;  %v789_v53 = vunpack.c.l.s8.bf16 %v515_v41  ;;  %v538_v34 = vld [vmem:[%s2577_s23 + $0x2d0] sm:$0xff] }
  0xea   : > { %1306 = vmatprep.subr.bf16.mxu1 %v779_v45  ;;  %v791_v45 = vunpack.c.h.s8.bf16 %v515_v41  ;;  %v821_v54 = vunpack.c.l.s8.bf16 %v531_v42  ;;  %v838_v36 = vunpack.c.h.s8.bf16 %v538_v34 }
  0xec   : > { %1266 = vmatpush2.bf16.msra.mxu0 %v746_v49  ;;  %v823_v49 = vunpack.c.h.s8.bf16 %v531_v42  ;;  %v836_v42 = vunpack.c.l.s8.bf16 %v538_v34  ;;  %v544_v34 = vld [vmem:[%s2577_s23 + $0x300] sm:$0xff] }
  0xed   : > { %1307 = vmatpush2.bf16.msra.mxu1 %v778_v50  ;;  %1267 = vmatprep.subr.bf16.mxu0 %v745_v51  ;;  %v530_v50 = vld [vmem:[%s2577_s23 + $0x290] sm:$0xff]  ;;  %v790_v51 = vunpack.c.h.s8.bf16 %v514_v46 }
  0xee   : > { %1308 = vmatprep.subr.bf16.mxu1 %v777_v52  ;;  %v822_v52 = vunpack.c.h.s8.bf16 %v530_v50  ;;  %v820_v56 = vunpack.c.l.s8.bf16 %v530_v50 }
  0xf0   : > { %1268 = vmatpush2.bf16.msra.mxu0 %v744_v31  ;;  %v513_v31 = vld [vmem:[%s2577_s23 + $0x208] sm:$0xff] }
  0xf1   : > { %1309 = vmatpush2.bf16.msra.mxu1 %v776_v32  ;;  %1269 = vmatprep.subr.bf16.mxu0 %v743_v55  ;;  %v529_v32 = vld [vmem:[%s2577_s23 + $0x288] sm:$0xff]  ;;  %v788_v55 = vunpack.c.l.s8.bf16 %v514_v46  ;;  %v785_v63 = vunpack.c.l.s8.bf16 %v513_v31  ;;  %v536_v46 = vld [vmem:[%s2577_s23 + $0x2c0] sm:$0xff] }
  0xf2   : > { %1310 = vmatprep.subr.bf16.mxu1 %v775_v57  ;;  %v787_v57 = vunpack.c.h.s8.bf16 %v513_v31  ;;  %v817_v0 = vunpack.c.l.s8.bf16 %v529_v32  ;;  %v834_v50 = vunpack.c.h.s8.bf16 %v536_v46 }
  0xf4   : > { %1270 = vmatpush2.bf16.msra.mxu0 %v742_v59  ;;  %v819_v59 = vunpack.c.h.s8.bf16 %v529_v32  ;;  %v832_v32 = vunpack.c.l.s8.bf16 %v536_v46  ;;  %v558_v46 = vld [vmem:[%s2577_s23 + $0x370] sm:$0xff] }
  0xf5   : > { %1311 = vmatpush2.bf16.msra.mxu1 %v774_v60  ;;  %1271 = vmatprep.subr.bf16.mxu0 %v741_v61  ;;  %v528_v60 = vld [vmem:[%s2577_s23 + $0x280] sm:$0xff]  ;;  %v786_v61 = vunpack.c.h.s8.bf16 %v512_v58 }
  0xf6   : > { %1312 = vmatprep.subr.bf16.mxu1 %v773_v62  ;;  %v818_v62 = vunpack.c.h.s8.bf16 %v528_v60  ;;  %v816_v4 = vunpack.c.l.s8.bf16 %v528_v60  ;;  %v1964_v60 = vcombine.low %v2713_v22, %v2713_v22 }
  0xf8   : > { %1272 = vmatpush2.bf16.msra.mxu0 %v740_v1  ;;  %v527_v1 = vld [vmem:[%s2577_s23 + $0x278] sm:$0xff] }
  0xf9   : > { %1313 = vmatpush2.bf16.msra.mxu1 %v772_v2  ;;  %1273 = vmatprep.subr.bf16.mxu0 %v739_v3  ;;  %v543_v2 = vld [vmem:[%s2577_s23 + $0x2f8] sm:$0xff]  ;;  %v784_v3 = vunpack.c.l.s8.bf16 %v512_v58  ;;  %v813_v11 = vunpack.c.l.s8.bf16 %v527_v1  ;;  %v566_v58 = vld [vmem:[%s2577_s23 + $0x3b0] sm:$0xff] }
  0xfa   : > { %1314 = vmatprep.subr.bf16.mxu1 %v771_v5  ;;  %v815_v5 = vunpack.c.h.s8.bf16 %v527_v1  ;;  %v845_v12 = vunpack.c.l.s8.bf16 %v543_v2 }
  0xfc   : > { %1274 = vmatpush2.bf16.msra.mxu0 %v738_v7  ;;  %v847_v7 = vunpack.c.h.s8.bf16 %v543_v2 }
  0xfd   : > { %1315 = vmatpush2.bf16.msra.mxu1 %v770_v8  ;;  %1275 = vmatprep.subr.bf16.mxu0 %v737_v9  ;;  %v542_v8 = vld [vmem:[%s2577_s23 + $0x2f0] sm:$0xff]  ;;  %v814_v9 = vunpack.c.h.s8.bf16 %v526_v6 }
  0xfe   : > { %1316 = vmatprep.subr.bf16.mxu1 %v769_v10  ;;  %v846_v10 = vunpack.c.h.s8.bf16 %v542_v8  ;;  %v844_v16 = vunpack.c.l.s8.bf16 %v542_v8  ;;  %v548_v8 = vld [vmem:[%s2577_s23 + $0x320] sm:$0xff] }
 0x100   : > { %1276 = vmatpush2.bf16.msra.mxu0 %v736_v13  ;;  %v525_v13 = vld [vmem:[%s2577_s23 + $0x268] sm:$0xff] }
 0x101   : > { %1317 = vmatpush2.bf16.msra.mxu1 %v768_v14  ;;  %1327 = vmatprep.subr.bf16.mxu0 %v799_v15  ;;  %v541_v14 = vld [vmem:[%s2577_s23 + $0x2e8] sm:$0xff]  ;;  %v812_v15 = vunpack.c.l.s8.bf16 %v526_v6  ;;  %v892_v6 = vunpack.c.l.s8.bf16 %v566_v58 }
 0x102   : > { %1368 = vmatprep.subr.bf16.mxu1 %v831_v17  ;;  %v811_v17 = vunpack.c.h.s8.bf16 %v525_v13 }
 0x103   : > { %1278 = vmatmul.mubr.bf16.vlgmr.msra.gmra.mxu0 %v1958_v19  ;;  %v843_v19 = vunpack.c.h.s8.bf16 %v541_v14 }
 0x104   : > { %1319 = vmatmul.mubr.bf16.vlgmr.msra.gmra.mxu1 %v1960_v20  ;;  %1328 = vmatpush1.bf16.msra.mxu0 %v798_v23  ;;  %v540_v20 = vld [vmem:[%s2577_s23 + $0x2e0] sm:$0xff]  ;;  %v810_v23 = vunpack.c.h.s8.bf16 %v524_v18 }
 0x105   : > { %1369 = vmatpush1.bf16.msra.mxu1 %v830_v24  ;;  %1329 = vmatprep.subr.bf16.mxu0 %v797_v25  ;;  %v842_v24 = vunpack.c.h.s8.bf16 %v540_v20  ;;  %v809_v25 = vunpack.c.l.s8.bf16 %v525_v13 }
 0x106   : > { %1370 = vmatprep.subr.bf16.mxu1 %v829_v26  ;;  %1359 = vmatprep.mubr.bf16.mxu0 %v1963_v47  ;;  %v841_v26 = vunpack.c.l.s8.bf16 %v541_v14  ;;  %v808_v47 = vunpack.c.l.s8.bf16 %v524_v18 }
 0x107   : > { %1400 = vmatprep.mubr.bf16.mxu1 %v1965_v48  ;;  %v840_v48 = vunpack.c.l.s8.bf16 %v540_v20  ;;  %v546_v20 = vld [vmem:[%s2577_s23 + $0x310] sm:$0xff] }
 0x108   : > { %1330 = vmatpush1.bf16.msra.mxu0 %v796_v29  ;;  %v807_v29 = vunpack.c.h.s8.bf16 %v523_v27 }
 0x109   : > { %1371 = vmatpush1.bf16.msra.mxu1 %v828_v30  ;;  %1331 = vmatprep.subr.bf16.mxu0 %v795_v33  ;;  %v522_v30 = vld [vmem:[%s2577_s23 + $0x250] sm:$0xff]  ;;  %v839_v33 = vunpack.c.h.s8.bf16 %v539_v28 }
 0x10a   : > { %1372 = vmatprep.subr.bf16.mxu1 %v827_v35  ;;  %v806_v35 = vunpack.c.h.s8.bf16 %v522_v30  ;;  %v804_v41 = vunpack.c.l.s8.bf16 %v522_v30 }
 0x10c   : > { %1332 = vmatpush1.bf16.msra.mxu0 %v794_v37  ;;  %v805_v37 = vunpack.c.l.s8.bf16 %v523_v27 }
 0x10d   : > { %1373 = vmatpush1.bf16.msra.mxu1 %v826_v38  ;;  %1333 = vmatprep.subr.bf16.mxu0 %v793_v39  ;;  %v837_v38 = vunpack.c.l.s8.bf16 %v539_v28  ;;  %v521_v39 = vld [vmem:[%s2577_s23 + $0x248] sm:$0xff] }
 0x10e   : > { %1374 = vmatprep.subr.bf16.mxu1 %v825_v40  ;;  %v537_v40 = vld [vmem:[%s2577_s23 + $0x2c8] sm:$0xff] }
 0x110   : > { %1334 = vmatpush1.bf16.msra.mxu0 %v792_v43  ;;  %v803_v43 = vunpack.c.h.s8.bf16 %v521_v39 }
 0x111   : > { %1375 = vmatpush1.bf16.msra.mxu1 %v824_v44  ;;  %1335 = vmatprep.subr.bf16.mxu0 %v791_v45  ;;  %v520_v44 = vld [vmem:[%s2577_s23 + $0x240] sm:$0xff]  ;;  %v835_v45 = vunpack.c.h.s8.bf16 %v537_v40 }
 0x112   : > { %1376 = vmatprep.subr.bf16.mxu1 %v823_v49  ;;  %v802_v49 = vunpack.c.h.s8.bf16 %v520_v44  ;;  %v800_v31 = vunpack.c.l.s8.bf16 %v520_v44 }
 0x114   : > { %1336 = vmatpush1.bf16.msra.mxu0 %v790_v51  ;;  %v801_v51 = vunpack.c.l.s8.bf16 %v521_v39 }
 0x115   : > { %1377 = vmatpush1.bf16.msra.mxu1 %v822_v52  ;;  %1337 = vmatprep.subr.bf16.mxu0 %v789_v53  ;;  %v833_v52 = vunpack.c.l.s8.bf16 %v537_v40  ;;  %v551_v53 = vld [vmem:[%s2577_s23 + $0x338] sm:$0xff] }
 0x116   : > { %1378 = vmatprep.subr.bf16.mxu1 %v821_v54  ;;  %v567_v54 = vld [vmem:[%s2577_s23 + $0x3b8] sm:$0xff]  ;;  %v861_v1 = vunpack.c.l.s8.bf16 %v551_v53 }
 0x117   : > { %v893_v2 = vunpack.c.l.s8.bf16 %v567_v54 }
 0x118   : > { %1338 = vmatpush1.bf16.msra.mxu0 %v788_v55  ;;  %v863_v55 = vunpack.c.h.s8.bf16 %v551_v53 }
 0x119   : > { %1379 = vmatpush1.bf16.msra.mxu1 %v820_v56  ;;  %1339 = vmatprep.subr.bf16.mxu0 %v787_v57  ;;  %v550_v56 = vld [vmem:[%s2577_s23 + $0x330] sm:$0xff]  ;;  %v895_v57 = vunpack.c.h.s8.bf16 %v567_v54 }
 0x11a   : > { %1380 = vmatprep.subr.bf16.mxu1 %v819_v59  ;;  %v1962_v59 = vcombine.low %v2710_v21, %v2710_v21 }
 0x11c   : > { %1340 = vmatpush1.bf16.msra.mxu0 %v786_v61  ;;  %v2756_v61 = vld [vmem:[%s2610_s8 + $0x30] sm:$0xff] }
 0x11d   : > { %1381 = vmatpush1.bf16.msra.mxu1 %v818_v62  ;;  %1341 = vmatprep.subr.bf16.mxu0 %v785_v63  ;;  %v2759_v62 = vld [vmem:[%s2610_s8 + $0x38] sm:$0xff]  ;;  %v862_v63 = vunpack.c.h.s8.bf16 %v550_v56  ;;  %v1967_v21 = vcombine.high %v2756_v61, %v2756_v61 }
 0x11e   : > { %1382 = vmatprep.subr.bf16.mxu1 %v817_v0  ;;  %v894_v0 = vunpack.c.h.s8.bf16 %v566_v58  ;;  %v1969_v22 = vcombine.high %v2759_v62, %v2759_v62  ;;  %v556_v58 = vld [vmem:[%s2577_s23 + $0x360] sm:$0xff] }
 0x120   : > { %1342 = vmatpush1.bf16.msra.mxu0 %v784_v3  ;;  %v549_v3 = vld [vmem:[%s2577_s23 + $0x328] sm:$0xff] }
 0x121   : > { %1383 = vmatpush1.bf16.msra.mxu1 %v816_v4  ;;  %1343 = vmatprep.subr.bf16.mxu0 %v815_v5  ;;  %v565_v4 = vld [vmem:[%s2577_s23 + $0x3a8] sm:$0xff]  ;;  %v860_v5 = vunpack.c.l.s8.bf16 %v550_v56  ;;  %v857_v13 = vunpack.c.l.s8.bf16 %v549_v3 }
 0x122   : > { %1384 = vmatprep.subr.bf16.mxu1 %v847_v7  ;;  %v859_v7 = vunpack.c.h.s8.bf16 %v549_v3  ;;  %v889_v14 = vunpack.c.l.s8.bf16 %v565_v4  ;;  %v555_v3 = vld [vmem:[%s2577_s23 + $0x358] sm:$0xff] }
 0x124   : > { %1344 = vmatpush2.bf16.msra.mxu0 %v814_v9  ;;  %v891_v9 = vunpack.c.h.s8.bf16 %v565_v4  ;;  %v571_v4 = vld [vmem:[%s2577_s23 + $0x3d8] sm:$0xff] }
 0x125   : > { %1385 = vmatpush2.bf16.msra.mxu1 %v846_v10  ;;  %1345 = vmatprep.subr.bf16.mxu0 %v813_v11  ;;  %v564_v10 = vld [vmem:[%s2577_s23 + $0x3a0] sm:$0xff]  ;;  %v858_v11 = vunpack.c.h.s8.bf16 %v548_v8 }
 0x126   : > { %1386 = vmatprep.subr.bf16.mxu1 %v845_v12  ;;  %v890_v12 = vunpack.c.h.s8.bf16 %v564_v10  ;;  %v888_v18 = vunpack.c.l.s8.bf16 %v564_v10 }
 0x128   : > { %1346 = vmatpush2.bf16.msra.mxu0 %v812_v15  ;;  %v547_v15 = vld [vmem:[%s2577_s23 + $0x318] sm:$0xff] }
 0x129   : > { %1387 = vmatpush2.bf16.msra.mxu1 %v844_v16  ;;  %1347 = vmatprep.subr.bf16.mxu0 %v811_v17  ;;  %v563_v16 = vld [vmem:[%s2577_s23 + $0x398] sm:$0xff]  ;;  %v856_v17 = vunpack.c.l.s8.bf16 %v548_v8  ;;  %v853_v27 = vunpack.c.l.s8.bf16 %v547_v15  ;;  %v570_v8 = vld [vmem:[%s2577_s23 + $0x3d0] sm:$0xff] }
 0x12a   : > { %1388 = vmatprep.subr.bf16.mxu1 %v843_v19  ;;  %v855_v19 = vunpack.c.h.s8.bf16 %v547_v15  ;;  %v885_v28 = vunpack.c.l.s8.bf16 %v563_v16  ;;  %v902_v10 = vunpack.c.h.s8.bf16 %v570_v8 }
 0x12c   : > { %1348 = vmatpush2.bf16.msra.mxu0 %v810_v23  ;;  %v887_v23 = vunpack.c.h.s8.bf16 %v563_v16  ;;  %v900_v16 = vunpack.c.l.s8.bf16 %v570_v8  ;;  %v594_v8 = vld [vmem:[%s2577_s23 + $0x490] sm:$0xff] }
 0x12d   : > { %1389 = vmatpush2.bf16.msra.mxu1 %v842_v24  ;;  %1349 = vmatprep.subr.bf16.mxu0 %v809_v25  ;;  %v562_v24 = vld [vmem:[%s2577_s23 + $0x390] sm:$0xff]  ;;  %v854_v25 = vunpack.c.h.s8.bf16 %v546_v20 }
 0x12e   : > { %1390 = vmatprep.subr.bf16.mxu1 %v841_v26  ;;  %v886_v26 = vunpack.c.h.s8.bf16 %v562_v24  ;;  %v884_v30 = vunpack.c.l.s8.bf16 %v562_v24 }
 0x130   : > { %1350 = vmatpush2.bf16.msra.mxu0 %v808_v47  ;;  %v545_v47 = vld [vmem:[%s2577_s23 + $0x308] sm:$0xff] }
 0x131   : > { %1391 = vmatpush2.bf16.msra.mxu1 %v840_v48  ;;  %1351 = vmatprep.subr.bf16.mxu0 %v807_v29  ;;  %v561_v48 = vld [vmem:[%s2577_s23 + $0x388] sm:$0xff]  ;;  %v852_v29 = vunpack.c.l.s8.bf16 %v546_v20  ;;  %v849_v39 = vunpack.c.l.s8.bf16 %v545_v47  ;;  %v568_v20 = vld [vmem:[%s2577_s23 + $0x3c0] sm:$0xff] }
 0x132   : > { %1392 = vmatprep.subr.bf16.mxu1 %v839_v33  ;;  %v851_v33 = vunpack.c.h.s8.bf16 %v545_v47  ;;  %v881_v40 = vunpack.c.l.s8.bf16 %v561_v48  ;;  %v898_v24 = vunpack.c.h.s8.bf16 %v568_v20 }
 0x134   : > { %1352 = vmatpush2.bf16.msra.mxu0 %v806_v35  ;;  %v883_v35 = vunpack.c.h.s8.bf16 %v561_v48  ;;  %v896_v48 = vunpack.c.l.s8.bf16 %v568_v20  ;;  %v592_v20 = vld [vmem:[%s2577_s23 + $0x480] sm:$0xff] }
 0x135   : > { %1393 = vmatpush2.bf16.msra.mxu1 %v838_v36  ;;  %1353 = vmatprep.subr.bf16.mxu0 %v805_v37  ;;  %v560_v36 = vld [vmem:[%s2577_s23 + $0x380] sm:$0xff]  ;;  %v850_v37 = vunpack.c.h.s8.bf16 %v544_v34 }
 0x136   : > { %1394 = vmatprep.subr.bf16.mxu1 %v837_v38  ;;  %v882_v38 = vunpack.c.h.s8.bf16 %v560_v36  ;;  %v880_v44 = vunpack.c.l.s8.bf16 %v560_v36  ;;  %v1968_v36 = vcombine.low %v2759_v62, %v2759_v62 }
 0x138   : > { %1354 = vmatpush2.bf16.msra.mxu0 %v804_v41  ;;  %v559_v41 = vld [vmem:[%s2577_s23 + $0x378] sm:$0xff] }
 0x139   : > { %1395 = vmatpush2.bf16.msra.mxu1 %v836_v42  ;;  %1355 = vmatprep.subr.bf16.mxu0 %v803_v43  ;;  %v575_v42 = vld [vmem:[%s2577_s23 + $0x3f8] sm:$0xff]  ;;  %v848_v43 = vunpack.c.l.s8.bf16 %v544_v34  ;;  %v877_v53 = vunpack.c.l.s8.bf16 %v559_v41  ;;  %v598_v34 = vld [vmem:[%s2577_s23 + $0x4b0] sm:$0xff] }
 0x13a   : > { %1396 = vmatprep.subr.bf16.mxu1 %v835_v45  ;;  %v879_v45 = vunpack.c.h.s8.bf16 %v559_v41  ;;  %v909_v54 = vunpack.c.l.s8.bf16 %v575_v42 }
 0x13c   : > { %1356 = vmatpush2.bf16.msra.mxu0 %v802_v49  ;;  %v911_v49 = vunpack.c.h.s8.bf16 %v575_v42 }
 0x13d   : > { %1397 = vmatpush2.bf16.msra.mxu1 %v834_v50  ;;  %1357 = vmatprep.subr.bf16.mxu0 %v801_v51  ;;  %v574_v50 = vld [vmem:[%s2577_s23 + $0x3f0] sm:$0xff]  ;;  %v878_v51 = vunpack.c.h.s8.bf16 %v558_v46 }
 0x13e   : > { %1398 = vmatprep.subr.bf16.mxu1 %v833_v52  ;;  %v910_v52 = vunpack.c.h.s8.bf16 %v574_v50  ;;  %v908_v56 = vunpack.c.l.s8.bf16 %v574_v50 }
 0x140   : > { %1358 = vmatpush2.bf16.msra.mxu0 %v800_v31  ;;  %v557_v31 = vld [vmem:[%s2577_s23 + $0x368] sm:$0xff] }
 0x141   : > { %1399 = vmatpush2.bf16.msra.mxu1 %v832_v32  ;;  %1409 = vmatprep.subr.bf16.mxu0 %v863_v55  ;;  %v573_v32 = vld [vmem:[%s2577_s23 + $0x3e8] sm:$0xff]  ;;  %v876_v55 = vunpack.c.l.s8.bf16 %v558_v46 }
 0x142   : > { %1450 = vmatprep.subr.bf16.mxu1 %v895_v57  ;;  %v875_v57 = vunpack.c.h.s8.bf16 %v557_v31 }
 0x143   : > { %1360 = vmatmul.mubr.bf16.vlgmr.msra.gmra.mxu0 %v1962_v59  ;;  %v907_v59 = vunpack.c.h.s8.bf16 %v573_v32 }
 0x144   : > { %1401 = vmatmul.mubr.bf16.vlgmr.msra.gmra.mxu1 %v1964_v60  ;;  %1410 = vmatpush1.bf16.msra.mxu0 %v862_v63  ;;  %v572_v60 = vld [vmem:[%s2577_s23 + $0x3e0] sm:$0xff]  ;;  %v874_v63 = vunpack.c.h.s8.bf16 %v556_v58 }
 0x145   : > { %1451 = vmatpush1.bf16.msra.mxu1 %v894_v0  ;;  %1411 = vmatprep.subr.bf16.mxu0 %v861_v1  ;;  %v906_v0 = vunpack.c.h.s8.bf16 %v572_v60  ;;  %v873_v1 = vunpack.c.l.s8.bf16 %v557_v31  ;;  %v580_v31 = vld [vmem:[%s2577_s23 + $0x420] sm:$0xff] }
 0x146   : > { %1452 = vmatprep.subr.bf16.mxu1 %v893_v2  ;;  %1441 = vmatprep.mubr.bf16.mxu0 %v1967_v21  ;;  %v905_v2 = vunpack.c.l.s8.bf16 %v573_v32  ;;  %v872_v21 = vunpack.c.l.s8.bf16 %v556_v58 }
 0x147   : > { %1482 = vmatprep.mubr.bf16.mxu1 %v1969_v22  ;;  %v904_v22 = vunpack.c.l.s8.bf16 %v572_v60 }
 0x148   : > { %1412 = vmatpush1.bf16.msra.mxu0 %v860_v5  ;;  %v871_v5 = vunpack.c.h.s8.bf16 %v555_v3 }
 0x149   : > { %1453 = vmatpush1.bf16.msra.mxu1 %v892_v6  ;;  %1413 = vmatprep.subr.bf16.mxu0 %v859_v7  ;;  %v554_v6 = vld [vmem:[%s2577_s23 + $0x350] sm:$0xff]  ;;  %v903_v7 = vunpack.c.h.s8.bf16 %v571_v4 }
 0x14a   : > { %1454 = vmatprep.subr.bf16.mxu1 %v891_v9  ;;  %v870_v9 = vunpack.c.h.s8.bf16 %v554_v6  ;;  %v868_v15 = vunpack.c.l.s8.bf16 %v554_v6  ;;  %v578_v6 = vld [vmem:[%s2577_s23 + $0x410] sm:$0xff] }
 0x14c   : > { %1414 = vmatpush1.bf16.msra.mxu0 %v858_v11  ;;  %v869_v11 = vunpack.c.l.s8.bf16 %v555_v3  ;;  %v579_v3 = vld [vmem:[%s2577_s23 + $0x418] sm:$0xff] }
 0x14d   : > { %1455 = vmatpush1.bf16.msra.mxu1 %v890_v12  ;;  %1415 = vmatprep.subr.bf16.mxu0 %v857_v13  ;;  %v901_v12 = vunpack.c.l.s8.bf16 %v571_v4  ;;  %v553_v13 = vld [vmem:[%s2577_s23 + $0x348] sm:$0xff]  ;;  %v595_v4 = vld [vmem:[%s2577_s23 + $0x498] sm:$0xff] }
 0x14e   : > { %1456 = vmatprep.subr.bf16.mxu1 %v889_v14  ;;  %v569_v14 = vld [vmem:[%s2577_s23 + $0x3c8] sm:$0xff] }
 0x150   : > { %1416 = vmatpush1.bf16.msra.mxu0 %v856_v17  ;;  %v867_v17 = vunpack.c.h.s8.bf16 %v553_v13 }
 0x151   : > { %1457 = vmatpush1.bf16.msra.mxu1 %v888_v18  ;;  %1417 = vmatprep.subr.bf16.mxu0 %v855_v19  ;;  %v552_v18 = vld [vmem:[%s2577_s23 + $0x340] sm:$0xff]  ;;  %v899_v19 = vunpack.c.h.s8.bf16 %v569_v14 }
 0x152   : > { %1458 = vmatprep.subr.bf16.mxu1 %v887_v23  ;;  %v866_v23 = vunpack.c.h.s8.bf16 %v552_v18  ;;  %v864_v47 = vunpack.c.l.s8.bf16 %v552_v18  ;;  %v576_v18 = vld [vmem:[%s2577_s23 + $0x400] sm:$0xff] }
 0x154   : > { %1418 = vmatpush1.bf16.msra.mxu0 %v854_v25  ;;  %v865_v25 = vunpack.c.l.s8.bf16 %v553_v13  ;;  %v577_v13 = vld [vmem:[%s2577_s23 + $0x408] sm:$0xff] }
 0x155   : > { %1459 = vmatpush1.bf16.msra.mxu1 %v886_v26  ;;  %1419 = vmatprep.subr.bf16.mxu0 %v853_v27  ;;  %v897_v26 = vunpack.c.l.s8.bf16 %v569_v14  ;;  %v583_v27 = vld [vmem:[%s2577_s23 + $0x438] sm:$0xff]  ;;  %v593_v14 = vld [vmem:[%s2577_s23 + $0x488] sm:$0xff] }
 0x156   : > { %1460 = vmatprep.subr.bf16.mxu1 %v885_v28  ;;  %v599_v28 = vld [vmem:[%s2577_s23 + $0x4b8] sm:$0xff]  ;;  %v925_v41 = vunpack.c.l.s8.bf16 %v583_v27 }
 0x157   : > { %v957_v42 = vunpack.c.l.s8.bf16 %v599_v28 }
 0x158   : > { %1420 = vmatpush1.bf16.msra.mxu0 %v852_v29  ;;  %v927_v29 = vunpack.c.h.s8.bf16 %v583_v27  ;;  %v591_v27 = vld [vmem:[%s2577_s23 + $0x478] sm:$0xff] }
 0x159   : > { %1461 = vmatpush1.bf16.msra.mxu1 %v884_v30  ;;  %1421 = vmatprep.subr.bf16.mxu0 %v851_v33  ;;  %v582_v30 = vld [vmem:[%s2577_s23 + $0x430] sm:$0xff]  ;;  %v959_v33 = vunpack.c.h.s8.bf16 %v599_v28  ;;  %v607_v28 = vld [vmem:[%s2577_s23 + $0x4f8] sm:$0xff] }
 0x15a   : > { %1462 = vmatprep.subr.bf16.mxu1 %v883_v35  ;;  %v1966_v35 = vcombine.low %v2756_v61, %v2756_v61  ;;  %v924_v50 = vunpack.c.l.s8.bf16 %v582_v30 }
 0x15c   : > { %1422 = vmatpush1.bf16.msra.mxu0 %v850_v37  ;;  %v2802_v37 = vld [vmem:[%s2610_s8 + $0x40] sm:$0xff] }
 0x15d   : > { %1463 = vmatpush1.bf16.msra.mxu1 %v882_v38  ;;  %1423 = vmatprep.subr.bf16.mxu0 %v849_v39  ;;  %v2805_v38 = vld [vmem:[%s2610_s8 + $0x48] sm:$0xff]  ;;  %v926_v39 = vunpack.c.h.s8.bf16 %v582_v30  ;;  %v1971_v61 = vcombine.high %v2802_v37, %v2802_v37  ;;  %v590_v30 = vld [vmem:[%s2577_s23 + $0x470] sm:$0xff] }
 0x15e   : > { %1464 = vmatprep.subr.bf16.mxu1 %v881_v40  ;;  %v958_v40 = vunpack.c.h.s8.bf16 %v598_v34  ;;  %v1973_v62 = vcombine.high %v2805_v38, %v2805_v38 }
 0x160   : > { %1424 = vmatpush1.bf16.msra.mxu0 %v848_v43  ;;  %v581_v43 = vld [vmem:[%s2577_s23 + $0x428] sm:$0xff] }
 0x161   : > { %1465 = vmatpush1.bf16.msra.mxu1 %v880_v44  ;;  %1425 = vmatprep.subr.bf16.mxu0 %v879_v45  ;;  %v597_v44 = vld [vmem:[%s2577_s23 + $0x4a8] sm:$0xff] }
 0x162   : > { %1466 = vmatprep.subr.bf16.mxu1 %v911_v49  ;;  %v955_v32 = vunpack.c.h.s8.bf16 %v597_v44 }
 0x164   : > { %1426 = vmatpush2.bf16.msra.mxu0 %v878_v51  ;;  %v956_v51 = vunpack.c.l.s8.bf16 %v598_v34  ;;  %v606_v34 = vld [vmem:[%s2577_s23 + $0x4f0] sm:$0xff] }
 0x165   : > { %1467 = vmatpush2.bf16.msra.mxu1 %v910_v52  ;;  %1427 = vmatprep.subr.bf16.mxu0 %v877_v53 }
 0x166   : > { %1468 = vmatprep.subr.bf16.mxu1 %v909_v54  ;;  %v923_v54 = vunpack.c.h.s8.bf16 %v581_v43 }
 0x168   : > { %1428 = vmatpush2.bf16.msra.mxu0 %v876_v55  ;;  %v596_v55 = vld [vmem:[%s2577_s23 + $0x4a0] sm:$0xff] }
 0x169   : > { %1469 = vmatpush2.bf16.msra.mxu1 %v908_v56  ;;  %1429 = vmatprep.subr.bf16.mxu0 %v875_v57  ;;  %v954_v60 = vunpack.c.h.s8.bf16 %v596_v55 }
 0x16a   : > { %1470 = vmatprep.subr.bf16.mxu1 %v907_v59  ;;  %v922_v59 = vunpack.c.h.s8.bf16 %v580_v31 }
 0x16c   : > { %1430 = vmatpush2.bf16.msra.mxu0 %v874_v63 }
 0x16d   : > { %1471 = vmatpush2.bf16.msra.mxu1 %v906_v0  ;;  %1431 = vmatprep.subr.bf16.mxu0 %v873_v1  ;;  %v921_v0 = vunpack.c.l.s8.bf16 %v581_v43  ;;  %v953_v1 = vunpack.c.l.s8.bf16 %v597_v44  ;;  %v940_v43 = vunpack.c.l.s8.bf16 %v590_v30  ;;  %v972_v44 = vunpack.c.l.s8.bf16 %v606_v34 }
 0x16e   : > { %1472 = vmatprep.subr.bf16.mxu1 %v905_v2 }
 0x170   : > { %1432 = vmatpush2.bf16.msra.mxu0 %v872_v21  ;;  %v920_v21 = vunpack.c.l.s8.bf16 %v580_v31  ;;  %v603_v31 = vld [vmem:[%s2577_s23 + $0x4d8] sm:$0xff] }
 0x171   : > { %1473 = vmatpush2.bf16.msra.mxu1 %v904_v22  ;;  %1433 = vmatprep.subr.bf16.mxu0 %v871_v5  ;;  %v952_v22 = vunpack.c.l.s8.bf16 %v596_v55  ;;  %v919_v5 = vunpack.c.h.s8.bf16 %v579_v3 }
 0x172   : > { %1474 = vmatprep.subr.bf16.mxu1 %v903_v7  ;;  %v951_v7 = vunpack.c.h.s8.bf16 %v595_v4 }
 0x174   : > { %1434 = vmatpush2.bf16.msra.mxu0 %v870_v9  ;;  %v918_v9 = vunpack.c.h.s8.bf16 %v578_v6 }
 0x175   : > { %1475 = vmatpush2.bf16.msra.mxu1 %v902_v10  ;;  %1435 = vmatprep.subr.bf16.mxu0 %v869_v11  ;;  %v950_v10 = vunpack.c.h.s8.bf16 %v594_v8  ;;  %v917_v11 = vunpack.c.l.s8.bf16 %v579_v3  ;;  %v585_v3 = vld [vmem:[%s2577_s23 + $0x448] sm:$0xff] }
 0x176   : > { %1476 = vmatprep.subr.bf16.mxu1 %v901_v12  ;;  %v949_v12 = vunpack.c.l.s8.bf16 %v595_v4  ;;  %v601_v4 = vld [vmem:[%s2577_s23 + $0x4c8] sm:$0xff] }
 0x178   : > { %1436 = vmatpush2.bf16.msra.mxu0 %v868_v15  ;;  %v916_v15 = vunpack.c.l.s8.bf16 %v578_v6  ;;  %v584_v6 = vld [vmem:[%s2577_s23 + $0x440] sm:$0xff] }
 0x179   : > { %1477 = vmatpush2.bf16.msra.mxu1 %v900_v16  ;;  %1437 = vmatprep.subr.bf16.mxu0 %v867_v17  ;;  %v948_v16 = vunpack.c.l.s8.bf16 %v594_v8  ;;  %v915_v17 = vunpack.c.h.s8.bf16 %v577_v13  ;;  %v600_v8 = vld [vmem:[%s2577_s23 + $0x4c0] sm:$0xff] }
 0x17a   : > { %1478 = vmatprep.subr.bf16.mxu1 %v899_v19  ;;  %v947_v19 = vunpack.c.h.s8.bf16 %v593_v14 }
 0x17c   : > { %1438 = vmatpush2.bf16.msra.mxu0 %v866_v23  ;;  %v914_v23 = vunpack.c.h.s8.bf16 %v576_v18 }
 0x17d   : > { %1479 = vmatpush2.bf16.msra.mxu1 %v898_v24  ;;  %1439 = vmatprep.subr.bf16.mxu0 %v865_v25  ;;  %v946_v24 = vunpack.c.h.s8.bf16 %v592_v20  ;;  %v913_v25 = vunpack.c.l.s8.bf16 %v577_v13  ;;  %v615_v13 = vld [vmem:[%s2577_s23 + $0x538] sm:$0xff] }
 0x17e   : > { %1480 = vmatprep.subr.bf16.mxu1 %v897_v26  ;;  %v945_v26 = vunpack.c.l.s8.bf16 %v593_v14  ;;  %v631_v14 = vld [vmem:[%s2577_s23 + $0x5b8] sm:$0xff] }
 0x180   : > { %1440 = vmatpush2.bf16.msra.mxu0 %v864_v47  ;;  %v912_v47 = vunpack.c.l.s8.bf16 %v576_v18  ;;  %v614_v18 = vld [vmem:[%s2577_s23 + $0x530] sm:$0xff] }
 0x181   : > { %1481 = vmatpush2.bf16.msra.mxu1 %v896_v48  ;;  %1491 = vmatprep.subr.bf16.mxu0 %v927_v29  ;;  %v944_v48 = vunpack.c.l.s8.bf16 %v592_v20  ;;  %v943_v29 = vunpack.c.h.s8.bf16 %v591_v27  ;;  %v630_v20 = vld [vmem:[%s2577_s23 + $0x5b0] sm:$0xff] }
 0x182   : > { %1532 = vmatprep.subr.bf16.mxu1 %v959_v33  ;;  %v975_v33 = vunpack.c.h.s8.bf16 %v607_v28 }
 0x183   : > { %v1197_v45 = vpop.f32.mrf.mxu0  ;;  %1442 = vmatmul.mubr.bf16.vlgmr.msra.gmra.mxu0 %v1966_v35  ;;  %v942_v35 = vunpack.c.h.s8.bf16 %v590_v30  ;;  %v629_v30 = vld [vmem:[%s2577_s23 + $0x5a8] sm:$0xff] }
 0x184   : > { %v1238_v46 = vpop.f32.mrf.mxu1  ;;  %1483 = vmatmul.mubr.bf16.vlgmr.msra.gmra.mxu1 %v1968_v36  ;;  %1492 = vmatpush1.bf16.msra.mxu0 %v926_v39  ;;  %v974_v36 = vunpack.c.h.s8.bf16 %v606_v34  ;;  %v941_v39 = vunpack.c.l.s8.bf16 %v591_v27  ;;  %v990_v27 = vunpack.c.h.s8.bf16 %v614_v18 }
 0x185   : > { %v2813_v49 = vadd.f32 %v1238_v46, %v1197_v45  ;;  %1533 = vmatpush1.bf16.msra.mxu1 %v958_v40  ;;  %v1199_v52 = vpop.f32.mrf.mxu0  ;;  %1493 = vmatprep.subr.bf16.mxu0 %v925_v41  ;;  %v973_v40 = vunpack.c.l.s8.bf16 %v607_v28  ;;  %v589_v41 = vld [vmem:[%s2577_s23 + $0x468] sm:$0xff]  ;;  %v604_v46 = vld [vmem:[%s2577_s23 + $0x4e0] sm:$0xff]  ;;  %v1022_v28 = vunpack.c.h.s8.bf16 %v630_v20 }
 0x186   : > { %v1240_v53 = vpop.f32.mrf.mxu1  ;;  %1534 = vmatprep.subr.bf16.mxu1 %v957_v42  ;;  %1523 = vmatprep.mubr.bf16.mxu0 %v1971_v61  ;;  %v605_v42 = vld [vmem:[%s2577_s23 + $0x4e8] sm:$0xff]  ;;  %v939_v61 = vunpack.c.h.s8.bf16 %v589_v41  ;;  %v968_v55 = vunpack.c.l.s8.bf16 %v604_v46 }
 0x187   : > { %v2817_v56 = vadd.f32 %v1240_v53, %v1199_v52  ;;  %1564 = vmatprep.mubr.bf16.mxu1 %v1973_v62  ;;  %v1201_v57 = vpop.f32.mrf.mxu0  ;;  %v588_v62 = vld [vmem:[%s2577_s23 + $0x460] sm:$0xff]  ;;  %v971_v45 = vunpack.c.h.s8.bf16 %v605_v42  ;;  %v937_v52 = vunpack.c.l.s8.bf16 %v589_v41  ;;  %v969_v53 = vunpack.c.l.s8.bf16 %v605_v42 }
 0x188   : > { %v1242_v58 = vpop.f32.mrf.mxu1  ;;  %1494 = vmatpush1.bf16.msra.mxu0 %v924_v50  ;;  %v938_v50 = vunpack.c.h.s8.bf16 %v588_v62 }
 0x189   : > { %1535 = vmatpush1.bf16.msra.mxu1 %v956_v51  ;;  %v1202_v63 = vpop.f32.mrf.mxu0  ;;  %1495 = vmatprep.subr.bf16.mxu0 %v923_v54  ;;  %v970_v51 = vunpack.c.h.s8.bf16 %v604_v46  ;;  %v587_v54 = vld [vmem:[%s2577_s23 + $0x458] sm:$0xff]  ;;  %v586_v58 = vld [vmem:[%s2577_s23 + $0x450] sm:$0xff] }
 0x18a   : > { %1536 = vmatprep.subr.bf16.mxu1 %v955_v32  ;;  %v1243_v2 = vpop.f32.mrf.mxu1  ;;  %v936_v32 = vunpack.c.l.s8.bf16 %v588_v62  ;;  %v935_v57 = vunpack.c.h.s8.bf16 %v587_v54  ;;  %v934_v63 = vunpack.c.h.s8.bf16 %v586_v58 }
 0x18b   : > { %v965_v2 = vunpack.c.l.s8.bf16 %v603_v31 }
 0x18c   : > { %1496 = vmatpush1.bf16.msra.mxu0 %v922_v59  ;;  %v967_v59 = vunpack.c.h.s8.bf16 %v603_v31 }
 0x18d   : > { %1537 = vmatpush1.bf16.msra.mxu1 %v954_v60  ;;  %1497 = vmatprep.subr.bf16.mxu0 %v921_v0  ;;  %v602_v60 = vld [vmem:[%s2577_s23 + $0x4d0] sm:$0xff] }
 0x18e   : > { %1538 = vmatprep.subr.bf16.mxu1 %v953_v1  ;;  %v966_v0 = vunpack.c.h.s8.bf16 %v602_v60  ;;  %v933_v1 = vunpack.c.l.s8.bf16 %v587_v54  ;;  %v1017_v54 = vunpack.c.l.s8.bf16 %v629_v30 }
 0x190   : > { %1498 = vmatpush1.bf16.msra.mxu0 %v920_v21  ;;  %v932_v21 = vunpack.c.l.s8.bf16 %v586_v58 }
 0x191   : > { %1539 = vmatpush1.bf16.msra.mxu1 %v952_v22  ;;  %1499 = vmatprep.subr.bf16.mxu0 %v919_v5  ;;  %v964_v22 = vunpack.c.l.s8.bf16 %v602_v60  ;;  %v931_v5 = vunpack.c.h.s8.bf16 %v585_v3  ;;  %v610_v60 = vld [vmem:[%s2577_s23 + $0x510] sm:$0xff] }
 0x192   : > { %1540 = vmatprep.subr.bf16.mxu1 %v951_v7  ;;  %v963_v7 = vunpack.c.h.s8.bf16 %v601_v4 }
 0x194   : > { %1500 = vmatpush1.bf16.msra.mxu0 %v918_v9  ;;  %v930_v9 = vunpack.c.h.s8.bf16 %v584_v6 }
 0x195   : > { %1541 = vmatpush1.bf16.msra.mxu1 %v950_v10  ;;  %1501 = vmatprep.subr.bf16.mxu0 %v917_v11  ;;  %v962_v10 = vunpack.c.h.s8.bf16 %v600_v8  ;;  %v929_v11 = vunpack.c.l.s8.bf16 %v585_v3 }
 0x196   : > { %1542 = vmatprep.subr.bf16.mxu1 %v949_v12  ;;  %v961_v12 = vunpack.c.l.s8.bf16 %v601_v4 }
 0x198   : > { %1502 = vmatpush1.bf16.msra.mxu0 %v916_v15  ;;  %v928_v15 = vunpack.c.l.s8.bf16 %v584_v6 }
 0x199   : > { %1543 = vmatpush1.bf16.msra.mxu1 %v948_v16  ;;  %1503 = vmatprep.subr.bf16.mxu0 %v915_v17  ;;  %v960_v16 = vunpack.c.l.s8.bf16 %v600_v8  ;;  %v991_v17 = vunpack.c.h.s8.bf16 %v615_v13  ;;  %v608_v8 = vld [vmem:[%s2577_s23 + $0x500] sm:$0xff] }
 0x19a   : > { %1544 = vmatprep.subr.bf16.mxu1 %v947_v19  ;;  %v1023_v19 = vunpack.c.h.s8.bf16 %v631_v14 }
 0x19c   : > { %1504 = vmatpush1.bf16.msra.mxu0 %v914_v23  ;;  %v1970_v23 = vcombine.low %v2802_v37, %v2802_v37 }
 0x19d   : > { %1545 = vmatpush1.bf16.msra.mxu1 %v946_v24  ;;  %1505 = vmatprep.subr.bf16.mxu0 %v913_v25  ;;  %v1972_v24 = vcombine.low %v2805_v38, %v2805_v38  ;;  %v2852_v25 = vld [vmem:[%s2610_s8 + $0x50] sm:$0xff] }
 0x19e   : > { %1546 = vmatprep.subr.bf16.mxu1 %v945_v26  ;;  %v2855_v26 = vld [vmem:[%s2610_s8 + $0x58] sm:$0xff]  ;;  %v1975_v37 = vcombine.high %v2852_v25, %v2852_v25 }
 0x19f   : > { %v1977_v38 = vcombine.high %v2855_v26, %v2855_v26 }
 0x1a0   : > { %1506 = vmatpush1.bf16.msra.mxu0 %v912_v47  ;;  %v989_v47 = vunpack.c.l.s8.bf16 %v615_v13 }
 0x1a1   : > { %1547 = vmatpush1.bf16.msra.mxu1 %v944_v48  ;;  %1507 = vmatprep.subr.bf16.mxu0 %v943_v29  ;;  %v1021_v48 = vunpack.c.l.s8.bf16 %v631_v14  ;;  %v613_v29 = vld [vmem:[%s2577_s23 + $0x528] sm:$0xff] }
 0x1a2   : > { %1548 = vmatprep.subr.bf16.mxu1 %v975_v33  ;;  %v987_v42 = vunpack.c.h.s8.bf16 %v613_v29 }
 0x1a4   : > { %1508 = vmatpush2.bf16.msra.mxu0 %v942_v35 }
 0x1a5   : > { %1549 = vmatpush2.bf16.msra.mxu1 %v974_v36  ;;  %1509 = vmatprep.subr.bf16.mxu0 %v941_v39  ;;  %v988_v36 = vunpack.c.l.s8.bf16 %v614_v18  ;;  %v1020_v39 = vunpack.c.l.s8.bf16 %v630_v20  ;;  %v622_v20 = vld [vmem:[%s2577_s23 + $0x570] sm:$0xff] }
 0x1a6   : > { %1550 = vmatprep.subr.bf16.mxu1 %v973_v40 }
 0x1a8   : > { %1510 = vmatpush2.bf16.msra.mxu0 %v940_v43  ;;  %v612_v43 = vld [vmem:[%s2577_s23 + $0x520] sm:$0xff] }
 0x1a9   : > { %1551 = vmatpush2.bf16.msra.mxu1 %v972_v44  ;;  %1511 = vmatprep.subr.bf16.mxu0 %v939_v61  ;;  %v1019_v44 = vunpack.c.h.s8.bf16 %v629_v30  ;;  %v628_v61 = vld [vmem:[%s2577_s23 + $0x5a0] sm:$0xff]  ;;  %v637_v30 = vld [vmem:[%s2577_s23 + $0x5e8] sm:$0xff] }
 0x1aa   : > { %1552 = vmatprep.subr.bf16.mxu1 %v971_v45  ;;  %v1016_v58 = vunpack.c.l.s8.bf16 %v628_v61 }
 0x1ac   : > { %1512 = vmatpush2.bf16.msra.mxu0 %v938_v50 }
 0x1ad   : > { %1553 = vmatpush2.bf16.msra.mxu1 %v970_v51  ;;  %1513 = vmatprep.subr.bf16.mxu0 %v937_v52  ;;  %v986_v51 = vunpack.c.h.s8.bf16 %v612_v43  ;;  %v1018_v52 = vunpack.c.h.s8.bf16 %v628_v61 }
 0x1ae   : > { %1554 = vmatprep.subr.bf16.mxu1 %v969_v53 }
 0x1b0   : > { %1514 = vmatpush2.bf16.msra.mxu0 %v936_v32  ;;  %v611_v32 = vld [vmem:[%s2577_s23 + $0x518] sm:$0xff] }
 0x1b1   : > { %1555 = vmatpush2.bf16.msra.mxu1 %v968_v55  ;;  %1515 = vmatprep.subr.bf16.mxu0 %v935_v57  ;;  %v627_v55 = vld [vmem:[%s2577_s23 + $0x598] sm:$0xff]  ;;  %v984_v57 = vunpack.c.l.s8.bf16 %v612_v43  ;;  %v981_v3 = vunpack.c.l.s8.bf16 %v611_v32 }
 0x1b2   : > { %1556 = vmatprep.subr.bf16.mxu1 %v967_v59  ;;  %v983_v59 = vunpack.c.h.s8.bf16 %v611_v32  ;;  %v1013_v4 = vunpack.c.l.s8.bf16 %v627_v55  ;;  %v619_v43 = vld [vmem:[%s2577_s23 + $0x558] sm:$0xff]  ;;  %v617_v32 = vld [vmem:[%s2577_s23 + $0x548] sm:$0xff] }
 0x1b4   : > { %1516 = vmatpush2.bf16.msra.mxu0 %v934_v63  ;;  %v1015_v63 = vunpack.c.h.s8.bf16 %v627_v55  ;;  %v633_v55 = vld [vmem:[%s2577_s23 + $0x5c8] sm:$0xff] }
 0x1b5   : > { %1557 = vmatpush2.bf16.msra.mxu1 %v966_v0  ;;  %1517 = vmatprep.subr.bf16.mxu0 %v933_v1  ;;  %v626_v0 = vld [vmem:[%s2577_s23 + $0x590] sm:$0xff]  ;;  %v982_v1 = vunpack.c.h.s8.bf16 %v610_v60 }
 0x1b6   : > { %1558 = vmatprep.subr.bf16.mxu1 %v965_v2  ;;  %v1014_v2 = vunpack.c.h.s8.bf16 %v626_v0  ;;  %v1012_v6 = vunpack.c.l.s8.bf16 %v626_v0  ;;  %v632_v0 = vld [vmem:[%s2577_s23 + $0x5c0] sm:$0xff] }
 0x1b8   : > { %1518 = vmatpush2.bf16.msra.mxu0 %v932_v21  ;;  %v609_v21 = vld [vmem:[%s2577_s23 + $0x508] sm:$0xff] }
 0x1b9   : > { %1559 = vmatpush2.bf16.msra.mxu1 %v964_v22  ;;  %1519 = vmatprep.subr.bf16.mxu0 %v931_v5  ;;  %v625_v22 = vld [vmem:[%s2577_s23 + $0x588] sm:$0xff]  ;;  %v980_v5 = vunpack.c.l.s8.bf16 %v610_v60  ;;  %v977_v13 = vunpack.c.l.s8.bf16 %v609_v21  ;;  %v616_v60 = vld [vmem:[%s2577_s23 + $0x540] sm:$0xff] }
 0x1ba   : > { %1560 = vmatprep.subr.bf16.mxu1 %v963_v7  ;;  %v979_v7 = vunpack.c.h.s8.bf16 %v609_v21  ;;  %v1009_v14 = vunpack.c.l.s8.bf16 %v625_v22  ;;  %v647_v21 = vld [vmem:[%s2577_s23 + $0x638] sm:$0xff] }
 0x1bc   : > { %1520 = vmatpush2.bf16.msra.mxu0 %v930_v9  ;;  %v1011_v9 = vunpack.c.h.s8.bf16 %v625_v22  ;;  %v992_v22 = vunpack.c.l.s8.bf16 %v616_v60 }
 0x1bd   : > { %1561 = vmatpush2.bf16.msra.mxu1 %v962_v10  ;;  %1521 = vmatprep.subr.bf16.mxu0 %v929_v11  ;;  %v624_v10 = vld [vmem:[%s2577_s23 + $0x580] sm:$0xff]  ;;  %v978_v11 = vunpack.c.h.s8.bf16 %v608_v8 }
 0x1be   : > { %1562 = vmatprep.subr.bf16.mxu1 %v961_v12  ;;  %v1010_v12 = vunpack.c.h.s8.bf16 %v624_v10  ;;  %v1008_v18 = vunpack.c.l.s8.bf16 %v624_v10  ;;  %v1976_v10 = vcombine.low %v2855_v26, %v2855_v26 }
 0x1c0   : > { %1522 = vmatpush2.bf16.msra.mxu0 %v928_v15  ;;  %v623_v15 = vld [vmem:[%s2577_s23 + $0x578] sm:$0xff] }
 0x1c1   : > { %1563 = vmatpush2.bf16.msra.mxu1 %v960_v16  ;;  %1573 = vmatprep.subr.bf16.mxu0 %v991_v17  ;;  %v639_v16 = vld [vmem:[%s2577_s23 + $0x5f8] sm:$0xff]  ;;  %v976_v17 = vunpack.c.l.s8.bf16 %v608_v8  ;;  %v2898_v8 = vld [vmem:[%s2610_s8 + $0x60] sm:$0xff] }
 0x1c2   : > { %1614 = vmatprep.subr.bf16.mxu1 %v1023_v19  ;;  %v1007_v19 = vunpack.c.h.s8.bf16 %v623_v15 }
 0x1c3   : > { %v1279_v33 = vpop.f32.mrf.mxu0  ;;  %1524 = vmatmul.mubr.bf16.vlgmr.msra.gmra.mxu0 %v1970_v23  ;;  %v1039_v23 = vunpack.c.h.s8.bf16 %v639_v16 }
 0x1c4   : > { %v1320_v34 = vpop.f32.mrf.mxu1  ;;  %1565 = vmatmul.mubr.bf16.vlgmr.msra.gmra.mxu1 %v1972_v24  ;;  %v1280_v35 = vadd.f32 %v1279_v33, %v2813_v49  ;;  %1574 = vmatpush1.bf16.msra.mxu0 %v990_v27  ;;  %v638_v24 = vld [vmem:[%s2577_s23 + $0x5f0] sm:$0xff]  ;;  %v1006_v27 = vunpack.c.h.s8.bf16 %v622_v20 }
 0x1c5   : > { %1615 = vmatpush1.bf16.msra.mxu1 %v1022_v28  ;;  %v1281_v40 = vpop.f32.mrf.mxu0  ;;  %1575 = vmatprep.subr.bf16.mxu0 %v989_v47  ;;  %v1038_v28 = vunpack.c.h.s8.bf16 %v638_v24  ;;  %v1005_v47 = vunpack.c.l.s8.bf16 %v623_v15 }
 0x1c6   : > { %v1322_v41 = vpop.f32.mrf.mxu1  ;;  %1616 = vmatprep.subr.bf16.mxu1 %v1021_v48  ;;  %v1282_v62 = vadd.f32 %v1281_v40, %v2817_v56  ;;  %v2867_v45 = vadd.f32 %v1320_v34, %v1280_v35  ;;  %1605 = vmatprep.mubr.bf16.mxu0 %v1975_v37  ;;  %v985_v56 = vunpack.c.l.s8.bf16 %v613_v29  ;;  %v1037_v48 = vunpack.c.l.s8.bf16 %v639_v16  ;;  %v621_v29 = vld [vmem:[%s2577_s23 + $0x568] sm:$0xff]  ;;  %v620_v34 = vld [vmem:[%s2577_s23 + $0x560] sm:$0xff] }
 0x1c7   : > { %1646 = vmatprep.mubr.bf16.mxu1 %v1977_v38  ;;  %v1283_v49 = vpop.f32.mrf.mxu0  ;;  %v1004_v37 = vunpack.c.l.s8.bf16 %v622_v20  ;;  %v1036_v38 = vunpack.c.l.s8.bf16 %v638_v24  ;;  %v1003_v33 = vunpack.c.h.s8.bf16 %v621_v29  ;;  %v1035_v35 = vunpack.c.h.s8.bf16 %v637_v30  ;;  %v644_v20 = vld [vmem:[%s2577_s23 + $0x620] sm:$0xff] }
 0x1c8   : > { %v1324_v46 = vpop.f32.mrf.mxu1  ;;  %v2869_v50 = vadd.f32 %v1322_v41, %v1282_v62  ;;  %1576 = vmatpush1.bf16.msra.mxu0 %v988_v36  ;;  %v636_v36 = vld [vmem:[%s2577_s23 + $0x5e0] sm:$0xff]  ;;  %v1001_v41 = vunpack.c.l.s8.bf16 %v621_v29  ;;  %v1000_v61 = vunpack.c.l.s8.bf16 %v620_v34  ;;  %v999_v49 = vunpack.c.h.s8.bf16 %v619_v43 }
 0x1c9   : > { %1617 = vmatpush1.bf16.msra.mxu1 %v1020_v39  ;;  %v1284_v53 = vpop.f32.mrf.mxu0  ;;  %1577 = vmatprep.subr.bf16.mxu0 %v987_v42  ;;  %v1002_v39 = vunpack.c.h.s8.bf16 %v620_v34  ;;  %v1034_v40 = vunpack.c.h.s8.bf16 %v636_v36  ;;  %v1033_v42 = vunpack.c.l.s8.bf16 %v637_v30  ;;  %v1032_v62 = vunpack.c.l.s8.bf16 %v636_v36  ;;  %v618_v46 = vld [vmem:[%s2577_s23 + $0x550] sm:$0xff]  ;;  %v641_v36 = vld [vmem:[%s2577_s23 + $0x608] sm:$0xff] }
 0x1ca   : > { %1618 = vmatprep.subr.bf16.mxu1 %v1019_v44  ;;  %v1325_v31 = vpop.f32.mrf.mxu1  ;;  %v635_v44 = vld [vmem:[%s2577_s23 + $0x5d8] sm:$0xff]  ;;  %v998_v53 = vunpack.c.h.s8.bf16 %v618_v46 }
 0x1cb   : > { %v1029_v31 = vunpack.c.l.s8.bf16 %v635_v44 }
 0x1cc   : > { %1578 = vmatpush1.bf16.msra.mxu0 %v986_v51  ;;  %v1031_v51 = vunpack.c.h.s8.bf16 %v635_v44  ;;  %v655_v44 = vld [vmem:[%s2577_s23 + $0x678] sm:$0xff] }
 0x1cd   : > { %1619 = vmatpush1.bf16.msra.mxu1 %v1018_v52  ;;  %1579 = vmatprep.subr.bf16.mxu0 %v985_v56  ;;  %v634_v52 = vld [vmem:[%s2577_s23 + $0x5d0] sm:$0xff] }
 0x1ce   : > { %1620 = vmatprep.subr.bf16.mxu1 %v1017_v54  ;;  %v1030_v56 = vunpack.c.h.s8.bf16 %v634_v52  ;;  %v997_v54 = vunpack.c.l.s8.bf16 %v619_v43  ;;  %v1041_v43 = vunpack.c.l.s8.bf16 %v641_v36 }
 0x1d0   : > { %1580 = vmatpush1.bf16.msra.mxu0 %v984_v57  ;;  %v996_v57 = vunpack.c.l.s8.bf16 %v618_v46 }
 0x1d1   : > { %1621 = vmatpush1.bf16.msra.mxu1 %v1016_v58  ;;  %1581 = vmatprep.subr.bf16.mxu0 %v983_v59  ;;  %v1028_v58 = vunpack.c.l.s8.bf16 %v634_v52  ;;  %v995_v59 = vunpack.c.h.s8.bf16 %v617_v32  ;;  %v653_v52 = vld [vmem:[%s2577_s23 + $0x668] sm:$0xff] }
 0x1d2   : > { %1622 = vmatprep.subr.bf16.mxu1 %v1015_v63  ;;  %v1027_v63 = vunpack.c.h.s8.bf16 %v633_v55 }
 0x1d4   : > { %1582 = vmatpush1.bf16.msra.mxu0 %v982_v1  ;;  %v994_v1 = vunpack.c.h.s8.bf16 %v616_v60 }
 0x1d5   : > { %1623 = vmatpush1.bf16.msra.mxu1 %v1014_v2  ;;  %1583 = vmatprep.subr.bf16.mxu0 %v981_v3  ;;  %v1026_v2 = vunpack.c.h.s8.bf16 %v632_v0  ;;  %v993_v3 = vunpack.c.l.s8.bf16 %v617_v32  ;;  %v1065_v32 = vunpack.c.l.s8.bf16 %v653_v52 }
 0x1d6   : > { %1624 = vmatprep.subr.bf16.mxu1 %v1013_v4  ;;  %v1025_v4 = vunpack.c.l.s8.bf16 %v633_v55  ;;  %v651_v55 = vld [vmem:[%s2577_s23 + $0x658] sm:$0xff] }
 0x1d8   : > { %1584 = vmatpush1.bf16.msra.mxu0 %v980_v5  ;;  %v1024_v5 = vunpack.c.l.s8.bf16 %v632_v0  ;;  %v649_v0 = vld [vmem:[%s2577_s23 + $0x648] sm:$0xff] }
 0x1d9   : > { %1625 = vmatpush1.bf16.msra.mxu1 %v1012_v6  ;;  %1585 = vmatprep.subr.bf16.mxu0 %v979_v7  ;;  %v1055_v6 = vunpack.c.h.s8.bf16 %v647_v21  ;;  %v646_v7 = vld [vmem:[%s2577_s23 + $0x630] sm:$0xff] }
 0x1da   : > { %1626 = vmatprep.subr.bf16.mxu1 %v1011_v9  ;;  %v1974_v9 = vcombine.low %v2852_v25, %v2852_v25  ;;  %v1052_v25 = vunpack.c.l.s8.bf16 %v646_v7 }
 0x1dc   : > { %1586 = vmatpush1.bf16.msra.mxu0 %v978_v11  ;;  %v1054_v11 = vunpack.c.h.s8.bf16 %v646_v7 }
 0x1dd   : > { %1627 = vmatpush1.bf16.msra.mxu1 %v1010_v12  ;;  %1587 = vmatprep.subr.bf16.mxu0 %v977_v13  ;;  %v1979_v12 = vcombine.high %v2898_v8, %v2898_v8  ;;  %v1053_v13 = vunpack.c.l.s8.bf16 %v647_v21  ;;  %v1057_v21 = vunpack.c.l.s8.bf16 %v649_v0 }
 0x1de   : > { %1628 = vmatprep.subr.bf16.mxu1 %v1009_v14  ;;  %v645_v14 = vld [vmem:[%s2577_s23 + $0x628] sm:$0xff] }
 0x1df   : > { %v1049_v29 = vunpack.c.l.s8.bf16 %v645_v14 }
 0x1e0   : > { %1588 = vmatpush1.bf16.msra.mxu0 %v976_v17 }
 0x1e1   : > { %1629 = vmatpush1.bf16.msra.mxu1 %v1008_v18  ;;  %1589 = vmatprep.subr.bf16.mxu0 %v1007_v19  ;;  %v1051_v19 = vunpack.c.h.s8.bf16 %v645_v14 }
 0x1e2   : > { %1630 = vmatprep.subr.bf16.mxu1 %v1039_v23 }
 0x1e4   : > { %1590 = vmatpush2.bf16.msra.mxu0 %v1006_v27 }
 0x1e5   : > { %1631 = vmatpush2.bf16.msra.mxu1 %v1038_v28  ;;  %1591 = vmatprep.subr.bf16.mxu0 %v1005_v47 }
 0x1e6   : > { %1632 = vmatprep.subr.bf16.mxu1 %v1037_v48 }
 0x1e8   : > { %1592 = vmatpush2.bf16.msra.mxu0 %v1004_v37  ;;  %v643_v37 = vld [vmem:[%s2577_s23 + $0x618] sm:$0xff] }
 0x1e9   : > { %1633 = vmatpush2.bf16.msra.mxu1 %v1036_v38  ;;  %1593 = vmatprep.subr.bf16.mxu0 %v1003_v33  ;;  %v1048_v38 = vunpack.c.l.s8.bf16 %v644_v20  ;;  %v642_v33 = vld [vmem:[%s2577_s23 + $0x610] sm:$0xff] }
 0x1ea   : > { %1634 = vmatprep.subr.bf16.mxu1 %v1035_v35  ;;  %v1046_v34 = vunpack.c.h.s8.bf16 %v642_v33  ;;  %v1045_v35 = vunpack.c.l.s8.bf16 %v643_v37 }
 0x1ec   : > { %1594 = vmatpush2.bf16.msra.mxu0 %v1002_v39  ;;  %v1044_v39 = vunpack.c.l.s8.bf16 %v642_v33 }
 0x1ed   : > { %1635 = vmatpush2.bf16.msra.mxu1 %v1034_v40  ;;  %1595 = vmatprep.subr.bf16.mxu0 %v1001_v41  ;;  %v1043_v40 = vunpack.c.h.s8.bf16 %v641_v36  ;;  %v640_v41 = vld [vmem:[%s2577_s23 + $0x600] sm:$0xff] }
 0x1ee   : > { %1636 = vmatprep.subr.bf16.mxu1 %v1033_v42  ;;  %v1042_v42 = vunpack.c.h.s8.bf16 %v640_v41 }
 0x1f0   : > { %1596 = vmatpush2.bf16.msra.mxu0 %v1000_v61  ;;  %v1040_v61 = vunpack.c.l.s8.bf16 %v640_v41  ;;  %v433_v41 = vld [vmem:[#allocation2] sm:$0xff] }
 0x1f1   : > { %1637 = vmatpush2.bf16.msra.mxu1 %v1032_v62  ;;  %1597 = vmatprep.subr.bf16.mxu0 %v999_v49  ;;  %v1071_v62 = vunpack.c.h.s8.bf16 %v655_v44  ;;  %v654_v49 = vld [vmem:[%s2577_s23 + $0x670] sm:$0xff] }
 0x1f2   : > { %1638 = vmatprep.subr.bf16.mxu1 %v1031_v51  ;;  %v1070_v46 = vunpack.c.h.s8.bf16 %v654_v49  ;;  %v1069_v51 = vunpack.c.l.s8.bf16 %v655_v44 }
 0x1f4   : > { %1598 = vmatpush2.bf16.msra.mxu0 %v998_v53  ;;  %v1068_v53 = vunpack.c.l.s8.bf16 %v654_v49 }
 0x1f5   : > { %1639 = vmatpush2.bf16.msra.mxu1 %v1030_v56  ;;  %1599 = vmatprep.subr.bf16.mxu0 %v997_v54  ;;  %v1067_v56 = vunpack.c.h.s8.bf16 %v653_v52  ;;  %v652_v54 = vld [vmem:[%s2577_s23 + $0x660] sm:$0xff] }
 0x1f6   : > { %1640 = vmatprep.subr.bf16.mxu1 %v1029_v31  ;;  %v1066_v31 = vunpack.c.h.s8.bf16 %v652_v54 }
 0x1f8   : > { %1600 = vmatpush2.bf16.msra.mxu0 %v996_v57  ;;  %v1064_v57 = vunpack.c.l.s8.bf16 %v652_v54 }
 0x1f9   : > { %1641 = vmatpush2.bf16.msra.mxu1 %v1028_v58  ;;  %1601 = vmatprep.subr.bf16.mxu0 %v995_v59  ;;  %v1063_v58 = vunpack.c.h.s8.bf16 %v651_v55  ;;  %v650_v59 = vld [vmem:[%s2577_s23 + $0x650] sm:$0xff] }
 0x1fa   : > { %1642 = vmatprep.subr.bf16.mxu1 %v1027_v63  ;;  %v1062_v60 = vunpack.c.h.s8.bf16 %v650_v59  ;;  %v1061_v63 = vunpack.c.l.s8.bf16 %v651_v55 }
 0x1fc   : > { %1602 = vmatpush2.bf16.msra.mxu0 %v994_v1  ;;  %v1060_v1 = vunpack.c.l.s8.bf16 %v650_v59 }
 0x1fd   : > { %1643 = vmatpush2.bf16.msra.mxu1 %v1026_v2  ;;  %1603 = vmatprep.subr.bf16.mxu0 %v993_v3  ;;  %v1059_v2 = vunpack.c.h.s8.bf16 %v649_v0  ;;  %v648_v3 = vld [vmem:[%s2577_s23 + $0x640] sm:$0xff] }
 0x1fe   : > { %1644 = vmatprep.subr.bf16.mxu1 %v1025_v4  ;;  %v1058_v4 = vunpack.c.h.s8.bf16 %v648_v3 }
 0x200   : > { %1604 = vmatpush2.bf16.msra.mxu0 %v992_v22  ;;  %v1056_v22 = vunpack.c.l.s8.bf16 %v648_v3 }
 0x201   : > { %1645 = vmatpush2.bf16.msra.mxu1 %v1024_v5  ;;  %1655 = vmatprep.subr.bf16.mxu0 %v1055_v6  ;;  %v1978_v5 = vcombine.low %v2898_v8, %v2898_v8 }
 0x203   : > { %v1361_v15 = vpop.f32.mrf.mxu0  ;;  %1606 = vmatmul.mubr.bf16.vlgmr.msra.gmra.mxu0 %v1974_v9 }
 0x204   : > { %v1402_v16 = vpop.f32.mrf.mxu1  ;;  %1647 = vmatmul.mubr.bf16.vlgmr.msra.gmra.mxu1 %v1976_v10  ;;  %v1362_v17 = vadd.f32 %v1361_v15, %v2867_v45  ;;  %1656 = vmatpush1.bf16.msra.mxu0 %v1054_v11  ;;  %v1050_v45 = vunpack.c.h.s8.bf16 %v644_v20 }
 0x205   : > { %1687 = vmatprep.mubr.bf16.mxu0 %v1979_v12  ;;  %v1363_v26 = vpop.f32.mrf.mxu0  ;;  %1657 = vmatprep.subr.bf16.mxu0 %v1053_v13 }
 0x206   : > { %v1404_v18 = vpop.f32.mrf.mxu1  ;;  %v1364_v23 = vadd.f32 %v1363_v26, %v2869_v50  ;;  %v2910_v24 = vadd.f32 %v1402_v16, %v1362_v17  ;;  %v1047_v50 = vunpack.c.h.s8.bf16 %v643_v37 }
 0x207   : > { %v1365_v27 = vpop.f32.mrf.mxu0 }
 0x208   : > { %v1406_v28 = vpop.f32.mrf.mxu1  ;;  %v2912_v47 = vadd.f32 %v1404_v18, %v1364_v23  ;;  %1658 = vmatpush1.bf16.msra.mxu0 %v1052_v25 }
 0x209   : > { %v1366_v48 = vpop.f32.mrf.mxu0  ;;  %1659 = vmatprep.subr.bf16.mxu0 %v1051_v19 }
 0x20a   : > { %v1407_v30 = vpop.f32.mrf.mxu1 }
 0x20c   : > { %1660 = vmatpush1.bf16.msra.mxu0 %v1050_v45 }
 0x20d   : > { %1661 = vmatprep.subr.bf16.mxu0 %v1049_v29 }
 0x210   : > { %1662 = vmatpush1.bf16.msra.mxu0 %v1048_v38 }
 0x211   : > { %1663 = vmatprep.subr.bf16.mxu0 %v1047_v50 }
 0x214   : > { %1664 = vmatpush1.bf16.msra.mxu0 %v1046_v34 }
 0x215   : > { %1665 = vmatprep.subr.bf16.mxu0 %v1045_v35 }
 0x218   : > { %1666 = vmatpush1.bf16.msra.mxu0 %v1044_v39 }
 0x219   : > { %1667 = vmatprep.subr.bf16.mxu0 %v1043_v40 }
 0x21c   : > { %1668 = vmatpush1.bf16.msra.mxu0 %v1042_v42 }
 0x21d   : > { %1669 = vmatprep.subr.bf16.mxu0 %v1041_v43 }
 0x220   : > { %1670 = vmatpush1.bf16.msra.mxu0 %v1040_v61  ;;  %v434_v61 = vld [vmem:[#allocation2 + $0x8] sm:$0xff] }
 0x221   : > { %1671 = vmatprep.subr.bf16.mxu0 %v1071_v62 }
 0x224   : > { %1672 = vmatpush2.bf16.msra.mxu0 %v1070_v46 }
 0x225   : > { %1673 = vmatprep.subr.bf16.mxu0 %v1069_v51 }
 0x228   : > { %1674 = vmatpush2.bf16.msra.mxu0 %v1068_v53 }
 0x229   : > { %1675 = vmatprep.subr.bf16.mxu0 %v1067_v56 }
 0x22c   : > { %1676 = vmatpush2.bf16.msra.mxu0 %v1066_v31 }
 0x22d   : > { %1677 = vmatprep.subr.bf16.mxu0 %v1065_v32 }
 0x230   : > { %1678 = vmatpush2.bf16.msra.mxu0 %v1064_v57 }
 0x231   : > { %1679 = vmatprep.subr.bf16.mxu0 %v1063_v58 }
 0x234   : > { %1680 = vmatpush2.bf16.msra.mxu0 %v1062_v60 }
 0x235   : > { %1681 = vmatprep.subr.bf16.mxu0 %v1061_v63 }
 0x238   : > { %1682 = vmatpush2.bf16.msra.mxu0 %v1060_v1 }
 0x239   : > { %1683 = vmatprep.subr.bf16.mxu0 %v1059_v2 }
 0x23c   : > { %1684 = vmatpush2.bf16.msra.mxu0 %v1058_v4 }
 0x23d   : > { %1685 = vmatprep.subr.bf16.mxu0 %v1057_v21 }
 0x240   : > { %1686 = vmatpush2.bf16.msra.mxu0 %v1056_v22 }
 0x243   : > { %v1443_v6 = vpop.f32.mrf.mxu0  ;;  %1688 = vmatmul.mubr.bf16.vlgmr.msra.gmra.mxu0 %v1978_v5 }
 0x244   : > { %v1484_v7 = vpop.f32.mrf.mxu1  ;;  %v1444_v9 = vadd.f32 %v1443_v6, %v2910_v24 }
 0x245   : > { %v1445_v10 = vpop.f32.mrf.mxu0 }
 0x246   : > { %v1486_v11 = vpop.f32.mrf.mxu1  ;;  %v1446_v12 = vadd.f32 %v1445_v10, %v2912_v47  ;;  %v1485_v13 = vadd.f32 %v1484_v7, %v1444_v9 }
 0x247   : > { %v1447_v14 = vpop.f32.mrf.mxu0 }
 0x248   : > { %v1488_v15 = vpop.f32.mrf.mxu1  ;;  %v1487_v16 = vadd.f32 %v1486_v11, %v1446_v12 }
 0x249   : > { %v1448_v17 = vpop.f32.mrf.mxu0 }
 0x24a   : > { %v1489_v25 = vpop.f32.mrf.mxu1 }
 0x283   : > { %v1525_v26 = vpop.f32.mrf.mxu0 }
 0x284   : > { %v1566_v18 = vpop.f32.mrf.mxu1  ;;  %v1526_v19 = vadd.f32 %v1525_v26, %v1485_v13 }
 0x285   : > { %v1527_v8 = vpop.f32.mrf.mxu0 }
 0x286   : > { %v1568_v20 = vpop.f32.mrf.mxu1  ;;  %v1528_v23 = vadd.f32 %v1527_v8, %v1487_v16  ;;  %v1567_v27 = vadd.f32 %v1566_v18, %v1526_v19 }
 0x287   : > { %v1529_v28 = vpop.f32.mrf.mxu0 }
 0x288   : > { %v1570_v45 = vpop.f32.mrf.mxu1  ;;  %v1569_v24 = vadd.f32 %v1568_v20, %v1528_v23 }
 0x289   : > { %v1530_v48 = vpop.f32.mrf.mxu0 }
 0x28a   : > { %v1571_v29 = vpop.f32.mrf.mxu1 }
 0x2c3   : > { %v1607_v30 = vpop.f32.mrf.mxu0 }
 0x2c4   : > { %v1648_v47 = vpop.f32.mrf.mxu1  ;;  %v1608_v36 = vadd.f32 %v1607_v30, %v1567_v27 }
 0x2c5   : > { %v1609_v37 = vpop.f32.mrf.mxu0 }
 0x2c6   : > { %v1650_v38 = vpop.f32.mrf.mxu1  ;;  %v1610_v39 = vadd.f32 %v1609_v37, %v1569_v24  ;;  %v1649_v40 = vadd.f32 %v1648_v47, %v1608_v36 }
 0x2c7   : > { %v1611_v50 = vpop.f32.mrf.mxu0 }
 0x2c8   : > { %v1652_v33 = vpop.f32.mrf.mxu1  ;;  %v1651_v43 = vadd.f32 %v1650_v38, %v1610_v39 }
 0x2c9   : > { %v1612_v34 = vpop.f32.mrf.mxu0 }
 0x2ca   : > { %v1653_v35 = vpop.f32.mrf.mxu1 }
 0x303   : > { %v1689_v42 = vpop.f32.mrf.mxu0 }
 0x304   : > { %v1690_v44 = vadd.f32 %v1689_v42, %v1649_v40 }
 0x305   : > { %v1691_v62 = vpop.f32.mrf.mxu0 }
 0x306   : > { %v1696_v49 = vadd.f32 %v1690_v44, %v433_v41  ;;  %v1692_v46 = vadd.f32 %v1691_v62, %v1651_v43  ;;  %1703 = sbr.rel (%p1980_p5) target bundleno = 949 (0x3b5), region = 64 }
 0x307   : > { %v1693_v51 = vpop.f32.mrf.mxu0 }
 0x308   : > { %1698 = vst [vmem:[#allocation2] sm:$0xff] %v1696_v49  ;;  %v1697_v52 = vadd.f32 %v1692_v46, %v434_v61 }
 0x309   : > { %v1694_v53 = vpop.f32.mrf.mxu0 }
 0x30a   : > { %1699 = vst [vmem:[#allocation2 + $0x8] sm:$0xff] %v1697_v52 }
 0x30b   : > { %v1708_v56 = vlaneseq  ;;  %v1706_v31 = vld [vmem:[%s334_s6] sm:$0x3]  ;;  %v1720_v32 = vld [vmem:[%s343_s11] sm:$0x3]  ;;  %v1736_v22 = vld [vmem:[%s352_s24] sm:$0x3] }
 0x30c   : > { %vm1753_vm0 = vcmask 7168  }
 0x30d   : > { %v1709_v54 = vshrl.u32 %v1708_v56, 7 }
 0x30f   : > { %v1710_v55 = vsub.s32 0, %v1709_v54  ;;  %v1714_v57 = vsub.s32 1, %v1709_v54  ;;  %v1704_v58 = vld [vmem:[#allocation2] sm:$0xff] }
 0x311   : > { %v1705_v59 = vld [vmem:[#allocation2 + $0x8] sm:$0xff]  ;;  %v1711_v60 = vrot.slane %v1706_v31, %v1710_v55  ;;  %v1715_v63 = vrot.slane %v1706_v31, %v1714_v57  ;;  %v1725_v0 = vrot.slane %v1720_v32, %v1710_v55  ;;  %v1729_v1 = vrot.slane %v1720_v32, %v1714_v57 }
 0x312   : > { %v1741_v5 = vrot.slane %v1736_v22, %v1710_v55  ;;  %v1745_v6 = vrot.slane %v1736_v22, %v1714_v57 }
 0x313   : > { %v1718_v2 = vmul.f32 %v1711_v60, %v1704_v58  ;;  %v1719_v3 = vmul.f32 %v1715_v63, %v1705_v59 }
 0x315   : > { %v1732_v4 = vadd.f32 %v1725_v0, %v1718_v2  ;;  %v1733_v21 = vadd.f32 %v1729_v1, %v1719_v3 }
 0x317   : > { %2129 = vtanh.f32 %v1732_v4 }
 0x318   : > { %2131 = vtanh.f32 %v1733_v21 }
 0x324   : > { %v2130_v7 = vpop.eup %2129 }
 0x325   : > { %v2132_v9 = vpop.eup %2131  ;;  %v1748_v10 = vmul.f32 %v2130_v7, %v1741_v5 }
 0x326   : > { %v1749_v11 = vmul.f32 %v2132_v9, %v1745_v6 }
 0x328   : > { %v1750_v12 = vadd.f32 %v1749_v11, %v1748_v10 }
 0x32a   : > { %1751 = vadd.xlane.f32.xlu0 %v1750_v12 }
 0x3b3   : > { %v1752_v13 = vpop.xlane.xlu0 %1751 }
 0x3b4   : > { %1754 = vst.msk [vmem:[%s2605_s17] sm:$0xff] %vm1753_vm0, %v1752_v13 }
 0x3b5 PF: > { %s24_s28 = sadd.s32 1, %s2343_s28   ;;  %s3014_s23 = sld [smem:[#allocation20_spill]] }
 0x3b6   : > { %p21_p6 = scmp.ge.s32.totalorder %s24_s28, 10   ;;  %s3015_s29 = sld [smem:[#allocation13_spill]] }
 0x3b7   : > { %s3016_s9 = sld [smem:[#allocation21_spill]]  ;;  %s3021_s18 = smov %s2307_s19 }
 0x3b8   : > { %s3017_s24 = sld [smem:[#allocation16_spill]]  ;;  %s3022_s19 = smov %s2311_s20 }
 0x3b9   : > { %s3018_s25 = sld [smem:[#allocation17_spill]]  ;;  %s3024_s21 = smov %s2319_s22 }
 0x3ba   : > { %s3019_s26 = sld [smem:[#allocation18_spill]]  ;;  %23 = sbr.rel (!%p21_p6) target bundleno = 15 (0xf), region = 128 }
 0x3bb   : > { %s3020_s27 = sld [smem:[#allocation19_spill]]  ;;  %s3023_s20 = smov %s3014_s23 }
 0x3bc   : > { %s3025_s22 = smov %s3015_s29 }
 0x3bd   : > { %s3026_s23 = smov %s3016_s9 }
 0x3bf   :  { %1780 = vsyncpa [#allocation4], 1 }
 0x3c0   :  { %1782 = vsyncpa [#allocation4 + $0x1], 1 }
 0x3c1   :  { %1783 = vsyncpa [#allocation6], 1 }
 0x3c2   :  { %1785 = vsyncpa [#allocation6 + $0x1], 1 }
 0x3c3   :  { %1786 = vsyncpa [#allocation9], 1 }
 0x3c4   :  { %1788 = vsyncpa [#allocation9 + $0x1], 1 }

</bundles_post_ra>
